<compile_context>
chip_gen: v7x
topology: tpu7x:2x2x1
jax: 0.10.0
libtpu: 0.0.40
codegen_flags: <defaults>
</compile_context>

<pallas_src>
import jax
import jax.numpy as jnp
from jax import lax
from jax.experimental import pallas as pl
from jax.experimental.pallas import tpu as pltpu

_NC = 21  # coefficients per face: 9 edge-fn + 3 z + 3 r + 3 g + 3 b


def _face_coefficients(face_verts_ndc, face_colors):
    """(N,F,3,3) verts + (N,F,3,3) colors -> (N, F*_NC) f32 linear-form coefficients.

    Every interpolated quantity q (barycentrics, z, r, g, b) becomes q = qx*xf + qy*yf + qc
    over pixel NDC coordinates, with 1/area folded in.  For degenerate faces (|area| <= 1e-8)
    inv = 0, so all barycentrics are 0 and the strict `> 0` inside test rejects every pixel.
    """
    fv = jnp.asarray(face_verts_ndc, jnp.float32)
    fc = jnp.asarray(face_colors, jnp.float32)
    x0, y0, z0 = fv[..., 0, 0], fv[..., 0, 1], fv[..., 0, 2]
    x1, y1, z1 = fv[..., 1, 0], fv[..., 1, 1], fv[..., 1, 2]
    x2, y2, z2 = fv[..., 2, 0], fv[..., 2, 1], fv[..., 2, 2]
    r0, g0, b0 = fc[..., 0, 0], fc[..., 0, 1], fc[..., 0, 2]
    r1, g1, b1 = fc[..., 1, 0], fc[..., 1, 1], fc[..., 1, 2]
    r2, g2, b2 = fc[..., 2, 0], fc[..., 2, 1], fc[..., 2, 2]

    area = (x1 - x0) * (y2 - y0) - (x2 - x0) * (y1 - y0)
    valid = jnp.abs(area) > 1e-8
    inv = jnp.where(valid, 1.0 / jnp.where(valid, area, 1.0), 0.0)

    e0x = (y1 - y2) * inv; e0y = (x2 - x1) * inv; e0c = (x1 * y2 - x2 * y1) * inv
    e1x = (y2 - y0) * inv; e1y = (x0 - x2) * inv; e1c = (x2 * y0 - x0 * y2) * inv
    e2x = (y0 - y1) * inv; e2y = (x1 - x0) * inv; e2c = (x0 * y1 - x1 * y0) * inv

    def lin(a0, a1, a2):
        return (e0x * a0 + e1x * a1 + e2x * a2,
                e0y * a0 + e1y * a1 + e2y * a2,
                e0c * a0 + e1c * a1 + e2c * a2)

    zx, zy, zc = lin(z0, z1, z2)
    rx, ry, rc = lin(r0, r1, r2)
    gx, gy, gc = lin(g0, g1, g2)
    bx, by, bc = lin(b0, b1, b2)

    coef = jnp.stack([e0x, e0y, e0c, e1x, e1y, e1c, e2x, e2y, e2c,
                      zx, zy, zc, rx, ry, rc, gx, gy, gc, bx, by, bc], axis=-1)  # (N, F, 21)
    N, F = coef.shape[:2]
    return coef.reshape(N, F * _NC)


def _make_raster_kernel(F, P, B):
    """Rasterize + shade B images per grid step.

    xf_ref / yf_ref : VMEM (P,128) pixel-center NDC coords, constant index_map (grid-resident).
    coef_ref        : SMEM (B, F*_NC) per-face linear-form coefficients for this step's images.
    out_ref         : VMEM (B, 4, P, 128) lane-dense NCHW channel planes, flat pixel = iy*W + ix.
    """
    unroll = True if F <= 16 else 8   # bounded unroll if the face count grows

    def kernel(xf_ref, yf_ref, coef_ref, out_ref):
        xf = xf_ref[...]              # (P,128), loaded once per step
        yf = yf_ref[...]

        for b in range(B):            # static Python loop: B images per grid step
            def face_body(f, carry):
                zbuf, racc, gacc, bacc = carry
                base = _NC * f

                def c(k):
                    # rank-0 SMEM scalar -> sreg-splat operand in the vector ops below
                    return coef_ref[b, base + k]

                e0x, e0y, e0c = c(0), c(1), c(2)
                e1x, e1y, e1c = c(3), c(4), c(5)
                e2x, e2y, e2c = c(6), c(7), c(8)
                zx, zy, zc = c(9), c(10), c(11)
                rx, ry, rc = c(12), c(13), c(14)
                gx, gy, gc = c(15), c(16), c(17)
                bx, by, bc = c(18), c(19), c(20)

                # full-width (P,128) vector work with scalar operands only
                ba0 = e0x * xf + e0y * yf + e0c
                ba1 = e1x * xf + e1y * yf + e1c
                ba2 = e2x * xf + e2y * yf + e2c
                pz = zx * xf + zy * yf + zc                       # interpolated depth
                inside = (ba0 > 0.0) & (ba1 > 0.0) & (ba2 > 0.0)
                take = inside & (pz >= 0.0) & (pz < zbuf)         # nearer & in front of camera

                rr = rx * xf + ry * yf + rc                       # TexturesVertex interpolation
                gg = gx * xf + gy * yf + gc
                bb = bx * xf + by * yf + bc

                zbuf = jnp.where(take, pz, zbuf)
                racc = jnp.where(take, rr, racc)
                gacc = jnp.where(take, gg, gacc)
                bacc = jnp.where(take, bb, bacc)
                return zbuf, racc, gacc, bacc

            init = (jnp.full((P, 128), 1e30, jnp.float32),        # z-buffer
                    jnp.ones((P, 128), jnp.float32),              # R (white background)
                    jnp.ones((P, 128), jnp.float32),              # G
                    jnp.ones((P, 128), jnp.float32))              # B
            zbuf, racc, gacc, bacc = lax.fori_loop(0, F, face_body, init, unroll=unroll)

            # alpha derived from the z-buffer after the loop (no alpha carry)
            aacc = jnp.where(zbuf < 1e30, jnp.float32(1.0), jnp.float32(0.0))

            # single deferred full-width store per channel plane
            out_ref[b, 0] = racc
            out_ref[b, 1] = gacc
            out_ref[b, 2] = bacc
            out_ref[b, 3] = aacc

    return kernel


def render_pallas(face_verts_ndc, face_colors, image_size, max_images_per_step=8):
    """face_verts_ndc, face_colors: (N, F, 3, 3) float32. Returns (N, H, W, 4) float32 (NHWC)."""
    N, F = face_verts_ndc.shape[:2]
    H = W = image_size
    assert (H * W) % 128 == 0, "lane-dense layout requires H*W to be a multiple of 128"
    P = (H * W) // 128
    # TODO(synk): once P grows past ~64 (image > ~90x90) the whole-image loop carries exceed the
    # 64-vreg file; add a pixel-tile grid axis (face loop innermost, pixel axis "parallel" so
    # both v7x TCs get work) before scaling the image size.

    # B images per grid step: largest divisor of N that is <= max_images_per_step
    B = 1
    for d in range(1, min(N, max_images_per_step) + 1):
        if N % d == 0:
            B = d

    coef = _face_coefficients(face_verts_ndc, face_colors)           # (N, F*_NC)

    # pixel-center NDC coordinates, built once in the wrapper (hoisted out of the kernel):
    # +X left / +Y up, pixel (0,0) top-left -> (+1,+1); flat pixel index = iy*W + ix.
    idx = jnp.arange(H * W, dtype=jnp.int32).reshape(P, 128)
    iy = (idx // W).astype(jnp.float32)
    ix = (idx % W).astype(jnp.float32)
    xf = ((W - 1.0 - ix) * 2.0 + 1.0) * (1.0 / W) - 1.0
    yf = ((H - 1.0 - iy) * 2.0 + 1.0) * (1.0 / H) - 1.0

    out = pl.pallas_call(
        _make_raster_kernel(F, P, B),
        out_shape=jax.ShapeDtypeStruct((N, 4, P, 128), jnp.float32),
        grid_spec=pltpu.PrefetchScalarGridSpec(
            num_scalar_prefetch=0,
            grid=(N // B,),
            in_specs=[
                pl.BlockSpec((P, 128), lambda n: (0, 0)),             # xf, grid-resident VMEM
                pl.BlockSpec((P, 128), lambda n: (0, 0)),             # yf, grid-resident VMEM
                pl.BlockSpec((B, F * _NC), lambda n: (n, 0),          # per-step SMEM coef rows
                             memory_space=pltpu.MemorySpace.SMEM),
            ],
            out_specs=pl.BlockSpec((B, 4, P, 128), lambda n: (n, 0, 0, 0)),
        ),
        compiler_params=pltpu.CompilerParams(
            dimension_semantics=("parallel",),                        # batch shards across TCs
            vmem_limit_bytes=32 * 1024 * 1024,
        ),
    )(xf, yf, coef)

    # (N,4,P,128) -> (N,4,H,W) is a free row-major reshape; final NCHW->NHWC transpose is a
    # tiny XLA op at 32x32.
    # TODO(synk): at large resolutions, emit NHWC/interleaved layout directly from the kernel to
    # avoid this extra HBM round trip (matters most on v5e bandwidth).
    out = out.reshape(N, 4, H, W)
    return jnp.transpose(out, (0, 2, 3, 1))


def toy_renderer_forward(verts_world, faces, vert_colors, R, T, image_size):
    """JAX glue reproducing ToyRenderer.forward(mesh, R, T).

    verts_world: (N, V, 3); faces: (F, 3) int32; vert_colors: (V, 3); R: (N,3,3); T: (N,3).
    """
    # world -> view (PyTorch3D row-vector convention: X_view = X_world @ R + T)
    verts_view = jnp.einsum('nvj,njk->nvk', verts_world, R) + T[:, None, :]
    # FoVOrthographicCameras defaults (bounds [-1,1], scale_xyz=1): x_ndc=x_view, y_ndc=y_view;
    # CustomMeshRasterizer.transform() then overwrites z_ndc with view-space z.
    verts_ndc = verts_view
    face_verts = verts_ndc[:, faces, :]                               # (N, F, 3, 3)
    face_cols = jnp.broadcast_to(vert_colors[faces][None],
                                 (verts_world.shape[0],) + vert_colors[faces].shape)
    return render_pallas(jnp.asarray(face_verts, jnp.float32),
                         jnp.asarray(face_cols, jnp.float32), image_size)

# TODO(synk): PyTorch3D's binned/coarse rasterization (bin_size, max_faces_per_bin) and the
# Fragments integer pix_to_face / dists outputs are host/data-dependent paths with no clean
# Pallas equivalent; the naive per-pixel z-buffer path reproduces the forward-pass image output.


if __name__ == "__main__":
    key = jax.random.PRNGKey(0)
    # SMALL shapes consistent with the module: batch=2 meshes, 16 verts, 8 faces, 32x32 image
    N, V, F, IMG = 2, 16, 8, 32

    k1, k2, k3 = jax.random.split(key, 3)
    verts = jax.random.uniform(k1, (V, 3), jnp.float32, minval=-0.8, maxval=0.8)
    faces = jax.random.randint(k2, (F, 3), 0, V, dtype=jnp.int32)
    vert_colors = jax.random.uniform(k3, (V, 3), jnp.float32)         # TexturesVertex RGB

    verts_world = jnp.broadcast_to(verts[None], (N, V, 3))
    # deterministic camera extrinsics passed to forward(): identity rotation, push mesh to z=+2
    R = jnp.broadcast_to(jnp.eye(3, dtype=jnp.float32)[None], (N, 3, 3))
    T = jnp.broadcast_to(jnp.array([[0.0, 0.0, 2.0]], jnp.float32), (N, 3))

    images = toy_renderer_forward(verts_world, faces, vert_colors, R, T, IMG)
    jax.block_until_ready(images)

    assert images.shape == (N, IMG, IMG, 4) and images.dtype == jnp.float32
    assert bool(jnp.all(jnp.isfinite(images)))
    print("KERNEL_OK")
</pallas_src>

<mosaic_0001>
module attributes {stable_mosaic.version = 11 : i64} {
  func.func @kernel(%arg0: i32, %arg1: memref<8x128xf32, #tpu.memory_space<vmem>>, %arg2: memref<8x128xf32, #tpu.memory_space<vmem>>, %arg3: memref<2x168xf32, #tpu.memory_space<smem>>, %arg4: memref<2x4x8x128xf32, #tpu.memory_space<vmem>>) attributes {dimension_semantics = [#tpu.dimension_semantics<parallel>], iteration_bounds = array<i64: 1>, scalar_prefetch = 0 : i64, scratch_operands = 0 : i64, tpu.core_type = #tpu.core_type<tc>, window_params = [{pipeline_mode = #tpu.pipeline_mode<synchronous>, transform_indices = @transform_0, window_bounds = array<i64: 8, 128>}, {pipeline_mode = #tpu.pipeline_mode<synchronous>, transform_indices = @transform_1, window_bounds = array<i64: 8, 128>}, {transform_indices = @transform_2, window_bounds = array<i64: 2, 168>}, {transform_indices = @transform_3, window_bounds = array<i64: 2, 4, 8, 128>}]} {
    %c0 = arith.constant 0 : index
    %c0_0 = arith.constant 0 : index
    %0 = vector.load %arg1[%c0, %c0_0] : memref<8x128xf32, #tpu.memory_space<vmem>>, vector<8x128xf32>
    %c0_1 = arith.constant 0 : index
    %c0_2 = arith.constant 0 : index
    %1 = vector.load %arg2[%c0_1, %c0_2] : memref<8x128xf32, #tpu.memory_space<vmem>>, vector<8x128xf32>
    %cst = arith.constant 1.000000e+30 : f32
    %2 = vector.broadcast %cst : f32 to vector<8x128xf32>
    %cst_3 = arith.constant 1.000000e+00 : f32
    %3 = vector.broadcast %cst_3 : f32 to vector<8x128xf32>
    %cst_4 = arith.constant 1.000000e+00 : f32
    %4 = vector.broadcast %cst_4 : f32 to vector<8x128xf32>
    %cst_5 = arith.constant 1.000000e+00 : f32
    %5 = vector.broadcast %cst_5 : f32 to vector<8x128xf32>
    %c0_i32 = arith.constant 0 : i32
    %c21_i32 = arith.constant 21 : i32
    %6 = arith.muli %c21_i32, %c0_i32 : i32
    %c0_i32_6 = arith.constant 0 : i32
    %7 = arith.addi %6, %c0_i32_6 : i32
    %c0_7 = arith.constant 0 : index
    %8 = arith.index_cast %7 : i32 to index
    %9 = memref.load %arg3[%c0_7, %8] : memref<2x168xf32, #tpu.memory_space<smem>>
    %c1_i32 = arith.constant 1 : i32
    %10 = arith.addi %6, %c1_i32 : i32
    %c0_8 = arith.constant 0 : index
    %11 = arith.index_cast %10 : i32 to index
    %12 = memref.load %arg3[%c0_8, %11] : memref<2x168xf32, #tpu.memory_space<smem>>
    %c2_i32 = arith.constant 2 : i32
    %13 = arith.addi %6, %c2_i32 : i32
    %c0_9 = arith.constant 0 : index
    %14 = arith.index_cast %13 : i32 to index
    %15 = memref.load %arg3[%c0_9, %14] : memref<2x168xf32, #tpu.memory_space<smem>>
    %c3_i32 = arith.constant 3 : i32
    %16 = arith.addi %6, %c3_i32 : i32
    %c0_10 = arith.constant 0 : index
    %17 = arith.index_cast %16 : i32 to index
    %18 = memref.load %arg3[%c0_10, %17] : memref<2x168xf32, #tpu.memory_space<smem>>
    %c4_i32 = arith.constant 4 : i32
    %19 = arith.addi %6, %c4_i32 : i32
    %c0_11 = arith.constant 0 : index
    %20 = arith.index_cast %19 : i32 to index
    %21 = memref.load %arg3[%c0_11, %20] : memref<2x168xf32, #tpu.memory_space<smem>>
    %c5_i32 = arith.constant 5 : i32
    %22 = arith.addi %6, %c5_i32 : i32
    %c0_12 = arith.constant 0 : index
    %23 = arith.index_cast %22 : i32 to index
    %24 = memref.load %arg3[%c0_12, %23] : memref<2x168xf32, #tpu.memory_space<smem>>
    %c6_i32 = arith.constant 6 : i32
    %25 = arith.addi %6, %c6_i32 : i32
    %c0_13 = arith.constant 0 : index
    %26 = arith.index_cast %25 : i32 to index
    %27 = memref.load %arg3[%c0_13, %26] : memref<2x168xf32, #tpu.memory_space<smem>>
    %c7_i32 = arith.constant 7 : i32
    %28 = arith.addi %6, %c7_i32 : i32
    %c0_14 = arith.constant 0 : index
    %29 = arith.index_cast %28 : i32 to index
    %30 = memref.load %arg3[%c0_14, %29] : memref<2x168xf32, #tpu.memory_space<smem>>
    %c8_i32 = arith.constant 8 : i32
    %31 = arith.addi %6, %c8_i32 : i32
    %c0_15 = arith.constant 0 : index
    %32 = arith.index_cast %31 : i32 to index
    %33 = memref.load %arg3[%c0_15, %32] : memref<2x168xf32, #tpu.memory_space<smem>>
    %c9_i32 = arith.constant 9 : i32
    %34 = arith.addi %6, %c9_i32 : i32
    %c0_16 = arith.constant 0 : index
    %35 = arith.index_cast %34 : i32 to index
    %36 = memref.load %arg3[%c0_16, %35] : memref<2x168xf32, #tpu.memory_space<smem>>
    %c10_i32 = arith.constant 10 : i32
    %37 = arith.addi %6, %c10_i32 : i32
    %c0_17 = arith.constant 0 : index
    %38 = arith.index_cast %37 : i32 to index
    %39 = memref.load %arg3[%c0_17, %38] : memref<2x168xf32, #tpu.memory_space<smem>>
    %c11_i32 = arith.constant 11 : i32
    %40 = arith.addi %6, %c11_i32 : i32
    %c0_18 = arith.constant 0 : index
    %41 = arith.index_cast %40 : i32 to index
    %42 = memref.load %arg3[%c0_18, %41] : memref<2x168xf32, #tpu.memory_space<smem>>
    %c12_i32 = arith.constant 12 : i32
    %43 = arith.addi %6, %c12_i32 : i32
    %c0_19 = arith.constant 0 : index
    %44 = arith.index_cast %43 : i32 to index
    %45 = memref.load %arg3[%c0_19, %44] : memref<2x168xf32, #tpu.memory_space<smem>>
    %c13_i32 = arith.constant 13 : i32
    %46 = arith.addi %6, %c13_i32 : i32
    %c0_20 = arith.constant 0 : index
    %47 = arith.index_cast %46 : i32 to index
    %48 = memref.load %arg3[%c0_20, %47] : memref<2x168xf32, #tpu.memory_space<smem>>
    %c14_i32 = arith.constant 14 : i32
    %49 = arith.addi %6, %c14_i32 : i32
    %c0_21 = arith.constant 0 : index
    %50 = arith.index_cast %49 : i32 to index
    %51 = memref.load %arg3[%c0_21, %50] : memref<2x168xf32, #tpu.memory_space<smem>>
    %c15_i32 = arith.constant 15 : i32
    %52 = arith.addi %6, %c15_i32 : i32
    %c0_22 = arith.constant 0 : index
    %53 = arith.index_cast %52 : i32 to index
    %54 = memref.load %arg3[%c0_22, %53] : memref<2x168xf32, #tpu.memory_space<smem>>
    %c16_i32 = arith.constant 16 : i32
    %55 = arith.addi %6, %c16_i32 : i32
    %c0_23 = arith.constant 0 : index
    %56 = arith.index_cast %55 : i32 to index
    %57 = memref.load %arg3[%c0_23, %56] : memref<2x168xf32, #tpu.memory_space<smem>>
    %c17_i32 = arith.constant 17 : i32
    %58 = arith.addi %6, %c17_i32 : i32
    %c0_24 = arith.constant 0 : index
    %59 = arith.index_cast %58 : i32 to index
    %60 = memref.load %arg3[%c0_24, %59] : memref<2x168xf32, #tpu.memory_space<smem>>
    %c18_i32 = arith.constant 18 : i32
    %61 = arith.addi %6, %c18_i32 : i32
    %c0_25 = arith.constant 0 : index
    %62 = arith.index_cast %61 : i32 to index
    %63 = memref.load %arg3[%c0_25, %62] : memref<2x168xf32, #tpu.memory_space<smem>>
    %c19_i32 = arith.constant 19 : i32
    %64 = arith.addi %6, %c19_i32 : i32
    %c0_26 = arith.constant 0 : index
    %65 = arith.index_cast %64 : i32 to index
    %66 = memref.load %arg3[%c0_26, %65] : memref<2x168xf32, #tpu.memory_space<smem>>
    %c20_i32 = arith.constant 20 : i32
    %67 = arith.addi %6, %c20_i32 : i32
    %c0_27 = arith.constant 0 : index
    %68 = arith.index_cast %67 : i32 to index
    %69 = memref.load %arg3[%c0_27, %68] : memref<2x168xf32, #tpu.memory_space<smem>>
    %70 = vector.broadcast %9 : f32 to vector<8x128xf32>
    %71 = arith.mulf %70, %0 : vector<8x128xf32>
    %72 = vector.broadcast %12 : f32 to vector<8x128xf32>
    %73 = arith.mulf %72, %1 : vector<8x128xf32>
    %74 = arith.addf %71, %73 : vector<8x128xf32>
    %75 = vector.broadcast %15 : f32 to vector<8x128xf32>
    %76 = arith.addf %74, %75 : vector<8x128xf32>
    %77 = vector.broadcast %18 : f32 to vector<8x128xf32>
    %78 = arith.mulf %77, %0 : vector<8x128xf32>
    %79 = vector.broadcast %21 : f32 to vector<8x128xf32>
    %80 = arith.mulf %79, %1 : vector<8x128xf32>
    %81 = arith.addf %78, %80 : vector<8x128xf32>
    %82 = vector.broadcast %24 : f32 to vector<8x128xf32>
    %83 = arith.addf %81, %82 : vector<8x128xf32>
    %84 = vector.broadcast %27 : f32 to vector<8x128xf32>
    %85 = arith.mulf %84, %0 : vector<8x128xf32>
    %86 = vector.broadcast %30 : f32 to vector<8x128xf32>
    %87 = arith.mulf %86, %1 : vector<8x128xf32>
    %88 = arith.addf %85, %87 : vector<8x128xf32>
    %89 = vector.broadcast %33 : f32 to vector<8x128xf32>
    %90 = arith.addf %88, %89 : vector<8x128xf32>
    %91 = vector.broadcast %36 : f32 to vector<8x128xf32>
    %92 = arith.mulf %91, %0 : vector<8x128xf32>
    %93 = vector.broadcast %39 : f32 to vector<8x128xf32>
    %94 = arith.mulf %93, %1 : vector<8x128xf32>
    %95 = arith.addf %92, %94 : vector<8x128xf32>
    %96 = vector.broadcast %42 : f32 to vector<8x128xf32>
    %97 = arith.addf %95, %96 : vector<8x128xf32>
    %cst_28 = arith.constant 0.000000e+00 : f32
    %98 = vector.broadcast %cst_28 : f32 to vector<8x128xf32>
    %99 = arith.cmpf ogt, %76, %98 : vector<8x128xf32>
    %cst_29 = arith.constant 0.000000e+00 : f32
    %100 = vector.broadcast %cst_29 : f32 to vector<8x128xf32>
    %101 = arith.cmpf ogt, %83, %100 : vector<8x128xf32>
    %102 = arith.andi %99, %101 : vector<8x128xi1>
    %cst_30 = arith.constant 0.000000e+00 : f32
    %103 = vector.broadcast %cst_30 : f32 to vector<8x128xf32>
    %104 = arith.cmpf ogt, %90, %103 : vector<8x128xf32>
    %105 = arith.andi %102, %104 : vector<8x128xi1>
    %cst_31 = arith.constant 0.000000e+00 : f32
    %106 = vector.broadcast %cst_31 : f32 to vector<8x128xf32>
    %107 = arith.cmpf oge, %97, %106 : vector<8x128xf32>
    %108 = arith.andi %105, %107 : vector<8x128xi1>
    %109 = arith.cmpf olt, %97, %2 : vector<8x128xf32>
    %110 = arith.andi %108, %109 : vector<8x128xi1>
    %111 = vector.broadcast %45 : f32 to vector<8x128xf32>
    %112 = arith.mulf %111, %0 : vector<8x128xf32>
    %113 = vector.broadcast %48 : f32 to vector<8x128xf32>
    %114 = arith.mulf %113, %1 : vector<8x128xf32>
    %115 = arith.addf %112, %114 : vector<8x128xf32>
    %116 = vector.broadcast %51 : f32 to vector<8x128xf32>
    %117 = arith.addf %115, %116 : vector<8x128xf32>
    %118 = vector.broadcast %54 : f32 to vector<8x128xf32>
    %119 = arith.mulf %118, %0 : vector<8x128xf32>
    %120 = vector.broadcast %57 : f32 to vector<8x128xf32>
    %121 = arith.mulf %120, %1 : vector<8x128xf32>
    %122 = arith.addf %119, %121 : vector<8x128xf32>
    %123 = vector.broadcast %60 : f32 to vector<8x128xf32>
    %124 = arith.addf %122, %123 : vector<8x128xf32>
    %125 = vector.broadcast %63 : f32 to vector<8x128xf32>
    %126 = arith.mulf %125, %0 : vector<8x128xf32>
    %127 = vector.broadcast %66 : f32 to vector<8x128xf32>
    %128 = arith.mulf %127, %1 : vector<8x128xf32>
    %129 = arith.addf %126, %128 : vector<8x128xf32>
    %130 = vector.broadcast %69 : f32 to vector<8x128xf32>
    %131 = arith.addf %129, %130 : vector<8x128xf32>
    %132 = arith.select %110, %97, %2 : vector<8x128xi1>, vector<8x128xf32>
    %133 = arith.select %110, %117, %3 : vector<8x128xi1>, vector<8x128xf32>
    %134 = arith.select %110, %124, %4 : vector<8x128xi1>, vector<8x128xf32>
    %135 = arith.select %110, %131, %5 : vector<8x128xi1>, vector<8x128xf32>
    %c1_i32_32 = arith.constant 1 : i32
    %c21_i32_33 = arith.constant 21 : i32
    %136 = arith.muli %c21_i32_33, %c1_i32_32 : i32
    %c0_i32_34 = arith.constant 0 : i32
    %137 = arith.addi %136, %c0_i32_34 : i32
    %c0_35 = arith.constant 0 : index
    %138 = arith.index_cast %137 : i32 to index
    %139 = memref.load %arg3[%c0_35, %138] : memref<2x168xf32, #tpu.memory_space<smem>>
    %c1_i32_36 = arith.constant 1 : i32
    %140 = arith.addi %136, %c1_i32_36 : i32
    %c0_37 = arith.constant 0 : index
    %141 = arith.index_cast %140 : i32 to index
    %142 = memref.load %arg3[%c0_37, %141] : memref<2x168xf32, #tpu.memory_space<smem>>
    %c2_i32_38 = arith.constant 2 : i32
    %143 = arith.addi %136, %c2_i32_38 : i32
    %c0_39 = arith.constant 0 : index
    %144 = arith.index_cast %143 : i32 to index
    %145 = memref.load %arg3[%c0_39, %144] : memref<2x168xf32, #tpu.memory_space<smem>>
    %c3_i32_40 = arith.constant 3 : i32
    %146 = arith.addi %136, %c3_i32_40 : i32
    %c0_41 = arith.constant 0 : index
    %147 = arith.index_cast %146 : i32 to index
    %148 = memref.load %arg3[%c0_41, %147] : memref<2x168xf32, #tpu.memory_space<smem>>
    %c4_i32_42 = arith.constant 4 : i32
    %149 = arith.addi %136, %c4_i32_42 : i32
    %c0_43 = arith.constant 0 : index
    %150 = arith.index_cast %149 : i32 to index
    %151 = memref.load %arg3[%c0_43, %150] : memref<2x168xf32, #tpu.memory_space<smem>>
    %c5_i32_44 = arith.constant 5 : i32
    %152 = arith.addi %136, %c5_i32_44 : i32
    %c0_45 = arith.constant 0 : index
    %153 = arith.index_cast %152 : i32 to index
    %154 = memref.load %arg3[%c0_45, %153] : memref<2x168xf32, #tpu.memory_space<smem>>
    %c6_i32_46 = arith.constant 6 : i32
    %155 = arith.addi %136, %c6_i32_46 : i32
    %c0_47 = arith.constant 0 : index
    %156 = arith.index_cast %155 : i32 to index
    %157 = memref.load %arg3[%c0_47, %156] : memref<2x168xf32, #tpu.memory_space<smem>>
    %c7_i32_48 = arith.constant 7 : i32
    %158 = arith.addi %136, %c7_i32_48 : i32
    %c0_49 = arith.constant 0 : index
    %159 = arith.index_cast %158 : i32 to index
    %160 = memref.load %arg3[%c0_49, %159] : memref<2x168xf32, #tpu.memory_space<smem>>
    %c8_i32_50 = arith.constant 8 : i32
    %161 = arith.addi %136, %c8_i32_50 : i32
    %c0_51 = arith.constant 0 : index
    %162 = arith.index_cast %161 : i32 to index
    %163 = memref.load %arg3[%c0_51, %162] : memref<2x168xf32, #tpu.memory_space<smem>>
    %c9_i32_52 = arith.constant 9 : i32
    %164 = arith.addi %136, %c9_i32_52 : i32
    %c0_53 = arith.constant 0 : index
    %165 = arith.index_cast %164 : i32 to index
    %166 = memref.load %arg3[%c0_53, %165] : memref<2x168xf32, #tpu.memory_space<smem>>
    %c10_i32_54 = arith.constant 10 : i32
    %167 = arith.addi %136, %c10_i32_54 : i32
    %c0_55 = arith.constant 0 : index
    %168 = arith.index_cast %167 : i32 to index
    %169 = memref.load %arg3[%c0_55, %168] : memref<2x168xf32, #tpu.memory_space<smem>>
    %c11_i32_56 = arith.constant 11 : i32
    %170 = arith.addi %136, %c11_i32_56 : i32
    %c0_57 = arith.constant 0 : index
    %171 = arith.index_cast %170 : i32 to index
    %172 = memref.load %arg3[%c0_57, %171] : memref<2x168xf32, #tpu.memory_space<smem>>
    %c12_i32_58 = arith.constant 12 : i32
    %173 = arith.addi %136, %c12_i32_58 : i32
    %c0_59 = arith.constant 0 : index
    %174 = arith.index_cast %173 : i32 to index
    %175 = memref.load %arg3[%c0_59, %174] : memref<2x168xf32, #tpu.memory_space<smem>>
    %c13_i32_60 = arith.constant 13 : i32
    %176 = arith.addi %136, %c13_i32_60 : i32
    %c0_61 = arith.constant 0 : index
    %177 = arith.index_cast %176 : i32 to index
    %178 = memref.load %arg3[%c0_61, %177] : memref<2x168xf32, #tpu.memory_space<smem>>
    %c14_i32_62 = arith.constant 14 : i32
    %179 = arith.addi %136, %c14_i32_62 : i32
    %c0_63 = arith.constant 0 : index
    %180 = arith.index_cast %179 : i32 to index
    %181 = memref.load %arg3[%c0_63, %180] : memref<2x168xf32, #tpu.memory_space<smem>>
    %c15_i32_64 = arith.constant 15 : i32
    %182 = arith.addi %136, %c15_i32_64 : i32
    %c0_65 = arith.constant 0 : index
    %183 = arith.index_cast %182 : i32 to index
    %184 = memref.load %arg3[%c0_65, %183] : memref<2x168xf32, #tpu.memory_space<smem>>
    %c16_i32_66 = arith.constant 16 : i32
    %185 = arith.addi %136, %c16_i32_66 : i32
    %c0_67 = arith.constant 0 : index
    %186 = arith.index_cast %185 : i32 to index
    %187 = memref.load %arg3[%c0_67, %186] : memref<2x168xf32, #tpu.memory_space<smem>>
    %c17_i32_68 = arith.constant 17 : i32
    %188 = arith.addi %136, %c17_i32_68 : i32
    %c0_69 = arith.constant 0 : index
    %189 = arith.index_cast %188 : i32 to index
    %190 = memref.load %arg3[%c0_69, %189] : memref<2x168xf32, #tpu.memory_space<smem>>
    %c18_i32_70 = arith.constant 18 : i32
    %191 = arith.addi %136, %c18_i32_70 : i32
    %c0_71 = arith.constant 0 : index
    %192 = arith.index_cast %191 : i32 to index
    %193 = memref.load %arg3[%c0_71, %192] : memref<2x168xf32, #tpu.memory_space<smem>>
    %c19_i32_72 = arith.constant 19 : i32
    %194 = arith.addi %136, %c19_i32_72 : i32
    %c0_73 = arith.constant 0 : index
    %195 = arith.index_cast %194 : i32 to index
    %196 = memref.load %arg3[%c0_73, %195] : memref<2x168xf32, #tpu.memory_space<smem>>
    %c20_i32_74 = arith.constant 20 : i32
    %197 = arith.addi %136, %c20_i32_74 : i32
    %c0_75 = arith.constant 0 : index
    %198 = arith.index_cast %197 : i32 to index
    %199 = memref.load %arg3[%c0_75, %198] : memref<2x168xf32, #tpu.memory_space<smem>>
    %200 = vector.broadcast %139 : f32 to vector<8x128xf32>
    %201 = arith.mulf %200, %0 : vector<8x128xf32>
    %202 = vector.broadcast %142 : f32 to vector<8x128xf32>
    %203 = arith.mulf %202, %1 : vector<8x128xf32>
    %204 = arith.addf %201, %203 : vector<8x128xf32>
    %205 = vector.broadcast %145 : f32 to vector<8x128xf32>
    %206 = arith.addf %204, %205 : vector<8x128xf32>
    %207 = vector.broadcast %148 : f32 to vector<8x128xf32>
    %208 = arith.mulf %207, %0 : vector<8x128xf32>
    %209 = vector.broadcast %151 : f32 to vector<8x128xf32>
    %210 = arith.mulf %209, %1 : vector<8x128xf32>
    %211 = arith.addf %208, %210 : vector<8x128xf32>
    %212 = vector.broadcast %154 : f32 to vector<8x128xf32>
    %213 = arith.addf %211, %212 : vector<8x128xf32>
    %214 = vector.broadcast %157 : f32 to vector<8x128xf32>
    %215 = arith.mulf %214, %0 : vector<8x128xf32>
    %216 = vector.broadcast %160 : f32 to vector<8x128xf32>
    %217 = arith.mulf %216, %1 : vector<8x128xf32>
    %218 = arith.addf %215, %217 : vector<8x128xf32>
    %219 = vector.broadcast %163 : f32 to vector<8x128xf32>
    %220 = arith.addf %218, %219 : vector<8x128xf32>
    %221 = vector.broadcast %166 : f32 to vector<8x128xf32>
    %222 = arith.mulf %221, %0 : vector<8x128xf32>
    %223 = vector.broadcast %169 : f32 to vector<8x128xf32>
    %224 = arith.mulf %223, %1 : vector<8x128xf32>
    %225 = arith.addf %222, %224 : vector<8x128xf32>
    %226 = vector.broadcast %172 : f32 to vector<8x128xf32>
    %227 = arith.addf %225, %226 : vector<8x128xf32>
    %cst_76 = arith.constant 0.000000e+00 : f32
    %228 = vector.broadcast %cst_76 : f32 to vector<8x128xf32>
    %229 = arith.cmpf ogt, %206, %228 : vector<8x128xf32>
    %cst_77 = arith.constant 0.000000e+00 : f32
    %230 = vector.broadcast %cst_77 : f32 to vector<8x128xf32>
    %231 = arith.cmpf ogt, %213, %230 : vector<8x128xf32>
    %232 = arith.andi %229, %231 : vector<8x128xi1>
    %cst_78 = arith.constant 0.000000e+00 : f32
    %233 = vector.broadcast %cst_78 : f32 to vector<8x128xf32>
    %234 = arith.cmpf ogt, %220, %233 : vector<8x128xf32>
    %235 = arith.andi %232, %234 : vector<8x128xi1>
    %cst_79 = arith.constant 0.000000e+00 : f32
    %236 = vector.broadcast %cst_79 : f32 to vector<8x128xf32>
    %237 = arith.cmpf oge, %227, %236 : vector<8x128xf32>
    %238 = arith.andi %235, %237 : vector<8x128xi1>
    %239 = arith.cmpf olt, %227, %132 : vector<8x128xf32>
    %240 = arith.andi %238, %239 : vector<8x128xi1>
    %241 = vector.broadcast %175 : f32 to vector<8x128xf32>
    %242 = arith.mulf %241, %0 : vector<8x128xf32>
    %243 = vector.broadcast %178 : f32 to vector<8x128xf32>
    %244 = arith.mulf %243, %1 : vector<8x128xf32>
    %245 = arith.addf %242, %244 : vector<8x128xf32>
    %246 = vector.broadcast %181 : f32 to vector<8x128xf32>
    %247 = arith.addf %245, %246 : vector<8x128xf32>
    %248 = vector.broadcast %184 : f32 to vector<8x128xf32>
    %249 = arith.mulf %248, %0 : vector<8x128xf32>
    %250 = vector.broadcast %187 : f32 to vector<8x128xf32>
    %251 = arith.mulf %250, %1 : vector<8x128xf32>
    %252 = arith.addf %249, %251 : vector<8x128xf32>
    %253 = vector.broadcast %190 : f32 to vector<8x128xf32>
    %254 = arith.addf %252, %253 : vector<8x128xf32>
    %255 = vector.broadcast %193 : f32 to vector<8x128xf32>
    %256 = arith.mulf %255, %0 : vector<8x128xf32>
    %257 = vector.broadcast %196 : f32 to vector<8x128xf32>
    %258 = arith.mulf %257, %1 : vector<8x128xf32>
    %259 = arith.addf %256, %258 : vector<8x128xf32>
    %260 = vector.broadcast %199 : f32 to vector<8x128xf32>
    %261 = arith.addf %259, %260 : vector<8x128xf32>
    %262 = arith.select %240, %227, %132 : vector<8x128xi1>, vector<8x128xf32>
    %263 = arith.select %240, %247, %133 : vector<8x128xi1>, vector<8x128xf32>
    %264 = arith.select %240, %254, %134 : vector<8x128xi1>, vector<8x128xf32>
    %265 = arith.select %240, %261, %135 : vector<8x128xi1>, vector<8x128xf32>
    %c2_i32_80 = arith.constant 2 : i32
    %c21_i32_81 = arith.constant 21 : i32
    %266 = arith.muli %c21_i32_81, %c2_i32_80 : i32
    %c0_i32_82 = arith.constant 0 : i32
    %267 = arith.addi %266, %c0_i32_82 : i32
    %c0_83 = arith.constant 0 : index
    %268 = arith.index_cast %267 : i32 to index
    %269 = memref.load %arg3[%c0_83, %268] : memref<2x168xf32, #tpu.memory_space<smem>>
    %c1_i32_84 = arith.constant 1 : i32
    %270 = arith.addi %266, %c1_i32_84 : i32
    %c0_85 = arith.constant 0 : index
    %271 = arith.index_cast %270 : i32 to index
    %272 = memref.load %arg3[%c0_85, %271] : memref<2x168xf32, #tpu.memory_space<smem>>
    %c2_i32_86 = arith.constant 2 : i32
    %273 = arith.addi %266, %c2_i32_86 : i32
    %c0_87 = arith.constant 0 : index
    %274 = arith.index_cast %273 : i32 to index
    %275 = memref.load %arg3[%c0_87, %274] : memref<2x168xf32, #tpu.memory_space<smem>>
    %c3_i32_88 = arith.constant 3 : i32
    %276 = arith.addi %266, %c3_i32_88 : i32
    %c0_89 = arith.constant 0 : index
    %277 = arith.index_cast %276 : i32 to index
    %278 = memref.load %arg3[%c0_89, %277] : memref<2x168xf32, #tpu.memory_space<smem>>
    %c4_i32_90 = arith.constant 4 : i32
    %279 = arith.addi %266, %c4_i32_90 : i32
    %c0_91 = arith.constant 0 : index
    %280 = arith.index_cast %279 : i32 to index
    %281 = memref.load %arg3[%c0_91, %280] : memref<2x168xf32, #tpu.memory_space<smem>>
    %c5_i32_92 = arith.constant 5 : i32
    %282 = arith.addi %266, %c5_i32_92 : i32
    %c0_93 = arith.constant 0 : index
    %283 = arith.index_cast %282 : i32 to index
    %284 = memref.load %arg3[%c0_93, %283] : memref<2x168xf32, #tpu.memory_space<smem>>
    %c6_i32_94 = arith.constant 6 : i32
    %285 = arith.addi %266, %c6_i32_94 : i32
    %c0_95 = arith.constant 0 : index
    %286 = arith.index_cast %285 : i32 to index
    %287 = memref.load %arg3[%c0_95, %286] : memref<2x168xf32, #tpu.memory_space<smem>>
    %c7_i32_96 = arith.constant 7 : i32
    %288 = arith.addi %266, %c7_i32_96 : i32
    %c0_97 = arith.constant 0 : index
    %289 = arith.index_cast %288 : i32 to index
    %290 = memref.load %arg3[%c0_97, %289] : memref<2x168xf32, #tpu.memory_space<smem>>
    %c8_i32_98 = arith.constant 8 : i32
    %291 = arith.addi %266, %c8_i32_98 : i32
    %c0_99 = arith.constant 0 : index
    %292 = arith.index_cast %291 : i32 to index
    %293 = memref.load %arg3[%c0_99, %292] : memref<2x168xf32, #tpu.memory_space<smem>>
    %c9_i32_100 = arith.constant 9 : i32
    %294 = arith.addi %266, %c9_i32_100 : i32
    %c0_101 = arith.constant 0 : index
    %295 = arith.index_cast %294 : i32 to index
    %296 = memref.load %arg3[%c0_101, %295] : memref<2x168xf32, #tpu.memory_space<smem>>
    %c10_i32_102 = arith.constant 10 : i32
    %297 = arith.addi %266, %c10_i32_102 : i32
    %c0_103 = arith.constant 0 : index
    %298 = arith.index_cast %297 : i32 to index
    %299 = memref.load %arg3[%c0_103, %298] : memref<2x168xf32, #tpu.memory_space<smem>>
    %c11_i32_104 = arith.constant 11 : i32
    %300 = arith.addi %266, %c11_i32_104 : i32
    %c0_105 = arith.constant 0 : index
    %301 = arith.index_cast %300 : i32 to index
    %302 = memref.load %arg3[%c0_105, %301] : memref<2x168xf32, #tpu.memory_space<smem>>
    %c12_i32_106 = arith.constant 12 : i32
    %303 = arith.addi %266, %c12_i32_106 : i32
    %c0_107 = arith.constant 0 : index
    %304 = arith.index_cast %303 : i32 to index
    %305 = memref.load %arg3[%c0_107, %304] : memref<2x168xf32, #tpu.memory_space<smem>>
    %c13_i32_108 = arith.constant 13 : i32
    %306 = arith.addi %266, %c13_i32_108 : i32
    %c0_109 = arith.constant 0 : index
    %307 = arith.index_cast %306 : i32 to index
    %308 = memref.load %arg3[%c0_109, %307] : memref<2x168xf32, #tpu.memory_space<smem>>
    %c14_i32_110 = arith.constant 14 : i32
    %309 = arith.addi %266, %c14_i32_110 : i32
    %c0_111 = arith.constant 0 : index
    %310 = arith.index_cast %309 : i32 to index
    %311 = memref.load %arg3[%c0_111, %310] : memref<2x168xf32, #tpu.memory_space<smem>>
    %c15_i32_112 = arith.constant 15 : i32
    %312 = arith.addi %266, %c15_i32_112 : i32
    %c0_113 = arith.constant 0 : index
    %313 = arith.index_cast %312 : i32 to index
    %314 = memref.load %arg3[%c0_113, %313] : memref<2x168xf32, #tpu.memory_space<smem>>
    %c16_i32_114 = arith.constant 16 : i32
    %315 = arith.addi %266, %c16_i32_114 : i32
    %c0_115 = arith.constant 0 : index
    %316 = arith.index_cast %315 : i32 to index
    %317 = memref.load %arg3[%c0_115, %316] : memref<2x168xf32, #tpu.memory_space<smem>>
    %c17_i32_116 = arith.constant 17 : i32
    %318 = arith.addi %266, %c17_i32_116 : i32
    %c0_117 = arith.constant 0 : index
    %319 = arith.index_cast %318 : i32 to index
    %320 = memref.load %arg3[%c0_117, %319] : memref<2x168xf32, #tpu.memory_space<smem>>
    %c18_i32_118 = arith.constant 18 : i32
    %321 = arith.addi %266, %c18_i32_118 : i32
    %c0_119 = arith.constant 0 : index
    %322 = arith.index_cast %321 : i32 to index
    %323 = memref.load %arg3[%c0_119, %322] : memref<2x168xf32, #tpu.memory_space<smem>>
    %c19_i32_120 = arith.constant 19 : i32
    %324 = arith.addi %266, %c19_i32_120 : i32
    %c0_121 = arith.constant 0 : index
    %325 = arith.index_cast %324 : i32 to index
    %326 = memref.load %arg3[%c0_121, %325] : memref<2x168xf32, #tpu.memory_space<smem>>
    %c20_i32_122 = arith.constant 20 : i32
    %327 = arith.addi %266, %c20_i32_122 : i32
    %c0_123 = arith.constant 0 : index
    %328 = arith.index_cast %327 : i32 to index
    %329 = memref.load %arg3[%c0_123, %328] : memref<2x168xf32, #tpu.memory_space<smem>>
    %330 = vector.broadcast %269 : f32 to vector<8x128xf32>
    %331 = arith.mulf %330, %0 : vector<8x128xf32>
    %332 = vector.broadcast %272 : f32 to vector<8x128xf32>
    %333 = arith.mulf %332, %1 : vector<8x128xf32>
    %334 = arith.addf %331, %333 : vector<8x128xf32>
    %335 = vector.broadcast %275 : f32 to vector<8x128xf32>
    %336 = arith.addf %334, %335 : vector<8x128xf32>
    %337 = vector.broadcast %278 : f32 to vector<8x128xf32>
    %338 = arith.mulf %337, %0 : vector<8x128xf32>
    %339 = vector.broadcast %281 : f32 to vector<8x128xf32>
    %340 = arith.mulf %339, %1 : vector<8x128xf32>
    %341 = arith.addf %338, %340 : vector<8x128xf32>
    %342 = vector.broadcast %284 : f32 to vector<8x128xf32>
    %343 = arith.addf %341, %342 : vector<8x128xf32>
    %344 = vector.broadcast %287 : f32 to vector<8x128xf32>
    %345 = arith.mulf %344, %0 : vector<8x128xf32>
    %346 = vector.broadcast %290 : f32 to vector<8x128xf32>
    %347 = arith.mulf %346, %1 : vector<8x128xf32>
    %348 = arith.addf %345, %347 : vector<8x128xf32>
    %349 = vector.broadcast %293 : f32 to vector<8x128xf32>
    %350 = arith.addf %348, %349 : vector<8x128xf32>
    %351 = vector.broadcast %296 : f32 to vector<8x128xf32>
    %352 = arith.mulf %351, %0 : vector<8x128xf32>
    %353 = vector.broadcast %299 : f32 to vector<8x128xf32>
    %354 = arith.mulf %353, %1 : vector<8x128xf32>
    %355 = arith.addf %352, %354 : vector<8x128xf32>
    %356 = vector.broadcast %302 : f32 to vector<8x128xf32>
    %357 = arith.addf %355, %356 : vector<8x128xf32>
    %cst_124 = arith.constant 0.000000e+00 : f32
    %358 = vector.broadcast %cst_124 : f32 to vector<8x128xf32>
    %359 = arith.cmpf ogt, %336, %358 : vector<8x128xf32>
    %cst_125 = arith.constant 0.000000e+00 : f32
    %360 = vector.broadcast %cst_125 : f32 to vector<8x128xf32>
    %361 = arith.cmpf ogt, %343, %360 : vector<8x128xf32>
    %362 = arith.andi %359, %361 : vector<8x128xi1>
    %cst_126 = arith.constant 0.000000e+00 : f32
    %363 = vector.broadcast %cst_126 : f32 to vector<8x128xf32>
    %364 = arith.cmpf ogt, %350, %363 : vector<8x128xf32>
    %365 = arith.andi %362, %364 : vector<8x128xi1>
    %cst_127 = arith.constant 0.000000e+00 : f32
    %366 = vector.broadcast %cst_127 : f32 to vector<8x128xf32>
    %367 = arith.cmpf oge, %357, %366 : vector<8x128xf32>
    %368 = arith.andi %365, %367 : vector<8x128xi1>
    %369 = arith.cmpf olt, %357, %262 : vector<8x128xf32>
    %370 = arith.andi %368, %369 : vector<8x128xi1>
    %371 = vector.broadcast %305 : f32 to vector<8x128xf32>
    %372 = arith.mulf %371, %0 : vector<8x128xf32>
    %373 = vector.broadcast %308 : f32 to vector<8x128xf32>
    %374 = arith.mulf %373, %1 : vector<8x128xf32>
    %375 = arith.addf %372, %374 : vector<8x128xf32>
    %376 = vector.broadcast %311 : f32 to vector<8x128xf32>
    %377 = arith.addf %375, %376 : vector<8x128xf32>
    %378 = vector.broadcast %314 : f32 to vector<8x128xf32>
    %379 = arith.mulf %378, %0 : vector<8x128xf32>
    %380 = vector.broadcast %317 : f32 to vector<8x128xf32>
    %381 = arith.mulf %380, %1 : vector<8x128xf32>
    %382 = arith.addf %379, %381 : vector<8x128xf32>
    %383 = vector.broadcast %320 : f32 to vector<8x128xf32>
    %384 = arith.addf %382, %383 : vector<8x128xf32>
    %385 = vector.broadcast %323 : f32 to vector<8x128xf32>
    %386 = arith.mulf %385, %0 : vector<8x128xf32>
    %387 = vector.broadcast %326 : f32 to vector<8x128xf32>
    %388 = arith.mulf %387, %1 : vector<8x128xf32>
    %389 = arith.addf %386, %388 : vector<8x128xf32>
    %390 = vector.broadcast %329 : f32 to vector<8x128xf32>
    %391 = arith.addf %389, %390 : vector<8x128xf32>
    %392 = arith.select %370, %357, %262 : vector<8x128xi1>, vector<8x128xf32>
    %393 = arith.select %370, %377, %263 : vector<8x128xi1>, vector<8x128xf32>
    %394 = arith.select %370, %384, %264 : vector<8x128xi1>, vector<8x128xf32>
    %395 = arith.select %370, %391, %265 : vector<8x128xi1>, vector<8x128xf32>
    %c3_i32_128 = arith.constant 3 : i32
    %c21_i32_129 = arith.constant 21 : i32
    %396 = arith.muli %c21_i32_129, %c3_i32_128 : i32
    %c0_i32_130 = arith.constant 0 : i32
    %397 = arith.addi %396, %c0_i32_130 : i32
    %c0_131 = arith.constant 0 : index
    %398 = arith.index_cast %397 : i32 to index
    %399 = memref.load %arg3[%c0_131, %398] : memref<2x168xf32, #tpu.memory_space<smem>>
    %c1_i32_132 = arith.constant 1 : i32
    %400 = arith.addi %396, %c1_i32_132 : i32
    %c0_133 = arith.constant 0 : index
    %401 = arith.index_cast %400 : i32 to index
    %402 = memref.load %arg3[%c0_133, %401] : memref<2x168xf32, #tpu.memory_space<smem>>
    %c2_i32_134 = arith.constant 2 : i32
    %403 = arith.addi %396, %c2_i32_134 : i32
    %c0_135 = arith.constant 0 : index
    %404 = arith.index_cast %403 : i32 to index
    %405 = memref.load %arg3[%c0_135, %404] : memref<2x168xf32, #tpu.memory_space<smem>>
    %c3_i32_136 = arith.constant 3 : i32
    %406 = arith.addi %396, %c3_i32_136 : i32
    %c0_137 = arith.constant 0 : index
    %407 = arith.index_cast %406 : i32 to index
    %408 = memref.load %arg3[%c0_137, %407] : memref<2x168xf32, #tpu.memory_space<smem>>
    %c4_i32_138 = arith.constant 4 : i32
    %409 = arith.addi %396, %c4_i32_138 : i32
    %c0_139 = arith.constant 0 : index
    %410 = arith.index_cast %409 : i32 to index
    %411 = memref.load %arg3[%c0_139, %410] : memref<2x168xf32, #tpu.memory_space<smem>>
    %c5_i32_140 = arith.constant 5 : i32
    %412 = arith.addi %396, %c5_i32_140 : i32
    %c0_141 = arith.constant 0 : index
    %413 = arith.index_cast %412 : i32 to index
    %414 = memref.load %arg3[%c0_141, %413] : memref<2x168xf32, #tpu.memory_space<smem>>
    %c6_i32_142 = arith.constant 6 : i32
    %415 = arith.addi %396, %c6_i32_142 : i32
    %c0_143 = arith.constant 0 : index
    %416 = arith.index_cast %415 : i32 to index
    %417 = memref.load %arg3[%c0_143, %416] : memref<2x168xf32, #tpu.memory_space<smem>>
    %c7_i32_144 = arith.constant 7 : i32
    %418 = arith.addi %396, %c7_i32_144 : i32
    %c0_145 = arith.constant 0 : index
    %419 = arith.index_cast %418 : i32 to index
    %420 = memref.load %arg3[%c0_145, %419] : memref<2x168xf32, #tpu.memory_space<smem>>
    %c8_i32_146 = arith.constant 8 : i32
    %421 = arith.addi %396, %c8_i32_146 : i32
    %c0_147 = arith.constant 0 : index
    %422 = arith.index_cast %421 : i32 to index
    %423 = memref.load %arg3[%c0_147, %422] : memref<2x168xf32, #tpu.memory_space<smem>>
    %c9_i32_148 = arith.constant 9 : i32
    %424 = arith.addi %396, %c9_i32_148 : i32
    %c0_149 = arith.constant 0 : index
    %425 = arith.index_cast %424 : i32 to index
    %426 = memref.load %arg3[%c0_149, %425] : memref<2x168xf32, #tpu.memory_space<smem>>
    %c10_i32_150 = arith.constant 10 : i32
    %427 = arith.addi %396, %c10_i32_150 : i32
    %c0_151 = arith.constant 0 : index
    %428 = arith.index_cast %427 : i32 to index
    %429 = memref.load %arg3[%c0_151, %428] : memref<2x168xf32, #tpu.memory_space<smem>>
    %c11_i32_152 = arith.constant 11 : i32
    %430 = arith.addi %396, %c11_i32_152 : i32
    %c0_153 = arith.constant 0 : index
    %431 = arith.index_cast %430 : i32 to index
    %432 = memref.load %arg3[%c0_153, %431] : memref<2x168xf32, #tpu.memory_space<smem>>
    %c12_i32_154 = arith.constant 12 : i32
    %433 = arith.addi %396, %c12_i32_154 : i32
    %c0_155 = arith.constant 0 : index
    %434 = arith.index_cast %433 : i32 to index
    %435 = memref.load %arg3[%c0_155, %434] : memref<2x168xf32, #tpu.memory_space<smem>>
    %c13_i32_156 = arith.constant 13 : i32
    %436 = arith.addi %396, %c13_i32_156 : i32
    %c0_157 = arith.constant 0 : index
    %437 = arith.index_cast %436 : i32 to index
    %438 = memref.load %arg3[%c0_157, %437] : memref<2x168xf32, #tpu.memory_space<smem>>
    %c14_i32_158 = arith.constant 14 : i32
    %439 = arith.addi %396, %c14_i32_158 : i32
    %c0_159 = arith.constant 0 : index
    %440 = arith.index_cast %439 : i32 to index
    %441 = memref.load %arg3[%c0_159, %440] : memref<2x168xf32, #tpu.memory_space<smem>>
    %c15_i32_160 = arith.constant 15 : i32
    %442 = arith.addi %396, %c15_i32_160 : i32
    %c0_161 = arith.constant 0 : index
    %443 = arith.index_cast %442 : i32 to index
    %444 = memref.load %arg3[%c0_161, %443] : memref<2x168xf32, #tpu.memory_space<smem>>
    %c16_i32_162 = arith.constant 16 : i32
    %445 = arith.addi %396, %c16_i32_162 : i32
    %c0_163 = arith.constant 0 : index
    %446 = arith.index_cast %445 : i32 to index
    %447 = memref.load %arg3[%c0_163, %446] : memref<2x168xf32, #tpu.memory_space<smem>>
    %c17_i32_164 = arith.constant 17 : i32
    %448 = arith.addi %396, %c17_i32_164 : i32
    %c0_165 = arith.constant 0 : index
    %449 = arith.index_cast %448 : i32 to index
    %450 = memref.load %arg3[%c0_165, %449] : memref<2x168xf32, #tpu.memory_space<smem>>
    %c18_i32_166 = arith.constant 18 : i32
    %451 = arith.addi %396, %c18_i32_166 : i32
    %c0_167 = arith.constant 0 : index
    %452 = arith.index_cast %451 : i32 to index
    %453 = memref.load %arg3[%c0_167, %452] : memref<2x168xf32, #tpu.memory_space<smem>>
    %c19_i32_168 = arith.constant 19 : i32
    %454 = arith.addi %396, %c19_i32_168 : i32
    %c0_169 = arith.constant 0 : index
    %455 = arith.index_cast %454 : i32 to index
    %456 = memref.load %arg3[%c0_169, %455] : memref<2x168xf32, #tpu.memory_space<smem>>
    %c20_i32_170 = arith.constant 20 : i32
    %457 = arith.addi %396, %c20_i32_170 : i32
    %c0_171 = arith.constant 0 : index
    %458 = arith.index_cast %457 : i32 to index
    %459 = memref.load %arg3[%c0_171, %458] : memref<2x168xf32, #tpu.memory_space<smem>>
    %460 = vector.broadcast %399 : f32 to vector<8x128xf32>
    %461 = arith.mulf %460, %0 : vector<8x128xf32>
    %462 = vector.broadcast %402 : f32 to vector<8x128xf32>
    %463 = arith.mulf %462, %1 : vector<8x128xf32>
    %464 = arith.addf %461, %463 : vector<8x128xf32>
    %465 = vector.broadcast %405 : f32 to vector<8x128xf32>
    %466 = arith.addf %464, %465 : vector<8x128xf32>
    %467 = vector.broadcast %408 : f32 to vector<8x128xf32>
    %468 = arith.mulf %467, %0 : vector<8x128xf32>
    %469 = vector.broadcast %411 : f32 to vector<8x128xf32>
    %470 = arith.mulf %469, %1 : vector<8x128xf32>
    %471 = arith.addf %468, %470 : vector<8x128xf32>
    %472 = vector.broadcast %414 : f32 to vector<8x128xf32>
    %473 = arith.addf %471, %472 : vector<8x128xf32>
    %474 = vector.broadcast %417 : f32 to vector<8x128xf32>
    %475 = arith.mulf %474, %0 : vector<8x128xf32>
    %476 = vector.broadcast %420 : f32 to vector<8x128xf32>
    %477 = arith.mulf %476, %1 : vector<8x128xf32>
    %478 = arith.addf %475, %477 : vector<8x128xf32>
    %479 = vector.broadcast %423 : f32 to vector<8x128xf32>
    %480 = arith.addf %478, %479 : vector<8x128xf32>
    %481 = vector.broadcast %426 : f32 to vector<8x128xf32>
    %482 = arith.mulf %481, %0 : vector<8x128xf32>
    %483 = vector.broadcast %429 : f32 to vector<8x128xf32>
    %484 = arith.mulf %483, %1 : vector<8x128xf32>
    %485 = arith.addf %482, %484 : vector<8x128xf32>
    %486 = vector.broadcast %432 : f32 to vector<8x128xf32>
    %487 = arith.addf %485, %486 : vector<8x128xf32>
    %cst_172 = arith.constant 0.000000e+00 : f32
    %488 = vector.broadcast %cst_172 : f32 to vector<8x128xf32>
    %489 = arith.cmpf ogt, %466, %488 : vector<8x128xf32>
    %cst_173 = arith.constant 0.000000e+00 : f32
    %490 = vector.broadcast %cst_173 : f32 to vector<8x128xf32>
    %491 = arith.cmpf ogt, %473, %490 : vector<8x128xf32>
    %492 = arith.andi %489, %491 : vector<8x128xi1>
    %cst_174 = arith.constant 0.000000e+00 : f32
    %493 = vector.broadcast %cst_174 : f32 to vector<8x128xf32>
    %494 = arith.cmpf ogt, %480, %493 : vector<8x128xf32>
    %495 = arith.andi %492, %494 : vector<8x128xi1>
    %cst_175 = arith.constant 0.000000e+00 : f32
    %496 = vector.broadcast %cst_175 : f32 to vector<8x128xf32>
    %497 = arith.cmpf oge, %487, %496 : vector<8x128xf32>
    %498 = arith.andi %495, %497 : vector<8x128xi1>
    %499 = arith.cmpf olt, %487, %392 : vector<8x128xf32>
    %500 = arith.andi %498, %499 : vector<8x128xi1>
    %501 = vector.broadcast %435 : f32 to vector<8x128xf32>
    %502 = arith.mulf %501, %0 : vector<8x128xf32>
    %503 = vector.broadcast %438 : f32 to vector<8x128xf32>
    %504 = arith.mulf %503, %1 : vector<8x128xf32>
    %505 = arith.addf %502, %504 : vector<8x128xf32>
    %506 = vector.broadcast %441 : f32 to vector<8x128xf32>
    %507 = arith.addf %505, %506 : vector<8x128xf32>
    %508 = vector.broadcast %444 : f32 to vector<8x128xf32>
    %509 = arith.mulf %508, %0 : vector<8x128xf32>
    %510 = vector.broadcast %447 : f32 to vector<8x128xf32>
    %511 = arith.mulf %510, %1 : vector<8x128xf32>
    %512 = arith.addf %509, %511 : vector<8x128xf32>
    %513 = vector.broadcast %450 : f32 to vector<8x128xf32>
    %514 = arith.addf %512, %513 : vector<8x128xf32>
    %515 = vector.broadcast %453 : f32 to vector<8x128xf32>
    %516 = arith.mulf %515, %0 : vector<8x128xf32>
    %517 = vector.broadcast %456 : f32 to vector<8x128xf32>
    %518 = arith.mulf %517, %1 : vector<8x128xf32>
    %519 = arith.addf %516, %518 : vector<8x128xf32>
    %520 = vector.broadcast %459 : f32 to vector<8x128xf32>
    %521 = arith.addf %519, %520 : vector<8x128xf32>
    %522 = arith.select %500, %487, %392 : vector<8x128xi1>, vector<8x128xf32>
    %523 = arith.select %500, %507, %393 : vector<8x128xi1>, vector<8x128xf32>
    %524 = arith.select %500, %514, %394 : vector<8x128xi1>, vector<8x128xf32>
    %525 = arith.select %500, %521, %395 : vector<8x128xi1>, vector<8x128xf32>
    %c4_i32_176 = arith.constant 4 : i32
    %c21_i32_177 = arith.constant 21 : i32
    %526 = arith.muli %c21_i32_177, %c4_i32_176 : i32
    %c0_i32_178 = arith.constant 0 : i32
    %527 = arith.addi %526, %c0_i32_178 : i32
    %c0_179 = arith.constant 0 : index
    %528 = arith.index_cast %527 : i32 to index
    %529 = memref.load %arg3[%c0_179, %528] : memref<2x168xf32, #tpu.memory_space<smem>>
    %c1_i32_180 = arith.constant 1 : i32
    %530 = arith.addi %526, %c1_i32_180 : i32
    %c0_181 = arith.constant 0 : index
    %531 = arith.index_cast %530 : i32 to index
    %532 = memref.load %arg3[%c0_181, %531] : memref<2x168xf32, #tpu.memory_space<smem>>
    %c2_i32_182 = arith.constant 2 : i32
    %533 = arith.addi %526, %c2_i32_182 : i32
    %c0_183 = arith.constant 0 : index
    %534 = arith.index_cast %533 : i32 to index
    %535 = memref.load %arg3[%c0_183, %534] : memref<2x168xf32, #tpu.memory_space<smem>>
    %c3_i32_184 = arith.constant 3 : i32
    %536 = arith.addi %526, %c3_i32_184 : i32
    %c0_185 = arith.constant 0 : index
    %537 = arith.index_cast %536 : i32 to index
    %538 = memref.load %arg3[%c0_185, %537] : memref<2x168xf32, #tpu.memory_space<smem>>
    %c4_i32_186 = arith.constant 4 : i32
    %539 = arith.addi %526, %c4_i32_186 : i32
    %c0_187 = arith.constant 0 : index
    %540 = arith.index_cast %539 : i32 to index
    %541 = memref.load %arg3[%c0_187, %540] : memref<2x168xf32, #tpu.memory_space<smem>>
    %c5_i32_188 = arith.constant 5 : i32
    %542 = arith.addi %526, %c5_i32_188 : i32
    %c0_189 = arith.constant 0 : index
    %543 = arith.index_cast %542 : i32 to index
    %544 = memref.load %arg3[%c0_189, %543] : memref<2x168xf32, #tpu.memory_space<smem>>
    %c6_i32_190 = arith.constant 6 : i32
    %545 = arith.addi %526, %c6_i32_190 : i32
    %c0_191 = arith.constant 0 : index
    %546 = arith.index_cast %545 : i32 to index
    %547 = memref.load %arg3[%c0_191, %546] : memref<2x168xf32, #tpu.memory_space<smem>>
    %c7_i32_192 = arith.constant 7 : i32
    %548 = arith.addi %526, %c7_i32_192 : i32
    %c0_193 = arith.constant 0 : index
    %549 = arith.index_cast %548 : i32 to index
    %550 = memref.load %arg3[%c0_193, %549] : memref<2x168xf32, #tpu.memory_space<smem>>
    %c8_i32_194 = arith.constant 8 : i32
    %551 = arith.addi %526, %c8_i32_194 : i32
    %c0_195 = arith.constant 0 : index
    %552 = arith.index_cast %551 : i32 to index
    %553 = memref.load %arg3[%c0_195, %552] : memref<2x168xf32, #tpu.memory_space<smem>>
    %c9_i32_196 = arith.constant 9 : i32
    %554 = arith.addi %526, %c9_i32_196 : i32
    %c0_197 = arith.constant 0 : index
    %555 = arith.index_cast %554 : i32 to index
    %556 = memref.load %arg3[%c0_197, %555] : memref<2x168xf32, #tpu.memory_space<smem>>
    %c10_i32_198 = arith.constant 10 : i32
    %557 = arith.addi %526, %c10_i32_198 : i32
    %c0_199 = arith.constant 0 : index
    %558 = arith.index_cast %557 : i32 to index
    %559 = memref.load %arg3[%c0_199, %558] : memref<2x168xf32, #tpu.memory_space<smem>>
    %c11_i32_200 = arith.constant 11 : i32
    %560 = arith.addi %526, %c11_i32_200 : i32
    %c0_201 = arith.constant 0 : index
    %561 = arith.index_cast %560 : i32 to index
    %562 = memref.load %arg3[%c0_201, %561] : memref<2x168xf32, #tpu.memory_space<smem>>
    %c12_i32_202 = arith.constant 12 : i32
    %563 = arith.addi %526, %c12_i32_202 : i32
    %c0_203 = arith.constant 0 : index
    %564 = arith.index_cast %563 : i32 to index
    %565 = memref.load %arg3[%c0_203, %564] : memref<2x168xf32, #tpu.memory_space<smem>>
    %c13_i32_204 = arith.constant 13 : i32
    %566 = arith.addi %526, %c13_i32_204 : i32
    %c0_205 = arith.constant 0 : index
    %567 = arith.index_cast %566 : i32 to index
    %568 = memref.load %arg3[%c0_205, %567] : memref<2x168xf32, #tpu.memory_space<smem>>
    %c14_i32_206 = arith.constant 14 : i32
    %569 = arith.addi %526, %c14_i32_206 : i32
    %c0_207 = arith.constant 0 : index
    %570 = arith.index_cast %569 : i32 to index
    %571 = memref.load %arg3[%c0_207, %570] : memref<2x168xf32, #tpu.memory_space<smem>>
    %c15_i32_208 = arith.constant 15 : i32
    %572 = arith.addi %526, %c15_i32_208 : i32
    %c0_209 = arith.constant 0 : index
    %573 = arith.index_cast %572 : i32 to index
    %574 = memref.load %arg3[%c0_209, %573] : memref<2x168xf32, #tpu.memory_space<smem>>
    %c16_i32_210 = arith.constant 16 : i32
    %575 = arith.addi %526, %c16_i32_210 : i32
    %c0_211 = arith.constant 0 : index
    %576 = arith.index_cast %575 : i32 to index
    %577 = memref.load %arg3[%c0_211, %576] : memref<2x168xf32, #tpu.memory_space<smem>>
    %c17_i32_212 = arith.constant 17 : i32
    %578 = arith.addi %526, %c17_i32_212 : i32
    %c0_213 = arith.constant 0 : index
    %579 = arith.index_cast %578 : i32 to index
    %580 = memref.load %arg3[%c0_213, %579] : memref<2x168xf32, #tpu.memory_space<smem>>
    %c18_i32_214 = arith.constant 18 : i32
    %581 = arith.addi %526, %c18_i32_214 : i32
    %c0_215 = arith.constant 0 : index
    %582 = arith.index_cast %581 : i32 to index
    %583 = memref.load %arg3[%c0_215, %582] : memref<2x168xf32, #tpu.memory_space<smem>>
    %c19_i32_216 = arith.constant 19 : i32
    %584 = arith.addi %526, %c19_i32_216 : i32
    %c0_217 = arith.constant 0 : index
    %585 = arith.index_cast %584 : i32 to index
    %586 = memref.load %arg3[%c0_217, %585] : memref<2x168xf32, #tpu.memory_space<smem>>
    %c20_i32_218 = arith.constant 20 : i32
    %587 = arith.addi %526, %c20_i32_218 : i32
    %c0_219 = arith.constant 0 : index
    %588 = arith.index_cast %587 : i32 to index
    %589 = memref.load %arg3[%c0_219, %588] : memref<2x168xf32, #tpu.memory_space<smem>>
    %590 = vector.broadcast %529 : f32 to vector<8x128xf32>
    %591 = arith.mulf %590, %0 : vector<8x128xf32>
    %592 = vector.broadcast %532 : f32 to vector<8x128xf32>
    %593 = arith.mulf %592, %1 : vector<8x128xf32>
    %594 = arith.addf %591, %593 : vector<8x128xf32>
    %595 = vector.broadcast %535 : f32 to vector<8x128xf32>
    %596 = arith.addf %594, %595 : vector<8x128xf32>
    %597 = vector.broadcast %538 : f32 to vector<8x128xf32>
    %598 = arith.mulf %597, %0 : vector<8x128xf32>
    %599 = vector.broadcast %541 : f32 to vector<8x128xf32>
    %600 = arith.mulf %599, %1 : vector<8x128xf32>
    %601 = arith.addf %598, %600 : vector<8x128xf32>
    %602 = vector.broadcast %544 : f32 to vector<8x128xf32>
    %603 = arith.addf %601, %602 : vector<8x128xf32>
    %604 = vector.broadcast %547 : f32 to vector<8x128xf32>
    %605 = arith.mulf %604, %0 : vector<8x128xf32>
    %606 = vector.broadcast %550 : f32 to vector<8x128xf32>
    %607 = arith.mulf %606, %1 : vector<8x128xf32>
    %608 = arith.addf %605, %607 : vector<8x128xf32>
    %609 = vector.broadcast %553 : f32 to vector<8x128xf32>
    %610 = arith.addf %608, %609 : vector<8x128xf32>
    %611 = vector.broadcast %556 : f32 to vector<8x128xf32>
    %612 = arith.mulf %611, %0 : vector<8x128xf32>
    %613 = vector.broadcast %559 : f32 to vector<8x128xf32>
    %614 = arith.mulf %613, %1 : vector<8x128xf32>
    %615 = arith.addf %612, %614 : vector<8x128xf32>
    %616 = vector.broadcast %562 : f32 to vector<8x128xf32>
    %617 = arith.addf %615, %616 : vector<8x128xf32>
    %cst_220 = arith.constant 0.000000e+00 : f32
    %618 = vector.broadcast %cst_220 : f32 to vector<8x128xf32>
    %619 = arith.cmpf ogt, %596, %618 : vector<8x128xf32>
    %cst_221 = arith.constant 0.000000e+00 : f32
    %620 = vector.broadcast %cst_221 : f32 to vector<8x128xf32>
    %621 = arith.cmpf ogt, %603, %620 : vector<8x128xf32>
    %622 = arith.andi %619, %621 : vector<8x128xi1>
    %cst_222 = arith.constant 0.000000e+00 : f32
    %623 = vector.broadcast %cst_222 : f32 to vector<8x128xf32>
    %624 = arith.cmpf ogt, %610, %623 : vector<8x128xf32>
    %625 = arith.andi %622, %624 : vector<8x128xi1>
    %cst_223 = arith.constant 0.000000e+00 : f32
    %626 = vector.broadcast %cst_223 : f32 to vector<8x128xf32>
    %627 = arith.cmpf oge, %617, %626 : vector<8x128xf32>
    %628 = arith.andi %625, %627 : vector<8x128xi1>
    %629 = arith.cmpf olt, %617, %522 : vector<8x128xf32>
    %630 = arith.andi %628, %629 : vector<8x128xi1>
    %631 = vector.broadcast %565 : f32 to vector<8x128xf32>
    %632 = arith.mulf %631, %0 : vector<8x128xf32>
    %633 = vector.broadcast %568 : f32 to vector<8x128xf32>
    %634 = arith.mulf %633, %1 : vector<8x128xf32>
    %635 = arith.addf %632, %634 : vector<8x128xf32>
    %636 = vector.broadcast %571 : f32 to vector<8x128xf32>
    %637 = arith.addf %635, %636 : vector<8x128xf32>
    %638 = vector.broadcast %574 : f32 to vector<8x128xf32>
    %639 = arith.mulf %638, %0 : vector<8x128xf32>
    %640 = vector.broadcast %577 : f32 to vector<8x128xf32>
    %641 = arith.mulf %640, %1 : vector<8x128xf32>
    %642 = arith.addf %639, %641 : vector<8x128xf32>
    %643 = vector.broadcast %580 : f32 to vector<8x128xf32>
    %644 = arith.addf %642, %643 : vector<8x128xf32>
    %645 = vector.broadcast %583 : f32 to vector<8x128xf32>
    %646 = arith.mulf %645, %0 : vector<8x128xf32>
    %647 = vector.broadcast %586 : f32 to vector<8x128xf32>
    %648 = arith.mulf %647, %1 : vector<8x128xf32>
    %649 = arith.addf %646, %648 : vector<8x128xf32>
    %650 = vector.broadcast %589 : f32 to vector<8x128xf32>
    %651 = arith.addf %649, %650 : vector<8x128xf32>
    %652 = arith.select %630, %617, %522 : vector<8x128xi1>, vector<8x128xf32>
    %653 = arith.select %630, %637, %523 : vector<8x128xi1>, vector<8x128xf32>
    %654 = arith.select %630, %644, %524 : vector<8x128xi1>, vector<8x128xf32>
    %655 = arith.select %630, %651, %525 : vector<8x128xi1>, vector<8x128xf32>
    %c5_i32_224 = arith.constant 5 : i32
    %c21_i32_225 = arith.constant 21 : i32
    %656 = arith.muli %c21_i32_225, %c5_i32_224 : i32
    %c0_i32_226 = arith.constant 0 : i32
    %657 = arith.addi %656, %c0_i32_226 : i32
    %c0_227 = arith.constant 0 : index
    %658 = arith.index_cast %657 : i32 to index
    %659 = memref.load %arg3[%c0_227, %658] : memref<2x168xf32, #tpu.memory_space<smem>>
    %c1_i32_228 = arith.constant 1 : i32
    %660 = arith.addi %656, %c1_i32_228 : i32
    %c0_229 = arith.constant 0 : index
    %661 = arith.index_cast %660 : i32 to index
    %662 = memref.load %arg3[%c0_229, %661] : memref<2x168xf32, #tpu.memory_space<smem>>
    %c2_i32_230 = arith.constant 2 : i32
    %663 = arith.addi %656, %c2_i32_230 : i32
    %c0_231 = arith.constant 0 : index
    %664 = arith.index_cast %663 : i32 to index
    %665 = memref.load %arg3[%c0_231, %664] : memref<2x168xf32, #tpu.memory_space<smem>>
    %c3_i32_232 = arith.constant 3 : i32
    %666 = arith.addi %656, %c3_i32_232 : i32
    %c0_233 = arith.constant 0 : index
    %667 = arith.index_cast %666 : i32 to index
    %668 = memref.load %arg3[%c0_233, %667] : memref<2x168xf32, #tpu.memory_space<smem>>
    %c4_i32_234 = arith.constant 4 : i32
    %669 = arith.addi %656, %c4_i32_234 : i32
    %c0_235 = arith.constant 0 : index
    %670 = arith.index_cast %669 : i32 to index
    %671 = memref.load %arg3[%c0_235, %670] : memref<2x168xf32, #tpu.memory_space<smem>>
    %c5_i32_236 = arith.constant 5 : i32
    %672 = arith.addi %656, %c5_i32_236 : i32
    %c0_237 = arith.constant 0 : index
    %673 = arith.index_cast %672 : i32 to index
    %674 = memref.load %arg3[%c0_237, %673] : memref<2x168xf32, #tpu.memory_space<smem>>
    %c6_i32_238 = arith.constant 6 : i32
    %675 = arith.addi %656, %c6_i32_238 : i32
    %c0_239 = arith.constant 0 : index
    %676 = arith.index_cast %675 : i32 to index
    %677 = memref.load %arg3[%c0_239, %676] : memref<2x168xf32, #tpu.memory_space<smem>>
    %c7_i32_240 = arith.constant 7 : i32
    %678 = arith.addi %656, %c7_i32_240 : i32
    %c0_241 = arith.constant 0 : index
    %679 = arith.index_cast %678 : i32 to index
    %680 = memref.load %arg3[%c0_241, %679] : memref<2x168xf32, #tpu.memory_space<smem>>
    %c8_i32_242 = arith.constant 8 : i32
    %681 = arith.addi %656, %c8_i32_242 : i32
    %c0_243 = arith.constant 0 : index
    %682 = arith.index_cast %681 : i32 to index
    %683 = memref.load %arg3[%c0_243, %682] : memref<2x168xf32, #tpu.memory_space<smem>>
    %c9_i32_244 = arith.constant 9 : i32
    %684 = arith.addi %656, %c9_i32_244 : i32
    %c0_245 = arith.constant 0 : index
    %685 = arith.index_cast %684 : i32 to index
    %686 = memref.load %arg3[%c0_245, %685] : memref<2x168xf32, #tpu.memory_space<smem>>
    %c10_i32_246 = arith.constant 10 : i32
    %687 = arith.addi %656, %c10_i32_246 : i32
    %c0_247 = arith.constant 0 : index
    %688 = arith.index_cast %687 : i32 to index
    %689 = memref.load %arg3[%c0_247, %688] : memref<2x168xf32, #tpu.memory_space<smem>>
    %c11_i32_248 = arith.constant 11 : i32
    %690 = arith.addi %656, %c11_i32_248 : i32
    %c0_249 = arith.constant 0 : index
    %691 = arith.index_cast %690 : i32 to index
    %692 = memref.load %arg3[%c0_249, %691] : memref<2x168xf32, #tpu.memory_space<smem>>
    %c12_i32_250 = arith.constant 12 : i32
    %693 = arith.addi %656, %c12_i32_250 : i32
    %c0_251 = arith.constant 0 : index
    %694 = arith.index_cast %693 : i32 to index
    %695 = memref.load %arg3[%c0_251, %694] : memref<2x168xf32, #tpu.memory_space<smem>>
    %c13_i32_252 = arith.constant 13 : i32
    %696 = arith.addi %656, %c13_i32_252 : i32
    %c0_253 = arith.constant 0 : index
    %697 = arith.index_cast %696 : i32 to index
    %698 = memref.load %arg3[%c0_253, %697] : memref<2x168xf32, #tpu.memory_space<smem>>
    %c14_i32_254 = arith.constant 14 : i32
    %699 = arith.addi %656, %c14_i32_254 : i32
    %c0_255 = arith.constant 0 : index
    %700 = arith.index_cast %699 : i32 to index
    %701 = memref.load %arg3[%c0_255, %700] : memref<2x168xf32, #tpu.memory_space<smem>>
    %c15_i32_256 = arith.constant 15 : i32
    %702 = arith.addi %656, %c15_i32_256 : i32
    %c0_257 = arith.constant 0 : index
    %703 = arith.index_cast %702 : i32 to index
    %704 = memref.load %arg3[%c0_257, %703] : memref<2x168xf32, #tpu.memory_space<smem>>
    %c16_i32_258 = arith.constant 16 : i32
    %705 = arith.addi %656, %c16_i32_258 : i32
    %c0_259 = arith.constant 0 : index
    %706 = arith.index_cast %705 : i32 to index
    %707 = memref.load %arg3[%c0_259, %706] : memref<2x168xf32, #tpu.memory_space<smem>>
    %c17_i32_260 = arith.constant 17 : i32
    %708 = arith.addi %656, %c17_i32_260 : i32
    %c0_261 = arith.constant 0 : index
    %709 = arith.index_cast %708 : i32 to index
    %710 = memref.load %arg3[%c0_261, %709] : memref<2x168xf32, #tpu.memory_space<smem>>
    %c18_i32_262 = arith.constant 18 : i32
    %711 = arith.addi %656, %c18_i32_262 : i32
    %c0_263 = arith.constant 0 : index
    %712 = arith.index_cast %711 : i32 to index
    %713 = memref.load %arg3[%c0_263, %712] : memref<2x168xf32, #tpu.memory_space<smem>>
    %c19_i32_264 = arith.constant 19 : i32
    %714 = arith.addi %656, %c19_i32_264 : i32
    %c0_265 = arith.constant 0 : index
    %715 = arith.index_cast %714 : i32 to index
    %716 = memref.load %arg3[%c0_265, %715] : memref<2x168xf32, #tpu.memory_space<smem>>
    %c20_i32_266 = arith.constant 20 : i32
    %717 = arith.addi %656, %c20_i32_266 : i32
    %c0_267 = arith.constant 0 : index
    %718 = arith.index_cast %717 : i32 to index
    %719 = memref.load %arg3[%c0_267, %718] : memref<2x168xf32, #tpu.memory_space<smem>>
    %720 = vector.broadcast %659 : f32 to vector<8x128xf32>
    %721 = arith.mulf %720, %0 : vector<8x128xf32>
    %722 = vector.broadcast %662 : f32 to vector<8x128xf32>
    %723 = arith.mulf %722, %1 : vector<8x128xf32>
    %724 = arith.addf %721, %723 : vector<8x128xf32>
    %725 = vector.broadcast %665 : f32 to vector<8x128xf32>
    %726 = arith.addf %724, %725 : vector<8x128xf32>
    %727 = vector.broadcast %668 : f32 to vector<8x128xf32>
    %728 = arith.mulf %727, %0 : vector<8x128xf32>
    %729 = vector.broadcast %671 : f32 to vector<8x128xf32>
    %730 = arith.mulf %729, %1 : vector<8x128xf32>
    %731 = arith.addf %728, %730 : vector<8x128xf32>
    %732 = vector.broadcast %674 : f32 to vector<8x128xf32>
    %733 = arith.addf %731, %732 : vector<8x128xf32>
    %734 = vector.broadcast %677 : f32 to vector<8x128xf32>
    %735 = arith.mulf %734, %0 : vector<8x128xf32>
    %736 = vector.broadcast %680 : f32 to vector<8x128xf32>
    %737 = arith.mulf %736, %1 : vector<8x128xf32>
    %738 = arith.addf %735, %737 : vector<8x128xf32>
    %739 = vector.broadcast %683 : f32 to vector<8x128xf32>
    %740 = arith.addf %738, %739 : vector<8x128xf32>
    %741 = vector.broadcast %686 : f32 to vector<8x128xf32>
    %742 = arith.mulf %741, %0 : vector<8x128xf32>
    %743 = vector.broadcast %689 : f32 to vector<8x128xf32>
    %744 = arith.mulf %743, %1 : vector<8x128xf32>
    %745 = arith.addf %742, %744 : vector<8x128xf32>
    %746 = vector.broadcast %692 : f32 to vector<8x128xf32>
    %747 = arith.addf %745, %746 : vector<8x128xf32>
    %cst_268 = arith.constant 0.000000e+00 : f32
    %748 = vector.broadcast %cst_268 : f32 to vector<8x128xf32>
    %749 = arith.cmpf ogt, %726, %748 : vector<8x128xf32>
    %cst_269 = arith.constant 0.000000e+00 : f32
    %750 = vector.broadcast %cst_269 : f32 to vector<8x128xf32>
    %751 = arith.cmpf ogt, %733, %750 : vector<8x128xf32>
    %752 = arith.andi %749, %751 : vector<8x128xi1>
    %cst_270 = arith.constant 0.000000e+00 : f32
    %753 = vector.broadcast %cst_270 : f32 to vector<8x128xf32>
    %754 = arith.cmpf ogt, %740, %753 : vector<8x128xf32>
    %755 = arith.andi %752, %754 : vector<8x128xi1>
    %cst_271 = arith.constant 0.000000e+00 : f32
    %756 = vector.broadcast %cst_271 : f32 to vector<8x128xf32>
    %757 = arith.cmpf oge, %747, %756 : vector<8x128xf32>
    %758 = arith.andi %755, %757 : vector<8x128xi1>
    %759 = arith.cmpf olt, %747, %652 : vector<8x128xf32>
    %760 = arith.andi %758, %759 : vector<8x128xi1>
    %761 = vector.broadcast %695 : f32 to vector<8x128xf32>
    %762 = arith.mulf %761, %0 : vector<8x128xf32>
    %763 = vector.broadcast %698 : f32 to vector<8x128xf32>
    %764 = arith.mulf %763, %1 : vector<8x128xf32>
    %765 = arith.addf %762, %764 : vector<8x128xf32>
    %766 = vector.broadcast %701 : f32 to vector<8x128xf32>
    %767 = arith.addf %765, %766 : vector<8x128xf32>
    %768 = vector.broadcast %704 : f32 to vector<8x128xf32>
    %769 = arith.mulf %768, %0 : vector<8x128xf32>
    %770 = vector.broadcast %707 : f32 to vector<8x128xf32>
    %771 = arith.mulf %770, %1 : vector<8x128xf32>
    %772 = arith.addf %769, %771 : vector<8x128xf32>
    %773 = vector.broadcast %710 : f32 to vector<8x128xf32>
    %774 = arith.addf %772, %773 : vector<8x128xf32>
    %775 = vector.broadcast %713 : f32 to vector<8x128xf32>
    %776 = arith.mulf %775, %0 : vector<8x128xf32>
    %777 = vector.broadcast %716 : f32 to vector<8x128xf32>
    %778 = arith.mulf %777, %1 : vector<8x128xf32>
    %779 = arith.addf %776, %778 : vector<8x128xf32>
    %780 = vector.broadcast %719 : f32 to vector<8x128xf32>
    %781 = arith.addf %779, %780 : vector<8x128xf32>
    %782 = arith.select %760, %747, %652 : vector<8x128xi1>, vector<8x128xf32>
    %783 = arith.select %760, %767, %653 : vector<8x128xi1>, vector<8x128xf32>
    %784 = arith.select %760, %774, %654 : vector<8x128xi1>, vector<8x128xf32>
    %785 = arith.select %760, %781, %655 : vector<8x128xi1>, vector<8x128xf32>
    %c6_i32_272 = arith.constant 6 : i32
    %c21_i32_273 = arith.constant 21 : i32
    %786 = arith.muli %c21_i32_273, %c6_i32_272 : i32
    %c0_i32_274 = arith.constant 0 : i32
    %787 = arith.addi %786, %c0_i32_274 : i32
    %c0_275 = arith.constant 0 : index
    %788 = arith.index_cast %787 : i32 to index
    %789 = memref.load %arg3[%c0_275, %788] : memref<2x168xf32, #tpu.memory_space<smem>>
    %c1_i32_276 = arith.constant 1 : i32
    %790 = arith.addi %786, %c1_i32_276 : i32
    %c0_277 = arith.constant 0 : index
    %791 = arith.index_cast %790 : i32 to index
    %792 = memref.load %arg3[%c0_277, %791] : memref<2x168xf32, #tpu.memory_space<smem>>
    %c2_i32_278 = arith.constant 2 : i32
    %793 = arith.addi %786, %c2_i32_278 : i32
    %c0_279 = arith.constant 0 : index
    %794 = arith.index_cast %793 : i32 to index
    %795 = memref.load %arg3[%c0_279, %794] : memref<2x168xf32, #tpu.memory_space<smem>>
    %c3_i32_280 = arith.constant 3 : i32
    %796 = arith.addi %786, %c3_i32_280 : i32
    %c0_281 = arith.constant 0 : index
    %797 = arith.index_cast %796 : i32 to index
    %798 = memref.load %arg3[%c0_281, %797] : memref<2x168xf32, #tpu.memory_space<smem>>
    %c4_i32_282 = arith.constant 4 : i32
    %799 = arith.addi %786, %c4_i32_282 : i32
    %c0_283 = arith.constant 0 : index
    %800 = arith.index_cast %799 : i32 to index
    %801 = memref.load %arg3[%c0_283, %800] : memref<2x168xf32, #tpu.memory_space<smem>>
    %c5_i32_284 = arith.constant 5 : i32
    %802 = arith.addi %786, %c5_i32_284 : i32
    %c0_285 = arith.constant 0 : index
    %803 = arith.index_cast %802 : i32 to index
    %804 = memref.load %arg3[%c0_285, %803] : memref<2x168xf32, #tpu.memory_space<smem>>
    %c6_i32_286 = arith.constant 6 : i32
    %805 = arith.addi %786, %c6_i32_286 : i32
    %c0_287 = arith.constant 0 : index
    %806 = arith.index_cast %805 : i32 to index
    %807 = memref.load %arg3[%c0_287, %806] : memref<2x168xf32, #tpu.memory_space<smem>>
    %c7_i32_288 = arith.constant 7 : i32
    %808 = arith.addi %786, %c7_i32_288 : i32
    %c0_289 = arith.constant 0 : index
    %809 = arith.index_cast %808 : i32 to index
    %810 = memref.load %arg3[%c0_289, %809] : memref<2x168xf32, #tpu.memory_space<smem>>
    %c8_i32_290 = arith.constant 8 : i32
    %811 = arith.addi %786, %c8_i32_290 : i32
    %c0_291 = arith.constant 0 : index
    %812 = arith.index_cast %811 : i32 to index
    %813 = memref.load %arg3[%c0_291, %812] : memref<2x168xf32, #tpu.memory_space<smem>>
    %c9_i32_292 = arith.constant 9 : i32
    %814 = arith.addi %786, %c9_i32_292 : i32
    %c0_293 = arith.constant 0 : index
    %815 = arith.index_cast %814 : i32 to index
    %816 = memref.load %arg3[%c0_293, %815] : memref<2x168xf32, #tpu.memory_space<smem>>
    %c10_i32_294 = arith.constant 10 : i32
    %817 = arith.addi %786, %c10_i32_294 : i32
    %c0_295 = arith.constant 0 : index
    %818 = arith.index_cast %817 : i32 to index
    %819 = memref.load %arg3[%c0_295, %818] : memref<2x168xf32, #tpu.memory_space<smem>>
    %c11_i32_296 = arith.constant 11 : i32
    %820 = arith.addi %786, %c11_i32_296 : i32
    %c0_297 = arith.constant 0 : index
    %821 = arith.index_cast %820 : i32 to index
    %822 = memref.load %arg3[%c0_297, %821] : memref<2x168xf32, #tpu.memory_space<smem>>
    %c12_i32_298 = arith.constant 12 : i32
    %823 = arith.addi %786, %c12_i32_298 : i32
    %c0_299 = arith.constant 0 : index
    %824 = arith.index_cast %823 : i32 to index
    %825 = memref.load %arg3[%c0_299, %824] : memref<2x168xf32, #tpu.memory_space<smem>>
    %c13_i32_300 = arith.constant 13 : i32
    %826 = arith.addi %786, %c13_i32_300 : i32
    %c0_301 = arith.constant 0 : index
    %827 = arith.index_cast %826 : i32 to index
    %828 = memref.load %arg3[%c0_301, %827] : memref<2x168xf32, #tpu.memory_space<smem>>
    %c14_i32_302 = arith.constant 14 : i32
    %829 = arith.addi %786, %c14_i32_302 : i32
    %c0_303 = arith.constant 0 : index
    %830 = arith.index_cast %829 : i32 to index
    %831 = memref.load %arg3[%c0_303, %830] : memref<2x168xf32, #tpu.memory_space<smem>>
    %c15_i32_304 = arith.constant 15 : i32
    %832 = arith.addi %786, %c15_i32_304 : i32
    %c0_305 = arith.constant 0 : index
    %833 = arith.index_cast %832 : i32 to index
    %834 = memref.load %arg3[%c0_305, %833] : memref<2x168xf32, #tpu.memory_space<smem>>
    %c16_i32_306 = arith.constant 16 : i32
    %835 = arith.addi %786, %c16_i32_306 : i32
    %c0_307 = arith.constant 0 : index
    %836 = arith.index_cast %835 : i32 to index
    %837 = memref.load %arg3[%c0_307, %836] : memref<2x168xf32, #tpu.memory_space<smem>>
    %c17_i32_308 = arith.constant 17 : i32
    %838 = arith.addi %786, %c17_i32_308 : i32
    %c0_309 = arith.constant 0 : index
    %839 = arith.index_cast %838 : i32 to index
    %840 = memref.load %arg3[%c0_309, %839] : memref<2x168xf32, #tpu.memory_space<smem>>
    %c18_i32_310 = arith.constant 18 : i32
    %841 = arith.addi %786, %c18_i32_310 : i32
    %c0_311 = arith.constant 0 : index
    %842 = arith.index_cast %841 : i32 to index
    %843 = memref.load %arg3[%c0_311, %842] : memref<2x168xf32, #tpu.memory_space<smem>>
    %c19_i32_312 = arith.constant 19 : i32
    %844 = arith.addi %786, %c19_i32_312 : i32
    %c0_313 = arith.constant 0 : index
    %845 = arith.index_cast %844 : i32 to index
    %846 = memref.load %arg3[%c0_313, %845] : memref<2x168xf32, #tpu.memory_space<smem>>
    %c20_i32_314 = arith.constant 20 : i32
    %847 = arith.addi %786, %c20_i32_314 : i32
    %c0_315 = arith.constant 0 : index
    %848 = arith.index_cast %847 : i32 to index
    %849 = memref.load %arg3[%c0_315, %848] : memref<2x168xf32, #tpu.memory_space<smem>>
    %850 = vector.broadcast %789 : f32 to vector<8x128xf32>
    %851 = arith.mulf %850, %0 : vector<8x128xf32>
    %852 = vector.broadcast %792 : f32 to vector<8x128xf32>
    %853 = arith.mulf %852, %1 : vector<8x128xf32>
    %854 = arith.addf %851, %853 : vector<8x128xf32>
    %855 = vector.broadcast %795 : f32 to vector<8x128xf32>
    %856 = arith.addf %854, %855 : vector<8x128xf32>
    %857 = vector.broadcast %798 : f32 to vector<8x128xf32>
    %858 = arith.mulf %857, %0 : vector<8x128xf32>
    %859 = vector.broadcast %801 : f32 to vector<8x128xf32>
    %860 = arith.mulf %859, %1 : vector<8x128xf32>
    %861 = arith.addf %858, %860 : vector<8x128xf32>
    %862 = vector.broadcast %804 : f32 to vector<8x128xf32>
    %863 = arith.addf %861, %862 : vector<8x128xf32>
    %864 = vector.broadcast %807 : f32 to vector<8x128xf32>
    %865 = arith.mulf %864, %0 : vector<8x128xf32>
    %866 = vector.broadcast %810 : f32 to vector<8x128xf32>
    %867 = arith.mulf %866, %1 : vector<8x128xf32>
    %868 = arith.addf %865, %867 : vector<8x128xf32>
    %869 = vector.broadcast %813 : f32 to vector<8x128xf32>
    %870 = arith.addf %868, %869 : vector<8x128xf32>
    %871 = vector.broadcast %816 : f32 to vector<8x128xf32>
    %872 = arith.mulf %871, %0 : vector<8x128xf32>
    %873 = vector.broadcast %819 : f32 to vector<8x128xf32>
    %874 = arith.mulf %873, %1 : vector<8x128xf32>
    %875 = arith.addf %872, %874 : vector<8x128xf32>
    %876 = vector.broadcast %822 : f32 to vector<8x128xf32>
    %877 = arith.addf %875, %876 : vector<8x128xf32>
    %cst_316 = arith.constant 0.000000e+00 : f32
    %878 = vector.broadcast %cst_316 : f32 to vector<8x128xf32>
    %879 = arith.cmpf ogt, %856, %878 : vector<8x128xf32>
    %cst_317 = arith.constant 0.000000e+00 : f32
    %880 = vector.broadcast %cst_317 : f32 to vector<8x128xf32>
    %881 = arith.cmpf ogt, %863, %880 : vector<8x128xf32>
    %882 = arith.andi %879, %881 : vector<8x128xi1>
    %cst_318 = arith.constant 0.000000e+00 : f32
    %883 = vector.broadcast %cst_318 : f32 to vector<8x128xf32>
    %884 = arith.cmpf ogt, %870, %883 : vector<8x128xf32>
    %885 = arith.andi %882, %884 : vector<8x128xi1>
    %cst_319 = arith.constant 0.000000e+00 : f32
    %886 = vector.broadcast %cst_319 : f32 to vector<8x128xf32>
    %887 = arith.cmpf oge, %877, %886 : vector<8x128xf32>
    %888 = arith.andi %885, %887 : vector<8x128xi1>
    %889 = arith.cmpf olt, %877, %782 : vector<8x128xf32>
    %890 = arith.andi %888, %889 : vector<8x128xi1>
    %891 = vector.broadcast %825 : f32 to vector<8x128xf32>
    %892 = arith.mulf %891, %0 : vector<8x128xf32>
    %893 = vector.broadcast %828 : f32 to vector<8x128xf32>
    %894 = arith.mulf %893, %1 : vector<8x128xf32>
    %895 = arith.addf %892, %894 : vector<8x128xf32>
    %896 = vector.broadcast %831 : f32 to vector<8x128xf32>
    %897 = arith.addf %895, %896 : vector<8x128xf32>
    %898 = vector.broadcast %834 : f32 to vector<8x128xf32>
    %899 = arith.mulf %898, %0 : vector<8x128xf32>
    %900 = vector.broadcast %837 : f32 to vector<8x128xf32>
    %901 = arith.mulf %900, %1 : vector<8x128xf32>
    %902 = arith.addf %899, %901 : vector<8x128xf32>
    %903 = vector.broadcast %840 : f32 to vector<8x128xf32>
    %904 = arith.addf %902, %903 : vector<8x128xf32>
    %905 = vector.broadcast %843 : f32 to vector<8x128xf32>
    %906 = arith.mulf %905, %0 : vector<8x128xf32>
    %907 = vector.broadcast %846 : f32 to vector<8x128xf32>
    %908 = arith.mulf %907, %1 : vector<8x128xf32>
    %909 = arith.addf %906, %908 : vector<8x128xf32>
    %910 = vector.broadcast %849 : f32 to vector<8x128xf32>
    %911 = arith.addf %909, %910 : vector<8x128xf32>
    %912 = arith.select %890, %877, %782 : vector<8x128xi1>, vector<8x128xf32>
    %913 = arith.select %890, %897, %783 : vector<8x128xi1>, vector<8x128xf32>
    %914 = arith.select %890, %904, %784 : vector<8x128xi1>, vector<8x128xf32>
    %915 = arith.select %890, %911, %785 : vector<8x128xi1>, vector<8x128xf32>
    %c7_i32_320 = arith.constant 7 : i32
    %c21_i32_321 = arith.constant 21 : i32
    %916 = arith.muli %c21_i32_321, %c7_i32_320 : i32
    %c0_i32_322 = arith.constant 0 : i32
    %917 = arith.addi %916, %c0_i32_322 : i32
    %c0_323 = arith.constant 0 : index
    %918 = arith.index_cast %917 : i32 to index
    %919 = memref.load %arg3[%c0_323, %918] : memref<2x168xf32, #tpu.memory_space<smem>>
    %c1_i32_324 = arith.constant 1 : i32
    %920 = arith.addi %916, %c1_i32_324 : i32
    %c0_325 = arith.constant 0 : index
    %921 = arith.index_cast %920 : i32 to index
    %922 = memref.load %arg3[%c0_325, %921] : memref<2x168xf32, #tpu.memory_space<smem>>
    %c2_i32_326 = arith.constant 2 : i32
    %923 = arith.addi %916, %c2_i32_326 : i32
    %c0_327 = arith.constant 0 : index
    %924 = arith.index_cast %923 : i32 to index
    %925 = memref.load %arg3[%c0_327, %924] : memref<2x168xf32, #tpu.memory_space<smem>>
    %c3_i32_328 = arith.constant 3 : i32
    %926 = arith.addi %916, %c3_i32_328 : i32
    %c0_329 = arith.constant 0 : index
    %927 = arith.index_cast %926 : i32 to index
    %928 = memref.load %arg3[%c0_329, %927] : memref<2x168xf32, #tpu.memory_space<smem>>
    %c4_i32_330 = arith.constant 4 : i32
    %929 = arith.addi %916, %c4_i32_330 : i32
    %c0_331 = arith.constant 0 : index
    %930 = arith.index_cast %929 : i32 to index
    %931 = memref.load %arg3[%c0_331, %930] : memref<2x168xf32, #tpu.memory_space<smem>>
    %c5_i32_332 = arith.constant 5 : i32
    %932 = arith.addi %916, %c5_i32_332 : i32
    %c0_333 = arith.constant 0 : index
    %933 = arith.index_cast %932 : i32 to index
    %934 = memref.load %arg3[%c0_333, %933] : memref<2x168xf32, #tpu.memory_space<smem>>
    %c6_i32_334 = arith.constant 6 : i32
    %935 = arith.addi %916, %c6_i32_334 : i32
    %c0_335 = arith.constant 0 : index
    %936 = arith.index_cast %935 : i32 to index
    %937 = memref.load %arg3[%c0_335, %936] : memref<2x168xf32, #tpu.memory_space<smem>>
    %c7_i32_336 = arith.constant 7 : i32
    %938 = arith.addi %916, %c7_i32_336 : i32
    %c0_337 = arith.constant 0 : index
    %939 = arith.index_cast %938 : i32 to index
    %940 = memref.load %arg3[%c0_337, %939] : memref<2x168xf32, #tpu.memory_space<smem>>
    %c8_i32_338 = arith.constant 8 : i32
    %941 = arith.addi %916, %c8_i32_338 : i32
    %c0_339 = arith.constant 0 : index
    %942 = arith.index_cast %941 : i32 to index
    %943 = memref.load %arg3[%c0_339, %942] : memref<2x168xf32, #tpu.memory_space<smem>>
    %c9_i32_340 = arith.constant 9 : i32
    %944 = arith.addi %916, %c9_i32_340 : i32
    %c0_341 = arith.constant 0 : index
    %945 = arith.index_cast %944 : i32 to index
    %946 = memref.load %arg3[%c0_341, %945] : memref<2x168xf32, #tpu.memory_space<smem>>
    %c10_i32_342 = arith.constant 10 : i32
    %947 = arith.addi %916, %c10_i32_342 : i32
    %c0_343 = arith.constant 0 : index
    %948 = arith.index_cast %947 : i32 to index
    %949 = memref.load %arg3[%c0_343, %948] : memref<2x168xf32, #tpu.memory_space<smem>>
    %c11_i32_344 = arith.constant 11 : i32
    %950 = arith.addi %916, %c11_i32_344 : i32
    %c0_345 = arith.constant 0 : index
    %951 = arith.index_cast %950 : i32 to index
    %952 = memref.load %arg3[%c0_345, %951] : memref<2x168xf32, #tpu.memory_space<smem>>
    %c12_i32_346 = arith.constant 12 : i32
    %953 = arith.addi %916, %c12_i32_346 : i32
    %c0_347 = arith.constant 0 : index
    %954 = arith.index_cast %953 : i32 to index
    %955 = memref.load %arg3[%c0_347, %954] : memref<2x168xf32, #tpu.memory_space<smem>>
    %c13_i32_348 = arith.constant 13 : i32
    %956 = arith.addi %916, %c13_i32_348 : i32
    %c0_349 = arith.constant 0 : index
    %957 = arith.index_cast %956 : i32 to index
    %958 = memref.load %arg3[%c0_349, %957] : memref<2x168xf32, #tpu.memory_space<smem>>
    %c14_i32_350 = arith.constant 14 : i32
    %959 = arith.addi %916, %c14_i32_350 : i32
    %c0_351 = arith.constant 0 : index
    %960 = arith.index_cast %959 : i32 to index
    %961 = memref.load %arg3[%c0_351, %960] : memref<2x168xf32, #tpu.memory_space<smem>>
    %c15_i32_352 = arith.constant 15 : i32
    %962 = arith.addi %916, %c15_i32_352 : i32
    %c0_353 = arith.constant 0 : index
    %963 = arith.index_cast %962 : i32 to index
    %964 = memref.load %arg3[%c0_353, %963] : memref<2x168xf32, #tpu.memory_space<smem>>
    %c16_i32_354 = arith.constant 16 : i32
    %965 = arith.addi %916, %c16_i32_354 : i32
    %c0_355 = arith.constant 0 : index
    %966 = arith.index_cast %965 : i32 to index
    %967 = memref.load %arg3[%c0_355, %966] : memref<2x168xf32, #tpu.memory_space<smem>>
    %c17_i32_356 = arith.constant 17 : i32
    %968 = arith.addi %916, %c17_i32_356 : i32
    %c0_357 = arith.constant 0 : index
    %969 = arith.index_cast %968 : i32 to index
    %970 = memref.load %arg3[%c0_357, %969] : memref<2x168xf32, #tpu.memory_space<smem>>
    %c18_i32_358 = arith.constant 18 : i32
    %971 = arith.addi %916, %c18_i32_358 : i32
    %c0_359 = arith.constant 0 : index
    %972 = arith.index_cast %971 : i32 to index
    %973 = memref.load %arg3[%c0_359, %972] : memref<2x168xf32, #tpu.memory_space<smem>>
    %c19_i32_360 = arith.constant 19 : i32
    %974 = arith.addi %916, %c19_i32_360 : i32
    %c0_361 = arith.constant 0 : index
    %975 = arith.index_cast %974 : i32 to index
    %976 = memref.load %arg3[%c0_361, %975] : memref<2x168xf32, #tpu.memory_space<smem>>
    %c20_i32_362 = arith.constant 20 : i32
    %977 = arith.addi %916, %c20_i32_362 : i32
    %c0_363 = arith.constant 0 : index
    %978 = arith.index_cast %977 : i32 to index
    %979 = memref.load %arg3[%c0_363, %978] : memref<2x168xf32, #tpu.memory_space<smem>>
    %980 = vector.broadcast %919 : f32 to vector<8x128xf32>
    %981 = arith.mulf %980, %0 : vector<8x128xf32>
    %982 = vector.broadcast %922 : f32 to vector<8x128xf32>
    %983 = arith.mulf %982, %1 : vector<8x128xf32>
    %984 = arith.addf %981, %983 : vector<8x128xf32>
    %985 = vector.broadcast %925 : f32 to vector<8x128xf32>
    %986 = arith.addf %984, %985 : vector<8x128xf32>
    %987 = vector.broadcast %928 : f32 to vector<8x128xf32>
    %988 = arith.mulf %987, %0 : vector<8x128xf32>
    %989 = vector.broadcast %931 : f32 to vector<8x128xf32>
    %990 = arith.mulf %989, %1 : vector<8x128xf32>
    %991 = arith.addf %988, %990 : vector<8x128xf32>
    %992 = vector.broadcast %934 : f32 to vector<8x128xf32>
    %993 = arith.addf %991, %992 : vector<8x128xf32>
    %994 = vector.broadcast %937 : f32 to vector<8x128xf32>
    %995 = arith.mulf %994, %0 : vector<8x128xf32>
    %996 = vector.broadcast %940 : f32 to vector<8x128xf32>
    %997 = arith.mulf %996, %1 : vector<8x128xf32>
    %998 = arith.addf %995, %997 : vector<8x128xf32>
    %999 = vector.broadcast %943 : f32 to vector<8x128xf32>
    %1000 = arith.addf %998, %999 : vector<8x128xf32>
    %1001 = vector.broadcast %946 : f32 to vector<8x128xf32>
    %1002 = arith.mulf %1001, %0 : vector<8x128xf32>
    %1003 = vector.broadcast %949 : f32 to vector<8x128xf32>
    %1004 = arith.mulf %1003, %1 : vector<8x128xf32>
    %1005 = arith.addf %1002, %1004 : vector<8x128xf32>
    %1006 = vector.broadcast %952 : f32 to vector<8x128xf32>
    %1007 = arith.addf %1005, %1006 : vector<8x128xf32>
    %cst_364 = arith.constant 0.000000e+00 : f32
    %1008 = vector.broadcast %cst_364 : f32 to vector<8x128xf32>
    %1009 = arith.cmpf ogt, %986, %1008 : vector<8x128xf32>
    %cst_365 = arith.constant 0.000000e+00 : f32
    %1010 = vector.broadcast %cst_365 : f32 to vector<8x128xf32>
    %1011 = arith.cmpf ogt, %993, %1010 : vector<8x128xf32>
    %1012 = arith.andi %1009, %1011 : vector<8x128xi1>
    %cst_366 = arith.constant 0.000000e+00 : f32
    %1013 = vector.broadcast %cst_366 : f32 to vector<8x128xf32>
    %1014 = arith.cmpf ogt, %1000, %1013 : vector<8x128xf32>
    %1015 = arith.andi %1012, %1014 : vector<8x128xi1>
    %cst_367 = arith.constant 0.000000e+00 : f32
    %1016 = vector.broadcast %cst_367 : f32 to vector<8x128xf32>
    %1017 = arith.cmpf oge, %1007, %1016 : vector<8x128xf32>
    %1018 = arith.andi %1015, %1017 : vector<8x128xi1>
    %1019 = arith.cmpf olt, %1007, %912 : vector<8x128xf32>
    %1020 = arith.andi %1018, %1019 : vector<8x128xi1>
    %1021 = vector.broadcast %955 : f32 to vector<8x128xf32>
    %1022 = arith.mulf %1021, %0 : vector<8x128xf32>
    %1023 = vector.broadcast %958 : f32 to vector<8x128xf32>
    %1024 = arith.mulf %1023, %1 : vector<8x128xf32>
    %1025 = arith.addf %1022, %1024 : vector<8x128xf32>
    %1026 = vector.broadcast %961 : f32 to vector<8x128xf32>
    %1027 = arith.addf %1025, %1026 : vector<8x128xf32>
    %1028 = vector.broadcast %964 : f32 to vector<8x128xf32>
    %1029 = arith.mulf %1028, %0 : vector<8x128xf32>
    %1030 = vector.broadcast %967 : f32 to vector<8x128xf32>
    %1031 = arith.mulf %1030, %1 : vector<8x128xf32>
    %1032 = arith.addf %1029, %1031 : vector<8x128xf32>
    %1033 = vector.broadcast %970 : f32 to vector<8x128xf32>
    %1034 = arith.addf %1032, %1033 : vector<8x128xf32>
    %1035 = vector.broadcast %973 : f32 to vector<8x128xf32>
    %1036 = arith.mulf %1035, %0 : vector<8x128xf32>
    %1037 = vector.broadcast %976 : f32 to vector<8x128xf32>
    %1038 = arith.mulf %1037, %1 : vector<8x128xf32>
    %1039 = arith.addf %1036, %1038 : vector<8x128xf32>
    %1040 = vector.broadcast %979 : f32 to vector<8x128xf32>
    %1041 = arith.addf %1039, %1040 : vector<8x128xf32>
    %1042 = arith.select %1020, %1007, %912 : vector<8x128xi1>, vector<8x128xf32>
    %1043 = arith.select %1020, %1027, %913 : vector<8x128xi1>, vector<8x128xf32>
    %1044 = arith.select %1020, %1034, %914 : vector<8x128xi1>, vector<8x128xf32>
    %1045 = arith.select %1020, %1041, %915 : vector<8x128xi1>, vector<8x128xf32>
    %c8_i32_368 = arith.constant 8 : i32
    %cst_369 = arith.constant 1.000000e+30 : f32
    %1046 = vector.broadcast %cst_369 : f32 to vector<8x128xf32>
    %1047 = arith.cmpf olt, %1042, %1046 : vector<8x128xf32>
    %cst_370 = arith.constant 1.000000e+00 : f32
    %cst_371 = arith.constant 0.000000e+00 : f32
    %1048 = vector.broadcast %cst_370 : f32 to vector<8x128xf32>
    %1049 = vector.broadcast %cst_371 : f32 to vector<8x128xf32>
    %1050 = arith.select %1047, %1048, %1049 : vector<8x128xi1>, vector<8x128xf32>
    %c0_372 = arith.constant 0 : index
    %c0_373 = arith.constant 0 : index
    %c0_374 = arith.constant 0 : index
    %c0_375 = arith.constant 0 : index
    %1051 = vector.load %arg4[%c0_372, %c0_373, %c0_374, %c0_375] : memref<2x4x8x128xf32, #tpu.memory_space<vmem>>, vector<1x1x8x128xf32>
    %1052 = vector.shape_cast %1051 : vector<1x1x8x128xf32> to vector<8x128xf32>
    %1053 = vector.shape_cast %1043 : vector<8x128xf32> to vector<1x1x8x128xf32>
    tpu.vector_store %arg4[%c0_372, %c0_373, %c0_374, %c0_375], %1053 {strides = array<i32>} : memref<2x4x8x128xf32, #tpu.memory_space<vmem>>, vector<1x1x8x128xf32>,
    %c0_376 = arith.constant 0 : index
    %c1 = arith.constant 1 : index
    %c0_377 = arith.constant 0 : index
    %c0_378 = arith.constant 0 : index
    %1054 = vector.load %arg4[%c0_376, %c1, %c0_377, %c0_378] : memref<2x4x8x128xf32, #tpu.memory_space<vmem>>, vector<1x1x8x128xf32>
    %1055 = vector.shape_cast %1054 : vector<1x1x8x128xf32> to vector<8x128xf32>
    %1056 = vector.shape_cast %1044 : vector<8x128xf32> to vector<1x1x8x128xf32>
    tpu.vector_store %arg4[%c0_376, %c1, %c0_377, %c0_378], %1056 {strides = array<i32>} : memref<2x4x8x128xf32, #tpu.memory_space<vmem>>, vector<1x1x8x128xf32>,
    %c0_379 = arith.constant 0 : index
    %c2 = arith.constant 2 : index
    %c0_380 = arith.constant 0 : index
    %c0_381 = arith.constant 0 : index
    %1057 = vector.load %arg4[%c0_379, %c2, %c0_380, %c0_381] : memref<2x4x8x128xf32, #tpu.memory_space<vmem>>, vector<1x1x8x128xf32>
    %1058 = vector.shape_cast %1057 : vector<1x1x8x128xf32> to vector<8x128xf32>
    %1059 = vector.shape_cast %1045 : vector<8x128xf32> to vector<1x1x8x128xf32>
    tpu.vector_store %arg4[%c0_379, %c2, %c0_380, %c0_381], %1059 {strides = array<i32>} : memref<2x4x8x128xf32, #tpu.memory_space<vmem>>, vector<1x1x8x128xf32>,
    %c0_382 = arith.constant 0 : index
    %c3 = arith.constant 3 : index
    %c0_383 = arith.constant 0 : index
    %c0_384 = arith.constant 0 : index
    %1060 = vector.load %arg4[%c0_382, %c3, %c0_383, %c0_384] : memref<2x4x8x128xf32, #tpu.memory_space<vmem>>, vector<1x1x8x128xf32>
    %1061 = vector.shape_cast %1060 : vector<1x1x8x128xf32> to vector<8x128xf32>
    %1062 = vector.shape_cast %1050 : vector<8x128xf32> to vector<1x1x8x128xf32>
    tpu.vector_store %arg4[%c0_382, %c3, %c0_383, %c0_384], %1062 {strides = array<i32>} : memref<2x4x8x128xf32, #tpu.memory_space<vmem>>, vector<1x1x8x128xf32>,
    %cst_385 = arith.constant 1.000000e+30 : f32
    %1063 = vector.broadcast %cst_385 : f32 to vector<8x128xf32>
    %cst_386 = arith.constant 1.000000e+00 : f32
    %1064 = vector.broadcast %cst_386 : f32 to vector<8x128xf32>
    %cst_387 = arith.constant 1.000000e+00 : f32
    %1065 = vector.broadcast %cst_387 : f32 to vector<8x128xf32>
    %cst_388 = arith.constant 1.000000e+00 : f32
    %1066 = vector.broadcast %cst_388 : f32 to vector<8x128xf32>
    %c0_i32_389 = arith.constant 0 : i32
    %c21_i32_390 = arith.constant 21 : i32
    %1067 = arith.muli %c21_i32_390, %c0_i32_389 : i32
    %c0_i32_391 = arith.constant 0 : i32
    %1068 = arith.addi %1067, %c0_i32_391 : i32
    %c1_392 = arith.constant 1 : index
    %1069 = arith.index_cast %1068 : i32 to index
    %1070 = memref.load %arg3[%c1_392, %1069] : memref<2x168xf32, #tpu.memory_space<smem>>
    %c1_i32_393 = arith.constant 1 : i32
    %1071 = arith.addi %1067, %c1_i32_393 : i32
    %c1_394 = arith.constant 1 : index
    %1072 = arith.index_cast %1071 : i32 to index
    %1073 = memref.load %arg3[%c1_394, %1072] : memref<2x168xf32, #tpu.memory_space<smem>>
    %c2_i32_395 = arith.constant 2 : i32
    %1074 = arith.addi %1067, %c2_i32_395 : i32
    %c1_396 = arith.constant 1 : index
    %1075 = arith.index_cast %1074 : i32 to index
    %1076 = memref.load %arg3[%c1_396, %1075] : memref<2x168xf32, #tpu.memory_space<smem>>
    %c3_i32_397 = arith.constant 3 : i32
    %1077 = arith.addi %1067, %c3_i32_397 : i32
    %c1_398 = arith.constant 1 : index
    %1078 = arith.index_cast %1077 : i32 to index
    %1079 = memref.load %arg3[%c1_398, %1078] : memref<2x168xf32, #tpu.memory_space<smem>>
    %c4_i32_399 = arith.constant 4 : i32
    %1080 = arith.addi %1067, %c4_i32_399 : i32
    %c1_400 = arith.constant 1 : index
    %1081 = arith.index_cast %1080 : i32 to index
    %1082 = memref.load %arg3[%c1_400, %1081] : memref<2x168xf32, #tpu.memory_space<smem>>
    %c5_i32_401 = arith.constant 5 : i32
    %1083 = arith.addi %1067, %c5_i32_401 : i32
    %c1_402 = arith.constant 1 : index
    %1084 = arith.index_cast %1083 : i32 to index
    %1085 = memref.load %arg3[%c1_402, %1084] : memref<2x168xf32, #tpu.memory_space<smem>>
    %c6_i32_403 = arith.constant 6 : i32
    %1086 = arith.addi %1067, %c6_i32_403 : i32
    %c1_404 = arith.constant 1 : index
    %1087 = arith.index_cast %1086 : i32 to index
    %1088 = memref.load %arg3[%c1_404, %1087] : memref<2x168xf32, #tpu.memory_space<smem>>
    %c7_i32_405 = arith.constant 7 : i32
    %1089 = arith.addi %1067, %c7_i32_405 : i32
    %c1_406 = arith.constant 1 : index
    %1090 = arith.index_cast %1089 : i32 to index
    %1091 = memref.load %arg3[%c1_406, %1090] : memref<2x168xf32, #tpu.memory_space<smem>>
    %c8_i32_407 = arith.constant 8 : i32
    %1092 = arith.addi %1067, %c8_i32_407 : i32
    %c1_408 = arith.constant 1 : index
    %1093 = arith.index_cast %1092 : i32 to index
    %1094 = memref.load %arg3[%c1_408, %1093] : memref<2x168xf32, #tpu.memory_space<smem>>
    %c9_i32_409 = arith.constant 9 : i32
    %1095 = arith.addi %1067, %c9_i32_409 : i32
    %c1_410 = arith.constant 1 : index
    %1096 = arith.index_cast %1095 : i32 to index
    %1097 = memref.load %arg3[%c1_410, %1096] : memref<2x168xf32, #tpu.memory_space<smem>>
    %c10_i32_411 = arith.constant 10 : i32
    %1098 = arith.addi %1067, %c10_i32_411 : i32
    %c1_412 = arith.constant 1 : index
    %1099 = arith.index_cast %1098 : i32 to index
    %1100 = memref.load %arg3[%c1_412, %1099] : memref<2x168xf32, #tpu.memory_space<smem>>
    %c11_i32_413 = arith.constant 11 : i32
    %1101 = arith.addi %1067, %c11_i32_413 : i32
    %c1_414 = arith.constant 1 : index
    %1102 = arith.index_cast %1101 : i32 to index
    %1103 = memref.load %arg3[%c1_414, %1102] : memref<2x168xf32, #tpu.memory_space<smem>>
    %c12_i32_415 = arith.constant 12 : i32
    %1104 = arith.addi %1067, %c12_i32_415 : i32
    %c1_416 = arith.constant 1 : index
    %1105 = arith.index_cast %1104 : i32 to index
    %1106 = memref.load %arg3[%c1_416, %1105] : memref<2x168xf32, #tpu.memory_space<smem>>
    %c13_i32_417 = arith.constant 13 : i32
    %1107 = arith.addi %1067, %c13_i32_417 : i32
    %c1_418 = arith.constant 1 : index
    %1108 = arith.index_cast %1107 : i32 to index
    %1109 = memref.load %arg3[%c1_418, %1108] : memref<2x168xf32, #tpu.memory_space<smem>>
    %c14_i32_419 = arith.constant 14 : i32
    %1110 = arith.addi %1067, %c14_i32_419 : i32
    %c1_420 = arith.constant 1 : index
    %1111 = arith.index_cast %1110 : i32 to index
    %1112 = memref.load %arg3[%c1_420, %1111] : memref<2x168xf32, #tpu.memory_space<smem>>
    %c15_i32_421 = arith.constant 15 : i32
    %1113 = arith.addi %1067, %c15_i32_421 : i32
    %c1_422 = arith.constant 1 : index
    %1114 = arith.index_cast %1113 : i32 to index
    %1115 = memref.load %arg3[%c1_422, %1114] : memref<2x168xf32, #tpu.memory_space<smem>>
    %c16_i32_423 = arith.constant 16 : i32
    %1116 = arith.addi %1067, %c16_i32_423 : i32
    %c1_424 = arith.constant 1 : index
    %1117 = arith.index_cast %1116 : i32 to index
    %1118 = memref.load %arg3[%c1_424, %1117] : memref<2x168xf32, #tpu.memory_space<smem>>
    %c17_i32_425 = arith.constant 17 : i32
    %1119 = arith.addi %1067, %c17_i32_425 : i32
    %c1_426 = arith.constant 1 : index
    %1120 = arith.index_cast %1119 : i32 to index
    %1121 = memref.load %arg3[%c1_426, %1120] : memref<2x168xf32, #tpu.memory_space<smem>>
    %c18_i32_427 = arith.constant 18 : i32
    %1122 = arith.addi %1067, %c18_i32_427 : i32
    %c1_428 = arith.constant 1 : index
    %1123 = arith.index_cast %1122 : i32 to index
    %1124 = memref.load %arg3[%c1_428, %1123] : memref<2x168xf32, #tpu.memory_space<smem>>
    %c19_i32_429 = arith.constant 19 : i32
    %1125 = arith.addi %1067, %c19_i32_429 : i32
    %c1_430 = arith.constant 1 : index
    %1126 = arith.index_cast %1125 : i32 to index
    %1127 = memref.load %arg3[%c1_430, %1126] : memref<2x168xf32, #tpu.memory_space<smem>>
    %c20_i32_431 = arith.constant 20 : i32
    %1128 = arith.addi %1067, %c20_i32_431 : i32
    %c1_432 = arith.constant 1 : index
    %1129 = arith.index_cast %1128 : i32 to index
    %1130 = memref.load %arg3[%c1_432, %1129] : memref<2x168xf32, #tpu.memory_space<smem>>
    %1131 = vector.broadcast %1070 : f32 to vector<8x128xf32>
    %1132 = arith.mulf %1131, %0 : vector<8x128xf32>
    %1133 = vector.broadcast %1073 : f32 to vector<8x128xf32>
    %1134 = arith.mulf %1133, %1 : vector<8x128xf32>
    %1135 = arith.addf %1132, %1134 : vector<8x128xf32>
    %1136 = vector.broadcast %1076 : f32 to vector<8x128xf32>
    %1137 = arith.addf %1135, %1136 : vector<8x128xf32>
    %1138 = vector.broadcast %1079 : f32 to vector<8x128xf32>
    %1139 = arith.mulf %1138, %0 : vector<8x128xf32>
    %1140 = vector.broadcast %1082 : f32 to vector<8x128xf32>
    %1141 = arith.mulf %1140, %1 : vector<8x128xf32>
    %1142 = arith.addf %1139, %1141 : vector<8x128xf32>
    %1143 = vector.broadcast %1085 : f32 to vector<8x128xf32>
    %1144 = arith.addf %1142, %1143 : vector<8x128xf32>
    %1145 = vector.broadcast %1088 : f32 to vector<8x128xf32>
    %1146 = arith.mulf %1145, %0 : vector<8x128xf32>
    %1147 = vector.broadcast %1091 : f32 to vector<8x128xf32>
    %1148 = arith.mulf %1147, %1 : vector<8x128xf32>
    %1149 = arith.addf %1146, %1148 : vector<8x128xf32>
    %1150 = vector.broadcast %1094 : f32 to vector<8x128xf32>
    %1151 = arith.addf %1149, %1150 : vector<8x128xf32>
    %1152 = vector.broadcast %1097 : f32 to vector<8x128xf32>
    %1153 = arith.mulf %1152, %0 : vector<8x128xf32>
    %1154 = vector.broadcast %1100 : f32 to vector<8x128xf32>
    %1155 = arith.mulf %1154, %1 : vector<8x128xf32>
    %1156 = arith.addf %1153, %1155 : vector<8x128xf32>
    %1157 = vector.broadcast %1103 : f32 to vector<8x128xf32>
    %1158 = arith.addf %1156, %1157 : vector<8x128xf32>
    %cst_433 = arith.constant 0.000000e+00 : f32
    %1159 = vector.broadcast %cst_433 : f32 to vector<8x128xf32>
    %1160 = arith.cmpf ogt, %1137, %1159 : vector<8x128xf32>
    %cst_434 = arith.constant 0.000000e+00 : f32
    %1161 = vector.broadcast %cst_434 : f32 to vector<8x128xf32>
    %1162 = arith.cmpf ogt, %1144, %1161 : vector<8x128xf32>
    %1163 = arith.andi %1160, %1162 : vector<8x128xi1>
    %cst_435 = arith.constant 0.000000e+00 : f32
    %1164 = vector.broadcast %cst_435 : f32 to vector<8x128xf32>
    %1165 = arith.cmpf ogt, %1151, %1164 : vector<8x128xf32>
    %1166 = arith.andi %1163, %1165 : vector<8x128xi1>
    %cst_436 = arith.constant 0.000000e+00 : f32
    %1167 = vector.broadcast %cst_436 : f32 to vector<8x128xf32>
    %1168 = arith.cmpf oge, %1158, %1167 : vector<8x128xf32>
    %1169 = arith.andi %1166, %1168 : vector<8x128xi1>
    %1170 = arith.cmpf olt, %1158, %1063 : vector<8x128xf32>
    %1171 = arith.andi %1169, %1170 : vector<8x128xi1>
    %1172 = vector.broadcast %1106 : f32 to vector<8x128xf32>
    %1173 = arith.mulf %1172, %0 : vector<8x128xf32>
    %1174 = vector.broadcast %1109 : f32 to vector<8x128xf32>
    %1175 = arith.mulf %1174, %1 : vector<8x128xf32>
    %1176 = arith.addf %1173, %1175 : vector<8x128xf32>
    %1177 = vector.broadcast %1112 : f32 to vector<8x128xf32>
    %1178 = arith.addf %1176, %1177 : vector<8x128xf32>
    %1179 = vector.broadcast %1115 : f32 to vector<8x128xf32>
    %1180 = arith.mulf %1179, %0 : vector<8x128xf32>
    %1181 = vector.broadcast %1118 : f32 to vector<8x128xf32>
    %1182 = arith.mulf %1181, %1 : vector<8x128xf32>
    %1183 = arith.addf %1180, %1182 : vector<8x128xf32>
    %1184 = vector.broadcast %1121 : f32 to vector<8x128xf32>
    %1185 = arith.addf %1183, %1184 : vector<8x128xf32>
    %1186 = vector.broadcast %1124 : f32 to vector<8x128xf32>
    %1187 = arith.mulf %1186, %0 : vector<8x128xf32>
    %1188 = vector.broadcast %1127 : f32 to vector<8x128xf32>
    %1189 = arith.mulf %1188, %1 : vector<8x128xf32>
    %1190 = arith.addf %1187, %1189 : vector<8x128xf32>
    %1191 = vector.broadcast %1130 : f32 to vector<8x128xf32>
    %1192 = arith.addf %1190, %1191 : vector<8x128xf32>
    %1193 = arith.select %1171, %1158, %1063 : vector<8x128xi1>, vector<8x128xf32>
    %1194 = arith.select %1171, %1178, %1064 : vector<8x128xi1>, vector<8x128xf32>
    %1195 = arith.select %1171, %1185, %1065 : vector<8x128xi1>, vector<8x128xf32>
    %1196 = arith.select %1171, %1192, %1066 : vector<8x128xi1>, vector<8x128xf32>
    %c1_i32_437 = arith.constant 1 : i32
    %c21_i32_438 = arith.constant 21 : i32
    %1197 = arith.muli %c21_i32_438, %c1_i32_437 : i32
    %c0_i32_439 = arith.constant 0 : i32
    %1198 = arith.addi %1197, %c0_i32_439 : i32
    %c1_440 = arith.constant 1 : index
    %1199 = arith.index_cast %1198 : i32 to index
    %1200 = memref.load %arg3[%c1_440, %1199] : memref<2x168xf32, #tpu.memory_space<smem>>
    %c1_i32_441 = arith.constant 1 : i32
    %1201 = arith.addi %1197, %c1_i32_441 : i32
    %c1_442 = arith.constant 1 : index
    %1202 = arith.index_cast %1201 : i32 to index
    %1203 = memref.load %arg3[%c1_442, %1202] : memref<2x168xf32, #tpu.memory_space<smem>>
    %c2_i32_443 = arith.constant 2 : i32
    %1204 = arith.addi %1197, %c2_i32_443 : i32
    %c1_444 = arith.constant 1 : index
    %1205 = arith.index_cast %1204 : i32 to index
    %1206 = memref.load %arg3[%c1_444, %1205] : memref<2x168xf32, #tpu.memory_space<smem>>
    %c3_i32_445 = arith.constant 3 : i32
    %1207 = arith.addi %1197, %c3_i32_445 : i32
    %c1_446 = arith.constant 1 : index
    %1208 = arith.index_cast %1207 : i32 to index
    %1209 = memref.load %arg3[%c1_446, %1208] : memref<2x168xf32, #tpu.memory_space<smem>>
    %c4_i32_447 = arith.constant 4 : i32
    %1210 = arith.addi %1197, %c4_i32_447 : i32
    %c1_448 = arith.constant 1 : index
    %1211 = arith.index_cast %1210 : i32 to index
    %1212 = memref.load %arg3[%c1_448, %1211] : memref<2x168xf32, #tpu.memory_space<smem>>
    %c5_i32_449 = arith.constant 5 : i32
    %1213 = arith.addi %1197, %c5_i32_449 : i32
    %c1_450 = arith.constant 1 : index
    %1214 = arith.index_cast %1213 : i32 to index
    %1215 = memref.load %arg3[%c1_450, %1214] : memref<2x168xf32, #tpu.memory_space<smem>>
    %c6_i32_451 = arith.constant 6 : i32
    %1216 = arith.addi %1197, %c6_i32_451 : i32
    %c1_452 = arith.constant 1 : index
    %1217 = arith.index_cast %1216 : i32 to index
    %1218 = memref.load %arg3[%c1_452, %1217] : memref<2x168xf32, #tpu.memory_space<smem>>
    %c7_i32_453 = arith.constant 7 : i32
    %1219 = arith.addi %1197, %c7_i32_453 : i32
    %c1_454 = arith.constant 1 : index
    %1220 = arith.index_cast %1219 : i32 to index
    %1221 = memref.load %arg3[%c1_454, %1220] : memref<2x168xf32, #tpu.memory_space<smem>>
    %c8_i32_455 = arith.constant 8 : i32
    %1222 = arith.addi %1197, %c8_i32_455 : i32
    %c1_456 = arith.constant 1 : index
    %1223 = arith.index_cast %1222 : i32 to index
    %1224 = memref.load %arg3[%c1_456, %1223] : memref<2x168xf32, #tpu.memory_space<smem>>
    %c9_i32_457 = arith.constant 9 : i32
    %1225 = arith.addi %1197, %c9_i32_457 : i32
    %c1_458 = arith.constant 1 : index
    %1226 = arith.index_cast %1225 : i32 to index
    %1227 = memref.load %arg3[%c1_458, %1226] : memref<2x168xf32, #tpu.memory_space<smem>>
    %c10_i32_459 = arith.constant 10 : i32
    %1228 = arith.addi %1197, %c10_i32_459 : i32
    %c1_460 = arith.constant 1 : index
    %1229 = arith.index_cast %1228 : i32 to index
    %1230 = memref.load %arg3[%c1_460, %1229] : memref<2x168xf32, #tpu.memory_space<smem>>
    %c11_i32_461 = arith.constant 11 : i32
    %1231 = arith.addi %1197, %c11_i32_461 : i32
    %c1_462 = arith.constant 1 : index
    %1232 = arith.index_cast %1231 : i32 to index
    %1233 = memref.load %arg3[%c1_462, %1232] : memref<2x168xf32, #tpu.memory_space<smem>>
    %c12_i32_463 = arith.constant 12 : i32
    %1234 = arith.addi %1197, %c12_i32_463 : i32
    %c1_464 = arith.constant 1 : index
    %1235 = arith.index_cast %1234 : i32 to index
    %1236 = memref.load %arg3[%c1_464, %1235] : memref<2x168xf32, #tpu.memory_space<smem>>
    %c13_i32_465 = arith.constant 13 : i32
    %1237 = arith.addi %1197, %c13_i32_465 : i32
    %c1_466 = arith.constant 1 : index
    %1238 = arith.index_cast %1237 : i32 to index
    %1239 = memref.load %arg3[%c1_466, %1238] : memref<2x168xf32, #tpu.memory_space<smem>>
    %c14_i32_467 = arith.constant 14 : i32
    %1240 = arith.addi %1197, %c14_i32_467 : i32
    %c1_468 = arith.constant 1 : index
    %1241 = arith.index_cast %1240 : i32 to index
    %1242 = memref.load %arg3[%c1_468, %1241] : memref<2x168xf32, #tpu.memory_space<smem>>
    %c15_i32_469 = arith.constant 15 : i32
    %1243 = arith.addi %1197, %c15_i32_469 : i32
    %c1_470 = arith.constant 1 : index
    %1244 = arith.index_cast %1243 : i32 to index
    %1245 = memref.load %arg3[%c1_470, %1244] : memref<2x168xf32, #tpu.memory_space<smem>>
    %c16_i32_471 = arith.constant 16 : i32
    %1246 = arith.addi %1197, %c16_i32_471 : i32
    %c1_472 = arith.constant 1 : index
    %1247 = arith.index_cast %1246 : i32 to index
    %1248 = memref.load %arg3[%c1_472, %1247] : memref<2x168xf32, #tpu.memory_space<smem>>
    %c17_i32_473 = arith.constant 17 : i32
    %1249 = arith.addi %1197, %c17_i32_473 : i32
    %c1_474 = arith.constant 1 : index
    %1250 = arith.index_cast %1249 : i32 to index
    %1251 = memref.load %arg3[%c1_474, %1250] : memref<2x168xf32, #tpu.memory_space<smem>>
    %c18_i32_475 = arith.constant 18 : i32
    %1252 = arith.addi %1197, %c18_i32_475 : i32
    %c1_476 = arith.constant 1 : index
    %1253 = arith.index_cast %1252 : i32 to index
    %1254 = memref.load %arg3[%c1_476, %1253] : memref<2x168xf32, #tpu.memory_space<smem>>
    %c19_i32_477 = arith.constant 19 : i32
    %1255 = arith.addi %1197, %c19_i32_477 : i32
    %c1_478 = arith.constant 1 : index
    %1256 = arith.index_cast %1255 : i32 to index
    %1257 = memref.load %arg3[%c1_478, %1256] : memref<2x168xf32, #tpu.memory_space<smem>>
    %c20_i32_479 = arith.constant 20 : i32
    %1258 = arith.addi %1197, %c20_i32_479 : i32
    %c1_480 = arith.constant 1 : index
    %1259 = arith.index_cast %1258 : i32 to index
    %1260 = memref.load %arg3[%c1_480, %1259] : memref<2x168xf32, #tpu.memory_space<smem>>
    %1261 = vector.broadcast %1200 : f32 to vector<8x128xf32>
    %1262 = arith.mulf %1261, %0 : vector<8x128xf32>
    %1263 = vector.broadcast %1203 : f32 to vector<8x128xf32>
    %1264 = arith.mulf %1263, %1 : vector<8x128xf32>
    %1265 = arith.addf %1262, %1264 : vector<8x128xf32>
    %1266 = vector.broadcast %1206 : f32 to vector<8x128xf32>
    %1267 = arith.addf %1265, %1266 : vector<8x128xf32>
    %1268 = vector.broadcast %1209 : f32 to vector<8x128xf32>
    %1269 = arith.mulf %1268, %0 : vector<8x128xf32>
    %1270 = vector.broadcast %1212 : f32 to vector<8x128xf32>
    %1271 = arith.mulf %1270, %1 : vector<8x128xf32>
    %1272 = arith.addf %1269, %1271 : vector<8x128xf32>
    %1273 = vector.broadcast %1215 : f32 to vector<8x128xf32>
    %1274 = arith.addf %1272, %1273 : vector<8x128xf32>
    %1275 = vector.broadcast %1218 : f32 to vector<8x128xf32>
    %1276 = arith.mulf %1275, %0 : vector<8x128xf32>
    %1277 = vector.broadcast %1221 : f32 to vector<8x128xf32>
    %1278 = arith.mulf %1277, %1 : vector<8x128xf32>
    %1279 = arith.addf %1276, %1278 : vector<8x128xf32>
    %1280 = vector.broadcast %1224 : f32 to vector<8x128xf32>
    %1281 = arith.addf %1279, %1280 : vector<8x128xf32>
    %1282 = vector.broadcast %1227 : f32 to vector<8x128xf32>
    %1283 = arith.mulf %1282, %0 : vector<8x128xf32>
    %1284 = vector.broadcast %1230 : f32 to vector<8x128xf32>
    %1285 = arith.mulf %1284, %1 : vector<8x128xf32>
    %1286 = arith.addf %1283, %1285 : vector<8x128xf32>
    %1287 = vector.broadcast %1233 : f32 to vector<8x128xf32>
    %1288 = arith.addf %1286, %1287 : vector<8x128xf32>
    %cst_481 = arith.constant 0.000000e+00 : f32
    %1289 = vector.broadcast %cst_481 : f32 to vector<8x128xf32>
    %1290 = arith.cmpf ogt, %1267, %1289 : vector<8x128xf32>
    %cst_482 = arith.constant 0.000000e+00 : f32
    %1291 = vector.broadcast %cst_482 : f32 to vector<8x128xf32>
    %1292 = arith.cmpf ogt, %1274, %1291 : vector<8x128xf32>
    %1293 = arith.andi %1290, %1292 : vector<8x128xi1>
    %cst_483 = arith.constant 0.000000e+00 : f32
    %1294 = vector.broadcast %cst_483 : f32 to vector<8x128xf32>
    %1295 = arith.cmpf ogt, %1281, %1294 : vector<8x128xf32>
    %1296 = arith.andi %1293, %1295 : vector<8x128xi1>
    %cst_484 = arith.constant 0.000000e+00 : f32
    %1297 = vector.broadcast %cst_484 : f32 to vector<8x128xf32>
    %1298 = arith.cmpf oge, %1288, %1297 : vector<8x128xf32>
    %1299 = arith.andi %1296, %1298 : vector<8x128xi1>
    %1300 = arith.cmpf olt, %1288, %1193 : vector<8x128xf32>
    %1301 = arith.andi %1299, %1300 : vector<8x128xi1>
    %1302 = vector.broadcast %1236 : f32 to vector<8x128xf32>
    %1303 = arith.mulf %1302, %0 : vector<8x128xf32>
    %1304 = vector.broadcast %1239 : f32 to vector<8x128xf32>
    %1305 = arith.mulf %1304, %1 : vector<8x128xf32>
    %1306 = arith.addf %1303, %1305 : vector<8x128xf32>
    %1307 = vector.broadcast %1242 : f32 to vector<8x128xf32>
    %1308 = arith.addf %1306, %1307 : vector<8x128xf32>
    %1309 = vector.broadcast %1245 : f32 to vector<8x128xf32>
    %1310 = arith.mulf %1309, %0 : vector<8x128xf32>
    %1311 = vector.broadcast %1248 : f32 to vector<8x128xf32>
    %1312 = arith.mulf %1311, %1 : vector<8x128xf32>
    %1313 = arith.addf %1310, %1312 : vector<8x128xf32>
    %1314 = vector.broadcast %1251 : f32 to vector<8x128xf32>
    %1315 = arith.addf %1313, %1314 : vector<8x128xf32>
    %1316 = vector.broadcast %1254 : f32 to vector<8x128xf32>
    %1317 = arith.mulf %1316, %0 : vector<8x128xf32>
    %1318 = vector.broadcast %1257 : f32 to vector<8x128xf32>
    %1319 = arith.mulf %1318, %1 : vector<8x128xf32>
    %1320 = arith.addf %1317, %1319 : vector<8x128xf32>
    %1321 = vector.broadcast %1260 : f32 to vector<8x128xf32>
    %1322 = arith.addf %1320, %1321 : vector<8x128xf32>
    %1323 = arith.select %1301, %1288, %1193 : vector<8x128xi1>, vector<8x128xf32>
    %1324 = arith.select %1301, %1308, %1194 : vector<8x128xi1>, vector<8x128xf32>
    %1325 = arith.select %1301, %1315, %1195 : vector<8x128xi1>, vector<8x128xf32>
    %1326 = arith.select %1301, %1322, %1196 : vector<8x128xi1>, vector<8x128xf32>
    %c2_i32_485 = arith.constant 2 : i32
    %c21_i32_486 = arith.constant 21 : i32
    %1327 = arith.muli %c21_i32_486, %c2_i32_485 : i32
    %c0_i32_487 = arith.constant 0 : i32
    %1328 = arith.addi %1327, %c0_i32_487 : i32
    %c1_488 = arith.constant 1 : index
    %1329 = arith.index_cast %1328 : i32 to index
    %1330 = memref.load %arg3[%c1_488, %1329] : memref<2x168xf32, #tpu.memory_space<smem>>
    %c1_i32_489 = arith.constant 1 : i32
    %1331 = arith.addi %1327, %c1_i32_489 : i32
    %c1_490 = arith.constant 1 : index
    %1332 = arith.index_cast %1331 : i32 to index
    %1333 = memref.load %arg3[%c1_490, %1332] : memref<2x168xf32, #tpu.memory_space<smem>>
    %c2_i32_491 = arith.constant 2 : i32
    %1334 = arith.addi %1327, %c2_i32_491 : i32
    %c1_492 = arith.constant 1 : index
    %1335 = arith.index_cast %1334 : i32 to index
    %1336 = memref.load %arg3[%c1_492, %1335] : memref<2x168xf32, #tpu.memory_space<smem>>
    %c3_i32_493 = arith.constant 3 : i32
    %1337 = arith.addi %1327, %c3_i32_493 : i32
    %c1_494 = arith.constant 1 : index
    %1338 = arith.index_cast %1337 : i32 to index
    %1339 = memref.load %arg3[%c1_494, %1338] : memref<2x168xf32, #tpu.memory_space<smem>>
    %c4_i32_495 = arith.constant 4 : i32
    %1340 = arith.addi %1327, %c4_i32_495 : i32
    %c1_496 = arith.constant 1 : index
    %1341 = arith.index_cast %1340 : i32 to index
    %1342 = memref.load %arg3[%c1_496, %1341] : memref<2x168xf32, #tpu.memory_space<smem>>
    %c5_i32_497 = arith.constant 5 : i32
    %1343 = arith.addi %1327, %c5_i32_497 : i32
    %c1_498 = arith.constant 1 : index
    %1344 = arith.index_cast %1343 : i32 to index
    %1345 = memref.load %arg3[%c1_498, %1344] : memref<2x168xf32, #tpu.memory_space<smem>>
    %c6_i32_499 = arith.constant 6 : i32
    %1346 = arith.addi %1327, %c6_i32_499 : i32
    %c1_500 = arith.constant 1 : index
    %1347 = arith.index_cast %1346 : i32 to index
    %1348 = memref.load %arg3[%c1_500, %1347] : memref<2x168xf32, #tpu.memory_space<smem>>
    %c7_i32_501 = arith.constant 7 : i32
    %1349 = arith.addi %1327, %c7_i32_501 : i32
    %c1_502 = arith.constant 1 : index
    %1350 = arith.index_cast %1349 : i32 to index
    %1351 = memref.load %arg3[%c1_502, %1350] : memref<2x168xf32, #tpu.memory_space<smem>>
    %c8_i32_503 = arith.constant 8 : i32
    %1352 = arith.addi %1327, %c8_i32_503 : i32
    %c1_504 = arith.constant 1 : index
    %1353 = arith.index_cast %1352 : i32 to index
    %1354 = memref.load %arg3[%c1_504, %1353] : memref<2x168xf32, #tpu.memory_space<smem>>
    %c9_i32_505 = arith.constant 9 : i32
    %1355 = arith.addi %1327, %c9_i32_505 : i32
    %c1_506 = arith.constant 1 : index
    %1356 = arith.index_cast %1355 : i32 to index
    %1357 = memref.load %arg3[%c1_506, %1356] : memref<2x168xf32, #tpu.memory_space<smem>>
    %c10_i32_507 = arith.constant 10 : i32
    %1358 = arith.addi %1327, %c10_i32_507 : i32
    %c1_508 = arith.constant 1 : index
    %1359 = arith.index_cast %1358 : i32 to index
    %1360 = memref.load %arg3[%c1_508, %1359] : memref<2x168xf32, #tpu.memory_space<smem>>
    %c11_i32_509 = arith.constant 11 : i32
    %1361 = arith.addi %1327, %c11_i32_509 : i32
    %c1_510 = arith.constant 1 : index
    %1362 = arith.index_cast %1361 : i32 to index
    %1363 = memref.load %arg3[%c1_510, %1362] : memref<2x168xf32, #tpu.memory_space<smem>>
    %c12_i32_511 = arith.constant 12 : i32
    %1364 = arith.addi %1327, %c12_i32_511 : i32
    %c1_512 = arith.constant 1 : index
    %1365 = arith.index_cast %1364 : i32 to index
    %1366 = memref.load %arg3[%c1_512, %1365] : memref<2x168xf32, #tpu.memory_space<smem>>
    %c13_i32_513 = arith.constant 13 : i32
    %1367 = arith.addi %1327, %c13_i32_513 : i32
    %c1_514 = arith.constant 1 : index
    %1368 = arith.index_cast %1367 : i32 to index
    %1369 = memref.load %arg3[%c1_514, %1368] : memref<2x168xf32, #tpu.memory_space<smem>>
    %c14_i32_515 = arith.constant 14 : i32
    %1370 = arith.addi %1327, %c14_i32_515 : i32
    %c1_516 = arith.constant 1 : index
    %1371 = arith.index_cast %1370 : i32 to index
    %1372 = memref.load %arg3[%c1_516, %1371] : memref<2x168xf32, #tpu.memory_space<smem>>
    %c15_i32_517 = arith.constant 15 : i32
    %1373 = arith.addi %1327, %c15_i32_517 : i32
    %c1_518 = arith.constant 1 : index
    %1374 = arith.index_cast %1373 : i32 to index
    %1375 = memref.load %arg3[%c1_518, %1374] : memref<2x168xf32, #tpu.memory_space<smem>>
    %c16_i32_519 = arith.constant 16 : i32
    %1376 = arith.addi %1327, %c16_i32_519 : i32
    %c1_520 = arith.constant 1 : index
    %1377 = arith.index_cast %1376 : i32 to index
    %1378 = memref.load %arg3[%c1_520, %1377] : memref<2x168xf32, #tpu.memory_space<smem>>
    %c17_i32_521 = arith.constant 17 : i32
    %1379 = arith.addi %1327, %c17_i32_521 : i32
    %c1_522 = arith.constant 1 : index
    %1380 = arith.index_cast %1379 : i32 to index
    %1381 = memref.load %arg3[%c1_522, %1380] : memref<2x168xf32, #tpu.memory_space<smem>>
    %c18_i32_523 = arith.constant 18 : i32
    %1382 = arith.addi %1327, %c18_i32_523 : i32
    %c1_524 = arith.constant 1 : index
    %1383 = arith.index_cast %1382 : i32 to index
    %1384 = memref.load %arg3[%c1_524, %1383] : memref<2x168xf32, #tpu.memory_space<smem>>
    %c19_i32_525 = arith.constant 19 : i32
    %1385 = arith.addi %1327, %c19_i32_525 : i32
    %c1_526 = arith.constant 1 : index
    %1386 = arith.index_cast %1385 : i32 to index
    %1387 = memref.load %arg3[%c1_526, %1386] : memref<2x168xf32, #tpu.memory_space<smem>>
    %c20_i32_527 = arith.constant 20 : i32
    %1388 = arith.addi %1327, %c20_i32_527 : i32
    %c1_528 = arith.constant 1 : index
    %1389 = arith.index_cast %1388 : i32 to index
    %1390 = memref.load %arg3[%c1_528, %1389] : memref<2x168xf32, #tpu.memory_space<smem>>
    %1391 = vector.broadcast %1330 : f32 to vector<8x128xf32>
    %1392 = arith.mulf %1391, %0 : vector<8x128xf32>
    %1393 = vector.broadcast %1333 : f32 to vector<8x128xf32>
    %1394 = arith.mulf %1393, %1 : vector<8x128xf32>
    %1395 = arith.addf %1392, %1394 : vector<8x128xf32>
    %1396 = vector.broadcast %1336 : f32 to vector<8x128xf32>
    %1397 = arith.addf %1395, %1396 : vector<8x128xf32>
    %1398 = vector.broadcast %1339 : f32 to vector<8x128xf32>
    %1399 = arith.mulf %1398, %0 : vector<8x128xf32>
    %1400 = vector.broadcast %1342 : f32 to vector<8x128xf32>
    %1401 = arith.mulf %1400, %1 : vector<8x128xf32>
    %1402 = arith.addf %1399, %1401 : vector<8x128xf32>
    %1403 = vector.broadcast %1345 : f32 to vector<8x128xf32>
    %1404 = arith.addf %1402, %1403 : vector<8x128xf32>
    %1405 = vector.broadcast %1348 : f32 to vector<8x128xf32>
    %1406 = arith.mulf %1405, %0 : vector<8x128xf32>
    %1407 = vector.broadcast %1351 : f32 to vector<8x128xf32>
    %1408 = arith.mulf %1407, %1 : vector<8x128xf32>
    %1409 = arith.addf %1406, %1408 : vector<8x128xf32>
    %1410 = vector.broadcast %1354 : f32 to vector<8x128xf32>
    %1411 = arith.addf %1409, %1410 : vector<8x128xf32>
    %1412 = vector.broadcast %1357 : f32 to vector<8x128xf32>
    %1413 = arith.mulf %1412, %0 : vector<8x128xf32>
    %1414 = vector.broadcast %1360 : f32 to vector<8x128xf32>
    %1415 = arith.mulf %1414, %1 : vector<8x128xf32>
    %1416 = arith.addf %1413, %1415 : vector<8x128xf32>
    %1417 = vector.broadcast %1363 : f32 to vector<8x128xf32>
    %1418 = arith.addf %1416, %1417 : vector<8x128xf32>
    %cst_529 = arith.constant 0.000000e+00 : f32
    %1419 = vector.broadcast %cst_529 : f32 to vector<8x128xf32>
    %1420 = arith.cmpf ogt, %1397, %1419 : vector<8x128xf32>
    %cst_530 = arith.constant 0.000000e+00 : f32
    %1421 = vector.broadcast %cst_530 : f32 to vector<8x128xf32>
    %1422 = arith.cmpf ogt, %1404, %1421 : vector<8x128xf32>
    %1423 = arith.andi %1420, %1422 : vector<8x128xi1>
    %cst_531 = arith.constant 0.000000e+00 : f32
    %1424 = vector.broadcast %cst_531 : f32 to vector<8x128xf32>
    %1425 = arith.cmpf ogt, %1411, %1424 : vector<8x128xf32>
    %1426 = arith.andi %1423, %1425 : vector<8x128xi1>
    %cst_532 = arith.constant 0.000000e+00 : f32
    %1427 = vector.broadcast %cst_532 : f32 to vector<8x128xf32>
    %1428 = arith.cmpf oge, %1418, %1427 : vector<8x128xf32>
    %1429 = arith.andi %1426, %1428 : vector<8x128xi1>
    %1430 = arith.cmpf olt, %1418, %1323 : vector<8x128xf32>
    %1431 = arith.andi %1429, %1430 : vector<8x128xi1>
    %1432 = vector.broadcast %1366 : f32 to vector<8x128xf32>
    %1433 = arith.mulf %1432, %0 : vector<8x128xf32>
    %1434 = vector.broadcast %1369 : f32 to vector<8x128xf32>
    %1435 = arith.mulf %1434, %1 : vector<8x128xf32>
    %1436 = arith.addf %1433, %1435 : vector<8x128xf32>
    %1437 = vector.broadcast %1372 : f32 to vector<8x128xf32>
    %1438 = arith.addf %1436, %1437 : vector<8x128xf32>
    %1439 = vector.broadcast %1375 : f32 to vector<8x128xf32>
    %1440 = arith.mulf %1439, %0 : vector<8x128xf32>
    %1441 = vector.broadcast %1378 : f32 to vector<8x128xf32>
    %1442 = arith.mulf %1441, %1 : vector<8x128xf32>
    %1443 = arith.addf %1440, %1442 : vector<8x128xf32>
    %1444 = vector.broadcast %1381 : f32 to vector<8x128xf32>
    %1445 = arith.addf %1443, %1444 : vector<8x128xf32>
    %1446 = vector.broadcast %1384 : f32 to vector<8x128xf32>
    %1447 = arith.mulf %1446, %0 : vector<8x128xf32>
    %1448 = vector.broadcast %1387 : f32 to vector<8x128xf32>
    %1449 = arith.mulf %1448, %1 : vector<8x128xf32>
    %1450 = arith.addf %1447, %1449 : vector<8x128xf32>
    %1451 = vector.broadcast %1390 : f32 to vector<8x128xf32>
    %1452 = arith.addf %1450, %1451 : vector<8x128xf32>
    %1453 = arith.select %1431, %1418, %1323 : vector<8x128xi1>, vector<8x128xf32>
    %1454 = arith.select %1431, %1438, %1324 : vector<8x128xi1>, vector<8x128xf32>
    %1455 = arith.select %1431, %1445, %1325 : vector<8x128xi1>, vector<8x128xf32>
    %1456 = arith.select %1431, %1452, %1326 : vector<8x128xi1>, vector<8x128xf32>
    %c3_i32_533 = arith.constant 3 : i32
    %c21_i32_534 = arith.constant 21 : i32
    %1457 = arith.muli %c21_i32_534, %c3_i32_533 : i32
    %c0_i32_535 = arith.constant 0 : i32
    %1458 = arith.addi %1457, %c0_i32_535 : i32
    %c1_536 = arith.constant 1 : index
    %1459 = arith.index_cast %1458 : i32 to index
    %1460 = memref.load %arg3[%c1_536, %1459] : memref<2x168xf32, #tpu.memory_space<smem>>
    %c1_i32_537 = arith.constant 1 : i32
    %1461 = arith.addi %1457, %c1_i32_537 : i32
    %c1_538 = arith.constant 1 : index
    %1462 = arith.index_cast %1461 : i32 to index
    %1463 = memref.load %arg3[%c1_538, %1462] : memref<2x168xf32, #tpu.memory_space<smem>>
    %c2_i32_539 = arith.constant 2 : i32
    %1464 = arith.addi %1457, %c2_i32_539 : i32
    %c1_540 = arith.constant 1 : index
    %1465 = arith.index_cast %1464 : i32 to index
    %1466 = memref.load %arg3[%c1_540, %1465] : memref<2x168xf32, #tpu.memory_space<smem>>
    %c3_i32_541 = arith.constant 3 : i32
    %1467 = arith.addi %1457, %c3_i32_541 : i32
    %c1_542 = arith.constant 1 : index
    %1468 = arith.index_cast %1467 : i32 to index
    %1469 = memref.load %arg3[%c1_542, %1468] : memref<2x168xf32, #tpu.memory_space<smem>>
    %c4_i32_543 = arith.constant 4 : i32
    %1470 = arith.addi %1457, %c4_i32_543 : i32
    %c1_544 = arith.constant 1 : index
    %1471 = arith.index_cast %1470 : i32 to index
    %1472 = memref.load %arg3[%c1_544, %1471] : memref<2x168xf32, #tpu.memory_space<smem>>
    %c5_i32_545 = arith.constant 5 : i32
    %1473 = arith.addi %1457, %c5_i32_545 : i32
    %c1_546 = arith.constant 1 : index
    %1474 = arith.index_cast %1473 : i32 to index
    %1475 = memref.load %arg3[%c1_546, %1474] : memref<2x168xf32, #tpu.memory_space<smem>>
    %c6_i32_547 = arith.constant 6 : i32
    %1476 = arith.addi %1457, %c6_i32_547 : i32
    %c1_548 = arith.constant 1 : index
    %1477 = arith.index_cast %1476 : i32 to index
    %1478 = memref.load %arg3[%c1_548, %1477] : memref<2x168xf32, #tpu.memory_space<smem>>
    %c7_i32_549 = arith.constant 7 : i32
    %1479 = arith.addi %1457, %c7_i32_549 : i32
    %c1_550 = arith.constant 1 : index
    %1480 = arith.index_cast %1479 : i32 to index
    %1481 = memref.load %arg3[%c1_550, %1480] : memref<2x168xf32, #tpu.memory_space<smem>>
    %c8_i32_551 = arith.constant 8 : i32
    %1482 = arith.addi %1457, %c8_i32_551 : i32
    %c1_552 = arith.constant 1 : index
    %1483 = arith.index_cast %1482 : i32 to index
    %1484 = memref.load %arg3[%c1_552, %1483] : memref<2x168xf32, #tpu.memory_space<smem>>
    %c9_i32_553 = arith.constant 9 : i32
    %1485 = arith.addi %1457, %c9_i32_553 : i32
    %c1_554 = arith.constant 1 : index
    %1486 = arith.index_cast %1485 : i32 to index
    %1487 = memref.load %arg3[%c1_554, %1486] : memref<2x168xf32, #tpu.memory_space<smem>>
    %c10_i32_555 = arith.constant 10 : i32
    %1488 = arith.addi %1457, %c10_i32_555 : i32
    %c1_556 = arith.constant 1 : index
    %1489 = arith.index_cast %1488 : i32 to index
    %1490 = memref.load %arg3[%c1_556, %1489] : memref<2x168xf32, #tpu.memory_space<smem>>
    %c11_i32_557 = arith.constant 11 : i32
    %1491 = arith.addi %1457, %c11_i32_557 : i32
    %c1_558 = arith.constant 1 : index
    %1492 = arith.index_cast %1491 : i32 to index
    %1493 = memref.load %arg3[%c1_558, %1492] : memref<2x168xf32, #tpu.memory_space<smem>>
    %c12_i32_559 = arith.constant 12 : i32
    %1494 = arith.addi %1457, %c12_i32_559 : i32
    %c1_560 = arith.constant 1 : index
    %1495 = arith.index_cast %1494 : i32 to index
    %1496 = memref.load %arg3[%c1_560, %1495] : memref<2x168xf32, #tpu.memory_space<smem>>
    %c13_i32_561 = arith.constant 13 : i32
    %1497 = arith.addi %1457, %c13_i32_561 : i32
    %c1_562 = arith.constant 1 : index
    %1498 = arith.index_cast %1497 : i32 to index
    %1499 = memref.load %arg3[%c1_562, %1498] : memref<2x168xf32, #tpu.memory_space<smem>>
    %c14_i32_563 = arith.constant 14 : i32
    %1500 = arith.addi %1457, %c14_i32_563 : i32
    %c1_564 = arith.constant 1 : index
    %1501 = arith.index_cast %1500 : i32 to index
    %1502 = memref.load %arg3[%c1_564, %1501] : memref<2x168xf32, #tpu.memory_space<smem>>
    %c15_i32_565 = arith.constant 15 : i32
    %1503 = arith.addi %1457, %c15_i32_565 : i32
    %c1_566 = arith.constant 1 : index
    %1504 = arith.index_cast %1503 : i32 to index
    %1505 = memref.load %arg3[%c1_566, %1504] : memref<2x168xf32, #tpu.memory_space<smem>>
    %c16_i32_567 = arith.constant 16 : i32
    %1506 = arith.addi %1457, %c16_i32_567 : i32
    %c1_568 = arith.constant 1 : index
    %1507 = arith.index_cast %1506 : i32 to index
    %1508 = memref.load %arg3[%c1_568, %1507] : memref<2x168xf32, #tpu.memory_space<smem>>
    %c17_i32_569 = arith.constant 17 : i32
    %1509 = arith.addi %1457, %c17_i32_569 : i32
    %c1_570 = arith.constant 1 : index
    %1510 = arith.index_cast %1509 : i32 to index
    %1511 = memref.load %arg3[%c1_570, %1510] : memref<2x168xf32, #tpu.memory_space<smem>>
    %c18_i32_571 = arith.constant 18 : i32
    %1512 = arith.addi %1457, %c18_i32_571 : i32
    %c1_572 = arith.constant 1 : index
    %1513 = arith.index_cast %1512 : i32 to index
    %1514 = memref.load %arg3[%c1_572, %1513] : memref<2x168xf32, #tpu.memory_space<smem>>
    %c19_i32_573 = arith.constant 19 : i32
    %1515 = arith.addi %1457, %c19_i32_573 : i32
    %c1_574 = arith.constant 1 : index
    %1516 = arith.index_cast %1515 : i32 to index
    %1517 = memref.load %arg3[%c1_574, %1516] : memref<2x168xf32, #tpu.memory_space<smem>>
    %c20_i32_575 = arith.constant 20 : i32
    %1518 = arith.addi %1457, %c20_i32_575 : i32
    %c1_576 = arith.constant 1 : index
    %1519 = arith.index_cast %1518 : i32 to index
    %1520 = memref.load %arg3[%c1_576, %1519] : memref<2x168xf32, #tpu.memory_space<smem>>
    %1521 = vector.broadcast %1460 : f32 to vector<8x128xf32>
    %1522 = arith.mulf %1521, %0 : vector<8x128xf32>
    %1523 = vector.broadcast %1463 : f32 to vector<8x128xf32>
    %1524 = arith.mulf %1523, %1 : vector<8x128xf32>
    %1525 = arith.addf %1522, %1524 : vector<8x128xf32>
    %1526 = vector.broadcast %1466 : f32 to vector<8x128xf32>
    %1527 = arith.addf %1525, %1526 : vector<8x128xf32>
    %1528 = vector.broadcast %1469 : f32 to vector<8x128xf32>
    %1529 = arith.mulf %1528, %0 : vector<8x128xf32>
    %1530 = vector.broadcast %1472 : f32 to vector<8x128xf32>
    %1531 = arith.mulf %1530, %1 : vector<8x128xf32>
    %1532 = arith.addf %1529, %1531 : vector<8x128xf32>
    %1533 = vector.broadcast %1475 : f32 to vector<8x128xf32>
    %1534 = arith.addf %1532, %1533 : vector<8x128xf32>
    %1535 = vector.broadcast %1478 : f32 to vector<8x128xf32>
    %1536 = arith.mulf %1535, %0 : vector<8x128xf32>
    %1537 = vector.broadcast %1481 : f32 to vector<8x128xf32>
    %1538 = arith.mulf %1537, %1 : vector<8x128xf32>
    %1539 = arith.addf %1536, %1538 : vector<8x128xf32>
    %1540 = vector.broadcast %1484 : f32 to vector<8x128xf32>
    %1541 = arith.addf %1539, %1540 : vector<8x128xf32>
    %1542 = vector.broadcast %1487 : f32 to vector<8x128xf32>
    %1543 = arith.mulf %1542, %0 : vector<8x128xf32>
    %1544 = vector.broadcast %1490 : f32 to vector<8x128xf32>
    %1545 = arith.mulf %1544, %1 : vector<8x128xf32>
    %1546 = arith.addf %1543, %1545 : vector<8x128xf32>
    %1547 = vector.broadcast %1493 : f32 to vector<8x128xf32>
    %1548 = arith.addf %1546, %1547 : vector<8x128xf32>
    %cst_577 = arith.constant 0.000000e+00 : f32
    %1549 = vector.broadcast %cst_577 : f32 to vector<8x128xf32>
    %1550 = arith.cmpf ogt, %1527, %1549 : vector<8x128xf32>
    %cst_578 = arith.constant 0.000000e+00 : f32
    %1551 = vector.broadcast %cst_578 : f32 to vector<8x128xf32>
    %1552 = arith.cmpf ogt, %1534, %1551 : vector<8x128xf32>
    %1553 = arith.andi %1550, %1552 : vector<8x128xi1>
    %cst_579 = arith.constant 0.000000e+00 : f32
    %1554 = vector.broadcast %cst_579 : f32 to vector<8x128xf32>
    %1555 = arith.cmpf ogt, %1541, %1554 : vector<8x128xf32>
    %1556 = arith.andi %1553, %1555 : vector<8x128xi1>
    %cst_580 = arith.constant 0.000000e+00 : f32
    %1557 = vector.broadcast %cst_580 : f32 to vector<8x128xf32>
    %1558 = arith.cmpf oge, %1548, %1557 : vector<8x128xf32>
    %1559 = arith.andi %1556, %1558 : vector<8x128xi1>
    %1560 = arith.cmpf olt, %1548, %1453 : vector<8x128xf32>
    %1561 = arith.andi %1559, %1560 : vector<8x128xi1>
    %1562 = vector.broadcast %1496 : f32 to vector<8x128xf32>
    %1563 = arith.mulf %1562, %0 : vector<8x128xf32>
    %1564 = vector.broadcast %1499 : f32 to vector<8x128xf32>
    %1565 = arith.mulf %1564, %1 : vector<8x128xf32>
    %1566 = arith.addf %1563, %1565 : vector<8x128xf32>
    %1567 = vector.broadcast %1502 : f32 to vector<8x128xf32>
    %1568 = arith.addf %1566, %1567 : vector<8x128xf32>
    %1569 = vector.broadcast %1505 : f32 to vector<8x128xf32>
    %1570 = arith.mulf %1569, %0 : vector<8x128xf32>
    %1571 = vector.broadcast %1508 : f32 to vector<8x128xf32>
    %1572 = arith.mulf %1571, %1 : vector<8x128xf32>
    %1573 = arith.addf %1570, %1572 : vector<8x128xf32>
    %1574 = vector.broadcast %1511 : f32 to vector<8x128xf32>
    %1575 = arith.addf %1573, %1574 : vector<8x128xf32>
    %1576 = vector.broadcast %1514 : f32 to vector<8x128xf32>
    %1577 = arith.mulf %1576, %0 : vector<8x128xf32>
    %1578 = vector.broadcast %1517 : f32 to vector<8x128xf32>
    %1579 = arith.mulf %1578, %1 : vector<8x128xf32>
    %1580 = arith.addf %1577, %1579 : vector<8x128xf32>
    %1581 = vector.broadcast %1520 : f32 to vector<8x128xf32>
    %1582 = arith.addf %1580, %1581 : vector<8x128xf32>
    %1583 = arith.select %1561, %1548, %1453 : vector<8x128xi1>, vector<8x128xf32>
    %1584 = arith.select %1561, %1568, %1454 : vector<8x128xi1>, vector<8x128xf32>
    %1585 = arith.select %1561, %1575, %1455 : vector<8x128xi1>, vector<8x128xf32>
    %1586 = arith.select %1561, %1582, %1456 : vector<8x128xi1>, vector<8x128xf32>
    %c4_i32_581 = arith.constant 4 : i32
    %c21_i32_582 = arith.constant 21 : i32
    %1587 = arith.muli %c21_i32_582, %c4_i32_581 : i32
    %c0_i32_583 = arith.constant 0 : i32
    %1588 = arith.addi %1587, %c0_i32_583 : i32
    %c1_584 = arith.constant 1 : index
    %1589 = arith.index_cast %1588 : i32 to index
    %1590 = memref.load %arg3[%c1_584, %1589] : memref<2x168xf32, #tpu.memory_space<smem>>
    %c1_i32_585 = arith.constant 1 : i32
    %1591 = arith.addi %1587, %c1_i32_585 : i32
    %c1_586 = arith.constant 1 : index
    %1592 = arith.index_cast %1591 : i32 to index
    %1593 = memref.load %arg3[%c1_586, %1592] : memref<2x168xf32, #tpu.memory_space<smem>>
    %c2_i32_587 = arith.constant 2 : i32
    %1594 = arith.addi %1587, %c2_i32_587 : i32
    %c1_588 = arith.constant 1 : index
    %1595 = arith.index_cast %1594 : i32 to index
    %1596 = memref.load %arg3[%c1_588, %1595] : memref<2x168xf32, #tpu.memory_space<smem>>
    %c3_i32_589 = arith.constant 3 : i32
    %1597 = arith.addi %1587, %c3_i32_589 : i32
    %c1_590 = arith.constant 1 : index
    %1598 = arith.index_cast %1597 : i32 to index
    %1599 = memref.load %arg3[%c1_590, %1598] : memref<2x168xf32, #tpu.memory_space<smem>>
    %c4_i32_591 = arith.constant 4 : i32
    %1600 = arith.addi %1587, %c4_i32_591 : i32
    %c1_592 = arith.constant 1 : index
    %1601 = arith.index_cast %1600 : i32 to index
    %1602 = memref.load %arg3[%c1_592, %1601] : memref<2x168xf32, #tpu.memory_space<smem>>
    %c5_i32_593 = arith.constant 5 : i32
    %1603 = arith.addi %1587, %c5_i32_593 : i32
    %c1_594 = arith.constant 1 : index
    %1604 = arith.index_cast %1603 : i32 to index
    %1605 = memref.load %arg3[%c1_594, %1604] : memref<2x168xf32, #tpu.memory_space<smem>>
    %c6_i32_595 = arith.constant 6 : i32
    %1606 = arith.addi %1587, %c6_i32_595 : i32
    %c1_596 = arith.constant 1 : index
    %1607 = arith.index_cast %1606 : i32 to index
    %1608 = memref.load %arg3[%c1_596, %1607] : memref<2x168xf32, #tpu.memory_space<smem>>
    %c7_i32_597 = arith.constant 7 : i32
    %1609 = arith.addi %1587, %c7_i32_597 : i32
    %c1_598 = arith.constant 1 : index
    %1610 = arith.index_cast %1609 : i32 to index
    %1611 = memref.load %arg3[%c1_598, %1610] : memref<2x168xf32, #tpu.memory_space<smem>>
    %c8_i32_599 = arith.constant 8 : i32
    %1612 = arith.addi %1587, %c8_i32_599 : i32
    %c1_600 = arith.constant 1 : index
    %1613 = arith.index_cast %1612 : i32 to index
    %1614 = memref.load %arg3[%c1_600, %1613] : memref<2x168xf32, #tpu.memory_space<smem>>
    %c9_i32_601 = arith.constant 9 : i32
    %1615 = arith.addi %1587, %c9_i32_601 : i32
    %c1_602 = arith.constant 1 : index
    %1616 = arith.index_cast %1615 : i32 to index
    %1617 = memref.load %arg3[%c1_602, %1616] : memref<2x168xf32, #tpu.memory_space<smem>>
    %c10_i32_603 = arith.constant 10 : i32
    %1618 = arith.addi %1587, %c10_i32_603 : i32
    %c1_604 = arith.constant 1 : index
    %1619 = arith.index_cast %1618 : i32 to index
    %1620 = memref.load %arg3[%c1_604, %1619] : memref<2x168xf32, #tpu.memory_space<smem>>
    %c11_i32_605 = arith.constant 11 : i32
    %1621 = arith.addi %1587, %c11_i32_605 : i32
    %c1_606 = arith.constant 1 : index
    %1622 = arith.index_cast %1621 : i32 to index
    %1623 = memref.load %arg3[%c1_606, %1622] : memref<2x168xf32, #tpu.memory_space<smem>>
    %c12_i32_607 = arith.constant 12 : i32
    %1624 = arith.addi %1587, %c12_i32_607 : i32
    %c1_608 = arith.constant 1 : index
    %1625 = arith.index_cast %1624 : i32 to index
    %1626 = memref.load %arg3[%c1_608, %1625] : memref<2x168xf32, #tpu.memory_space<smem>>
    %c13_i32_609 = arith.constant 13 : i32
    %1627 = arith.addi %1587, %c13_i32_609 : i32
    %c1_610 = arith.constant 1 : index
    %1628 = arith.index_cast %1627 : i32 to index
    %1629 = memref.load %arg3[%c1_610, %1628] : memref<2x168xf32, #tpu.memory_space<smem>>
    %c14_i32_611 = arith.constant 14 : i32
    %1630 = arith.addi %1587, %c14_i32_611 : i32
    %c1_612 = arith.constant 1 : index
    %1631 = arith.index_cast %1630 : i32 to index
    %1632 = memref.load %arg3[%c1_612, %1631] : memref<2x168xf32, #tpu.memory_space<smem>>
    %c15_i32_613 = arith.constant 15 : i32
    %1633 = arith.addi %1587, %c15_i32_613 : i32
    %c1_614 = arith.constant 1 : index
    %1634 = arith.index_cast %1633 : i32 to index
    %1635 = memref.load %arg3[%c1_614, %1634] : memref<2x168xf32, #tpu.memory_space<smem>>
    %c16_i32_615 = arith.constant 16 : i32
    %1636 = arith.addi %1587, %c16_i32_615 : i32
    %c1_616 = arith.constant 1 : index
    %1637 = arith.index_cast %1636 : i32 to index
    %1638 = memref.load %arg3[%c1_616, %1637] : memref<2x168xf32, #tpu.memory_space<smem>>
    %c17_i32_617 = arith.constant 17 : i32
    %1639 = arith.addi %1587, %c17_i32_617 : i32
    %c1_618 = arith.constant 1 : index
    %1640 = arith.index_cast %1639 : i32 to index
    %1641 = memref.load %arg3[%c1_618, %1640] : memref<2x168xf32, #tpu.memory_space<smem>>
    %c18_i32_619 = arith.constant 18 : i32
    %1642 = arith.addi %1587, %c18_i32_619 : i32
    %c1_620 = arith.constant 1 : index
    %1643 = arith.index_cast %1642 : i32 to index
    %1644 = memref.load %arg3[%c1_620, %1643] : memref<2x168xf32, #tpu.memory_space<smem>>
    %c19_i32_621 = arith.constant 19 : i32
    %1645 = arith.addi %1587, %c19_i32_621 : i32
    %c1_622 = arith.constant 1 : index
    %1646 = arith.index_cast %1645 : i32 to index
    %1647 = memref.load %arg3[%c1_622, %1646] : memref<2x168xf32, #tpu.memory_space<smem>>
    %c20_i32_623 = arith.constant 20 : i32
    %1648 = arith.addi %1587, %c20_i32_623 : i32
    %c1_624 = arith.constant 1 : index
    %1649 = arith.index_cast %1648 : i32 to index
    %1650 = memref.load %arg3[%c1_624, %1649] : memref<2x168xf32, #tpu.memory_space<smem>>
    %1651 = vector.broadcast %1590 : f32 to vector<8x128xf32>
    %1652 = arith.mulf %1651, %0 : vector<8x128xf32>
    %1653 = vector.broadcast %1593 : f32 to vector<8x128xf32>
    %1654 = arith.mulf %1653, %1 : vector<8x128xf32>
    %1655 = arith.addf %1652, %1654 : vector<8x128xf32>
    %1656 = vector.broadcast %1596 : f32 to vector<8x128xf32>
    %1657 = arith.addf %1655, %1656 : vector<8x128xf32>
    %1658 = vector.broadcast %1599 : f32 to vector<8x128xf32>
    %1659 = arith.mulf %1658, %0 : vector<8x128xf32>
    %1660 = vector.broadcast %1602 : f32 to vector<8x128xf32>
    %1661 = arith.mulf %1660, %1 : vector<8x128xf32>
    %1662 = arith.addf %1659, %1661 : vector<8x128xf32>
    %1663 = vector.broadcast %1605 : f32 to vector<8x128xf32>
    %1664 = arith.addf %1662, %1663 : vector<8x128xf32>
    %1665 = vector.broadcast %1608 : f32 to vector<8x128xf32>
    %1666 = arith.mulf %1665, %0 : vector<8x128xf32>
    %1667 = vector.broadcast %1611 : f32 to vector<8x128xf32>
    %1668 = arith.mulf %1667, %1 : vector<8x128xf32>
    %1669 = arith.addf %1666, %1668 : vector<8x128xf32>
    %1670 = vector.broadcast %1614 : f32 to vector<8x128xf32>
    %1671 = arith.addf %1669, %1670 : vector<8x128xf32>
    %1672 = vector.broadcast %1617 : f32 to vector<8x128xf32>
    %1673 = arith.mulf %1672, %0 : vector<8x128xf32>
    %1674 = vector.broadcast %1620 : f32 to vector<8x128xf32>
    %1675 = arith.mulf %1674, %1 : vector<8x128xf32>
    %1676 = arith.addf %1673, %1675 : vector<8x128xf32>
    %1677 = vector.broadcast %1623 : f32 to vector<8x128xf32>
    %1678 = arith.addf %1676, %1677 : vector<8x128xf32>
    %cst_625 = arith.constant 0.000000e+00 : f32
    %1679 = vector.broadcast %cst_625 : f32 to vector<8x128xf32>
    %1680 = arith.cmpf ogt, %1657, %1679 : vector<8x128xf32>
    %cst_626 = arith.constant 0.000000e+00 : f32
    %1681 = vector.broadcast %cst_626 : f32 to vector<8x128xf32>
    %1682 = arith.cmpf ogt, %1664, %1681 : vector<8x128xf32>
    %1683 = arith.andi %1680, %1682 : vector<8x128xi1>
    %cst_627 = arith.constant 0.000000e+00 : f32
    %1684 = vector.broadcast %cst_627 : f32 to vector<8x128xf32>
    %1685 = arith.cmpf ogt, %1671, %1684 : vector<8x128xf32>
    %1686 = arith.andi %1683, %1685 : vector<8x128xi1>
    %cst_628 = arith.constant 0.000000e+00 : f32
    %1687 = vector.broadcast %cst_628 : f32 to vector<8x128xf32>
    %1688 = arith.cmpf oge, %1678, %1687 : vector<8x128xf32>
    %1689 = arith.andi %1686, %1688 : vector<8x128xi1>
    %1690 = arith.cmpf olt, %1678, %1583 : vector<8x128xf32>
    %1691 = arith.andi %1689, %1690 : vector<8x128xi1>
    %1692 = vector.broadcast %1626 : f32 to vector<8x128xf32>
    %1693 = arith.mulf %1692, %0 : vector<8x128xf32>
    %1694 = vector.broadcast %1629 : f32 to vector<8x128xf32>
    %1695 = arith.mulf %1694, %1 : vector<8x128xf32>
    %1696 = arith.addf %1693, %1695 : vector<8x128xf32>
    %1697 = vector.broadcast %1632 : f32 to vector<8x128xf32>
    %1698 = arith.addf %1696, %1697 : vector<8x128xf32>
    %1699 = vector.broadcast %1635 : f32 to vector<8x128xf32>
    %1700 = arith.mulf %1699, %0 : vector<8x128xf32>
    %1701 = vector.broadcast %1638 : f32 to vector<8x128xf32>
    %1702 = arith.mulf %1701, %1 : vector<8x128xf32>
    %1703 = arith.addf %1700, %1702 : vector<8x128xf32>
    %1704 = vector.broadcast %1641 : f32 to vector<8x128xf32>
    %1705 = arith.addf %1703, %1704 : vector<8x128xf32>
    %1706 = vector.broadcast %1644 : f32 to vector<8x128xf32>
    %1707 = arith.mulf %1706, %0 : vector<8x128xf32>
    %1708 = vector.broadcast %1647 : f32 to vector<8x128xf32>
    %1709 = arith.mulf %1708, %1 : vector<8x128xf32>
    %1710 = arith.addf %1707, %1709 : vector<8x128xf32>
    %1711 = vector.broadcast %1650 : f32 to vector<8x128xf32>
    %1712 = arith.addf %1710, %1711 : vector<8x128xf32>
    %1713 = arith.select %1691, %1678, %1583 : vector<8x128xi1>, vector<8x128xf32>
    %1714 = arith.select %1691, %1698, %1584 : vector<8x128xi1>, vector<8x128xf32>
    %1715 = arith.select %1691, %1705, %1585 : vector<8x128xi1>, vector<8x128xf32>
    %1716 = arith.select %1691, %1712, %1586 : vector<8x128xi1>, vector<8x128xf32>
    %c5_i32_629 = arith.constant 5 : i32
    %c21_i32_630 = arith.constant 21 : i32
    %1717 = arith.muli %c21_i32_630, %c5_i32_629 : i32
    %c0_i32_631 = arith.constant 0 : i32
    %1718 = arith.addi %1717, %c0_i32_631 : i32
    %c1_632 = arith.constant 1 : index
    %1719 = arith.index_cast %1718 : i32 to index
    %1720 = memref.load %arg3[%c1_632, %1719] : memref<2x168xf32, #tpu.memory_space<smem>>
    %c1_i32_633 = arith.constant 1 : i32
    %1721 = arith.addi %1717, %c1_i32_633 : i32
    %c1_634 = arith.constant 1 : index
    %1722 = arith.index_cast %1721 : i32 to index
    %1723 = memref.load %arg3[%c1_634, %1722] : memref<2x168xf32, #tpu.memory_space<smem>>
    %c2_i32_635 = arith.constant 2 : i32
    %1724 = arith.addi %1717, %c2_i32_635 : i32
    %c1_636 = arith.constant 1 : index
    %1725 = arith.index_cast %1724 : i32 to index
    %1726 = memref.load %arg3[%c1_636, %1725] : memref<2x168xf32, #tpu.memory_space<smem>>
    %c3_i32_637 = arith.constant 3 : i32
    %1727 = arith.addi %1717, %c3_i32_637 : i32
    %c1_638 = arith.constant 1 : index
    %1728 = arith.index_cast %1727 : i32 to index
    %1729 = memref.load %arg3[%c1_638, %1728] : memref<2x168xf32, #tpu.memory_space<smem>>
    %c4_i32_639 = arith.constant 4 : i32
    %1730 = arith.addi %1717, %c4_i32_639 : i32
    %c1_640 = arith.constant 1 : index
    %1731 = arith.index_cast %1730 : i32 to index
    %1732 = memref.load %arg3[%c1_640, %1731] : memref<2x168xf32, #tpu.memory_space<smem>>
    %c5_i32_641 = arith.constant 5 : i32
    %1733 = arith.addi %1717, %c5_i32_641 : i32
    %c1_642 = arith.constant 1 : index
    %1734 = arith.index_cast %1733 : i32 to index
    %1735 = memref.load %arg3[%c1_642, %1734] : memref<2x168xf32, #tpu.memory_space<smem>>
    %c6_i32_643 = arith.constant 6 : i32
    %1736 = arith.addi %1717, %c6_i32_643 : i32
    %c1_644 = arith.constant 1 : index
    %1737 = arith.index_cast %1736 : i32 to index
    %1738 = memref.load %arg3[%c1_644, %1737] : memref<2x168xf32, #tpu.memory_space<smem>>
    %c7_i32_645 = arith.constant 7 : i32
    %1739 = arith.addi %1717, %c7_i32_645 : i32
    %c1_646 = arith.constant 1 : index
    %1740 = arith.index_cast %1739 : i32 to index
    %1741 = memref.load %arg3[%c1_646, %1740] : memref<2x168xf32, #tpu.memory_space<smem>>
    %c8_i32_647 = arith.constant 8 : i32
    %1742 = arith.addi %1717, %c8_i32_647 : i32
    %c1_648 = arith.constant 1 : index
    %1743 = arith.index_cast %1742 : i32 to index
    %1744 = memref.load %arg3[%c1_648, %1743] : memref<2x168xf32, #tpu.memory_space<smem>>
    %c9_i32_649 = arith.constant 9 : i32
    %1745 = arith.addi %1717, %c9_i32_649 : i32
    %c1_650 = arith.constant 1 : index
    %1746 = arith.index_cast %1745 : i32 to index
    %1747 = memref.load %arg3[%c1_650, %1746] : memref<2x168xf32, #tpu.memory_space<smem>>
    %c10_i32_651 = arith.constant 10 : i32
    %1748 = arith.addi %1717, %c10_i32_651 : i32
    %c1_652 = arith.constant 1 : index
    %1749 = arith.index_cast %1748 : i32 to index
    %1750 = memref.load %arg3[%c1_652, %1749] : memref<2x168xf32, #tpu.memory_space<smem>>
    %c11_i32_653 = arith.constant 11 : i32
    %1751 = arith.addi %1717, %c11_i32_653 : i32
    %c1_654 = arith.constant 1 : index
    %1752 = arith.index_cast %1751 : i32 to index
    %1753 = memref.load %arg3[%c1_654, %1752] : memref<2x168xf32, #tpu.memory_space<smem>>
    %c12_i32_655 = arith.constant 12 : i32
    %1754 = arith.addi %1717, %c12_i32_655 : i32
    %c1_656 = arith.constant 1 : index
    %1755 = arith.index_cast %1754 : i32 to index
    %1756 = memref.load %arg3[%c1_656, %1755] : memref<2x168xf32, #tpu.memory_space<smem>>
    %c13_i32_657 = arith.constant 13 : i32
    %1757 = arith.addi %1717, %c13_i32_657 : i32
    %c1_658 = arith.constant 1 : index
    %1758 = arith.index_cast %1757 : i32 to index
    %1759 = memref.load %arg3[%c1_658, %1758] : memref<2x168xf32, #tpu.memory_space<smem>>
    %c14_i32_659 = arith.constant 14 : i32
    %1760 = arith.addi %1717, %c14_i32_659 : i32
    %c1_660 = arith.constant 1 : index
    %1761 = arith.index_cast %1760 : i32 to index
    %1762 = memref.load %arg3[%c1_660, %1761] : memref<2x168xf32, #tpu.memory_space<smem>>
    %c15_i32_661 = arith.constant 15 : i32
    %1763 = arith.addi %1717, %c15_i32_661 : i32
    %c1_662 = arith.constant 1 : index
    %1764 = arith.index_cast %1763 : i32 to index
    %1765 = memref.load %arg3[%c1_662, %1764] : memref<2x168xf32, #tpu.memory_space<smem>>
    %c16_i32_663 = arith.constant 16 : i32
    %1766 = arith.addi %1717, %c16_i32_663 : i32
    %c1_664 = arith.constant 1 : index
    %1767 = arith.index_cast %1766 : i32 to index
    %1768 = memref.load %arg3[%c1_664, %1767] : memref<2x168xf32, #tpu.memory_space<smem>>
    %c17_i32_665 = arith.constant 17 : i32
    %1769 = arith.addi %1717, %c17_i32_665 : i32
    %c1_666 = arith.constant 1 : index
    %1770 = arith.index_cast %1769 : i32 to index
    %1771 = memref.load %arg3[%c1_666, %1770] : memref<2x168xf32, #tpu.memory_space<smem>>
    %c18_i32_667 = arith.constant 18 : i32
    %1772 = arith.addi %1717, %c18_i32_667 : i32
    %c1_668 = arith.constant 1 : index
    %1773 = arith.index_cast %1772 : i32 to index
    %1774 = memref.load %arg3[%c1_668, %1773] : memref<2x168xf32, #tpu.memory_space<smem>>
    %c19_i32_669 = arith.constant 19 : i32
    %1775 = arith.addi %1717, %c19_i32_669 : i32
    %c1_670 = arith.constant 1 : index
    %1776 = arith.index_cast %1775 : i32 to index
    %1777 = memref.load %arg3[%c1_670, %1776] : memref<2x168xf32, #tpu.memory_space<smem>>
    %c20_i32_671 = arith.constant 20 : i32
    %1778 = arith.addi %1717, %c20_i32_671 : i32
    %c1_672 = arith.constant 1 : index
    %1779 = arith.index_cast %1778 : i32 to index
    %1780 = memref.load %arg3[%c1_672, %1779] : memref<2x168xf32, #tpu.memory_space<smem>>
    %1781 = vector.broadcast %1720 : f32 to vector<8x128xf32>
    %1782 = arith.mulf %1781, %0 : vector<8x128xf32>
    %1783 = vector.broadcast %1723 : f32 to vector<8x128xf32>
    %1784 = arith.mulf %1783, %1 : vector<8x128xf32>
    %1785 = arith.addf %1782, %1784 : vector<8x128xf32>
    %1786 = vector.broadcast %1726 : f32 to vector<8x128xf32>
    %1787 = arith.addf %1785, %1786 : vector<8x128xf32>
    %1788 = vector.broadcast %1729 : f32 to vector<8x128xf32>
    %1789 = arith.mulf %1788, %0 : vector<8x128xf32>
    %1790 = vector.broadcast %1732 : f32 to vector<8x128xf32>
    %1791 = arith.mulf %1790, %1 : vector<8x128xf32>
    %1792 = arith.addf %1789, %1791 : vector<8x128xf32>
    %1793 = vector.broadcast %1735 : f32 to vector<8x128xf32>
    %1794 = arith.addf %1792, %1793 : vector<8x128xf32>
    %1795 = vector.broadcast %1738 : f32 to vector<8x128xf32>
    %1796 = arith.mulf %1795, %0 : vector<8x128xf32>
    %1797 = vector.broadcast %1741 : f32 to vector<8x128xf32>
    %1798 = arith.mulf %1797, %1 : vector<8x128xf32>
    %1799 = arith.addf %1796, %1798 : vector<8x128xf32>
    %1800 = vector.broadcast %1744 : f32 to vector<8x128xf32>
    %1801 = arith.addf %1799, %1800 : vector<8x128xf32>
    %1802 = vector.broadcast %1747 : f32 to vector<8x128xf32>
    %1803 = arith.mulf %1802, %0 : vector<8x128xf32>
    %1804 = vector.broadcast %1750 : f32 to vector<8x128xf32>
    %1805 = arith.mulf %1804, %1 : vector<8x128xf32>
    %1806 = arith.addf %1803, %1805 : vector<8x128xf32>
    %1807 = vector.broadcast %1753 : f32 to vector<8x128xf32>
    %1808 = arith.addf %1806, %1807 : vector<8x128xf32>
    %cst_673 = arith.constant 0.000000e+00 : f32
    %1809 = vector.broadcast %cst_673 : f32 to vector<8x128xf32>
    %1810 = arith.cmpf ogt, %1787, %1809 : vector<8x128xf32>
    %cst_674 = arith.constant 0.000000e+00 : f32
    %1811 = vector.broadcast %cst_674 : f32 to vector<8x128xf32>
    %1812 = arith.cmpf ogt, %1794, %1811 : vector<8x128xf32>
    %1813 = arith.andi %1810, %1812 : vector<8x128xi1>
    %cst_675 = arith.constant 0.000000e+00 : f32
    %1814 = vector.broadcast %cst_675 : f32 to vector<8x128xf32>
    %1815 = arith.cmpf ogt, %1801, %1814 : vector<8x128xf32>
    %1816 = arith.andi %1813, %1815 : vector<8x128xi1>
    %cst_676 = arith.constant 0.000000e+00 : f32
    %1817 = vector.broadcast %cst_676 : f32 to vector<8x128xf32>
    %1818 = arith.cmpf oge, %1808, %1817 : vector<8x128xf32>
    %1819 = arith.andi %1816, %1818 : vector<8x128xi1>
    %1820 = arith.cmpf olt, %1808, %1713 : vector<8x128xf32>
    %1821 = arith.andi %1819, %1820 : vector<8x128xi1>
    %1822 = vector.broadcast %1756 : f32 to vector<8x128xf32>
    %1823 = arith.mulf %1822, %0 : vector<8x128xf32>
    %1824 = vector.broadcast %1759 : f32 to vector<8x128xf32>
    %1825 = arith.mulf %1824, %1 : vector<8x128xf32>
    %1826 = arith.addf %1823, %1825 : vector<8x128xf32>
    %1827 = vector.broadcast %1762 : f32 to vector<8x128xf32>
    %1828 = arith.addf %1826, %1827 : vector<8x128xf32>
    %1829 = vector.broadcast %1765 : f32 to vector<8x128xf32>
    %1830 = arith.mulf %1829, %0 : vector<8x128xf32>
    %1831 = vector.broadcast %1768 : f32 to vector<8x128xf32>
    %1832 = arith.mulf %1831, %1 : vector<8x128xf32>
    %1833 = arith.addf %1830, %1832 : vector<8x128xf32>
    %1834 = vector.broadcast %1771 : f32 to vector<8x128xf32>
    %1835 = arith.addf %1833, %1834 : vector<8x128xf32>
    %1836 = vector.broadcast %1774 : f32 to vector<8x128xf32>
    %1837 = arith.mulf %1836, %0 : vector<8x128xf32>
    %1838 = vector.broadcast %1777 : f32 to vector<8x128xf32>
    %1839 = arith.mulf %1838, %1 : vector<8x128xf32>
    %1840 = arith.addf %1837, %1839 : vector<8x128xf32>
    %1841 = vector.broadcast %1780 : f32 to vector<8x128xf32>
    %1842 = arith.addf %1840, %1841 : vector<8x128xf32>
    %1843 = arith.select %1821, %1808, %1713 : vector<8x128xi1>, vector<8x128xf32>
    %1844 = arith.select %1821, %1828, %1714 : vector<8x128xi1>, vector<8x128xf32>
    %1845 = arith.select %1821, %1835, %1715 : vector<8x128xi1>, vector<8x128xf32>
    %1846 = arith.select %1821, %1842, %1716 : vector<8x128xi1>, vector<8x128xf32>
    %c6_i32_677 = arith.constant 6 : i32
    %c21_i32_678 = arith.constant 21 : i32
    %1847 = arith.muli %c21_i32_678, %c6_i32_677 : i32
    %c0_i32_679 = arith.constant 0 : i32
    %1848 = arith.addi %1847, %c0_i32_679 : i32
    %c1_680 = arith.constant 1 : index
    %1849 = arith.index_cast %1848 : i32 to index
    %1850 = memref.load %arg3[%c1_680, %1849] : memref<2x168xf32, #tpu.memory_space<smem>>
    %c1_i32_681 = arith.constant 1 : i32
    %1851 = arith.addi %1847, %c1_i32_681 : i32
    %c1_682 = arith.constant 1 : index
    %1852 = arith.index_cast %1851 : i32 to index
    %1853 = memref.load %arg3[%c1_682, %1852] : memref<2x168xf32, #tpu.memory_space<smem>>
    %c2_i32_683 = arith.constant 2 : i32
    %1854 = arith.addi %1847, %c2_i32_683 : i32
    %c1_684 = arith.constant 1 : index
    %1855 = arith.index_cast %1854 : i32 to index
    %1856 = memref.load %arg3[%c1_684, %1855] : memref<2x168xf32, #tpu.memory_space<smem>>
    %c3_i32_685 = arith.constant 3 : i32
    %1857 = arith.addi %1847, %c3_i32_685 : i32
    %c1_686 = arith.constant 1 : index
    %1858 = arith.index_cast %1857 : i32 to index
    %1859 = memref.load %arg3[%c1_686, %1858] : memref<2x168xf32, #tpu.memory_space<smem>>
    %c4_i32_687 = arith.constant 4 : i32
    %1860 = arith.addi %1847, %c4_i32_687 : i32
    %c1_688 = arith.constant 1 : index
    %1861 = arith.index_cast %1860 : i32 to index
    %1862 = memref.load %arg3[%c1_688, %1861] : memref<2x168xf32, #tpu.memory_space<smem>>
    %c5_i32_689 = arith.constant 5 : i32
    %1863 = arith.addi %1847, %c5_i32_689 : i32
    %c1_690 = arith.constant 1 : index
    %1864 = arith.index_cast %1863 : i32 to index
    %1865 = memref.load %arg3[%c1_690, %1864] : memref<2x168xf32, #tpu.memory_space<smem>>
    %c6_i32_691 = arith.constant 6 : i32
    %1866 = arith.addi %1847, %c6_i32_691 : i32
    %c1_692 = arith.constant 1 : index
    %1867 = arith.index_cast %1866 : i32 to index
    %1868 = memref.load %arg3[%c1_692, %1867] : memref<2x168xf32, #tpu.memory_space<smem>>
    %c7_i32_693 = arith.constant 7 : i32
    %1869 = arith.addi %1847, %c7_i32_693 : i32
    %c1_694 = arith.constant 1 : index
    %1870 = arith.index_cast %1869 : i32 to index
    %1871 = memref.load %arg3[%c1_694, %1870] : memref<2x168xf32, #tpu.memory_space<smem>>
    %c8_i32_695 = arith.constant 8 : i32
    %1872 = arith.addi %1847, %c8_i32_695 : i32
    %c1_696 = arith.constant 1 : index
    %1873 = arith.index_cast %1872 : i32 to index
    %1874 = memref.load %arg3[%c1_696, %1873] : memref<2x168xf32, #tpu.memory_space<smem>>
    %c9_i32_697 = arith.constant 9 : i32
    %1875 = arith.addi %1847, %c9_i32_697 : i32
    %c1_698 = arith.constant 1 : index
    %1876 = arith.index_cast %1875 : i32 to index
    %1877 = memref.load %arg3[%c1_698, %1876] : memref<2x168xf32, #tpu.memory_space<smem>>
    %c10_i32_699 = arith.constant 10 : i32
    %1878 = arith.addi %1847, %c10_i32_699 : i32
    %c1_700 = arith.constant 1 : index
    %1879 = arith.index_cast %1878 : i32 to index
    %1880 = memref.load %arg3[%c1_700, %1879] : memref<2x168xf32, #tpu.memory_space<smem>>
    %c11_i32_701 = arith.constant 11 : i32
    %1881 = arith.addi %1847, %c11_i32_701 : i32
    %c1_702 = arith.constant 1 : index
    %1882 = arith.index_cast %1881 : i32 to index
    %1883 = memref.load %arg3[%c1_702, %1882] : memref<2x168xf32, #tpu.memory_space<smem>>
    %c12_i32_703 = arith.constant 12 : i32
    %1884 = arith.addi %1847, %c12_i32_703 : i32
    %c1_704 = arith.constant 1 : index
    %1885 = arith.index_cast %1884 : i32 to index
    %1886 = memref.load %arg3[%c1_704, %1885] : memref<2x168xf32, #tpu.memory_space<smem>>
    %c13_i32_705 = arith.constant 13 : i32
    %1887 = arith.addi %1847, %c13_i32_705 : i32
    %c1_706 = arith.constant 1 : index
    %1888 = arith.index_cast %1887 : i32 to index
    %1889 = memref.load %arg3[%c1_706, %1888] : memref<2x168xf32, #tpu.memory_space<smem>>
    %c14_i32_707 = arith.constant 14 : i32
    %1890 = arith.addi %1847, %c14_i32_707 : i32
    %c1_708 = arith.constant 1 : index
    %1891 = arith.index_cast %1890 : i32 to index
    %1892 = memref.load %arg3[%c1_708, %1891] : memref<2x168xf32, #tpu.memory_space<smem>>
    %c15_i32_709 = arith.constant 15 : i32
    %1893 = arith.addi %1847, %c15_i32_709 : i32
    %c1_710 = arith.constant 1 : index
    %1894 = arith.index_cast %1893 : i32 to index
    %1895 = memref.load %arg3[%c1_710, %1894] : memref<2x168xf32, #tpu.memory_space<smem>>
    %c16_i32_711 = arith.constant 16 : i32
    %1896 = arith.addi %1847, %c16_i32_711 : i32
    %c1_712 = arith.constant 1 : index
    %1897 = arith.index_cast %1896 : i32 to index
    %1898 = memref.load %arg3[%c1_712, %1897] : memref<2x168xf32, #tpu.memory_space<smem>>
    %c17_i32_713 = arith.constant 17 : i32
    %1899 = arith.addi %1847, %c17_i32_713 : i32
    %c1_714 = arith.constant 1 : index
    %1900 = arith.index_cast %1899 : i32 to index
    %1901 = memref.load %arg3[%c1_714, %1900] : memref<2x168xf32, #tpu.memory_space<smem>>
    %c18_i32_715 = arith.constant 18 : i32
    %1902 = arith.addi %1847, %c18_i32_715 : i32
    %c1_716 = arith.constant 1 : index
    %1903 = arith.index_cast %1902 : i32 to index
    %1904 = memref.load %arg3[%c1_716, %1903] : memref<2x168xf32, #tpu.memory_space<smem>>
    %c19_i32_717 = arith.constant 19 : i32
    %1905 = arith.addi %1847, %c19_i32_717 : i32
    %c1_718 = arith.constant 1 : index
    %1906 = arith.index_cast %1905 : i32 to index
    %1907 = memref.load %arg3[%c1_718, %1906] : memref<2x168xf32, #tpu.memory_space<smem>>
    %c20_i32_719 = arith.constant 20 : i32
    %1908 = arith.addi %1847, %c20_i32_719 : i32
    %c1_720 = arith.constant 1 : index
    %1909 = arith.index_cast %1908 : i32 to index
    %1910 = memref.load %arg3[%c1_720, %1909] : memref<2x168xf32, #tpu.memory_space<smem>>
    %1911 = vector.broadcast %1850 : f32 to vector<8x128xf32>
    %1912 = arith.mulf %1911, %0 : vector<8x128xf32>
    %1913 = vector.broadcast %1853 : f32 to vector<8x128xf32>
    %1914 = arith.mulf %1913, %1 : vector<8x128xf32>
    %1915 = arith.addf %1912, %1914 : vector<8x128xf32>
    %1916 = vector.broadcast %1856 : f32 to vector<8x128xf32>
    %1917 = arith.addf %1915, %1916 : vector<8x128xf32>
    %1918 = vector.broadcast %1859 : f32 to vector<8x128xf32>
    %1919 = arith.mulf %1918, %0 : vector<8x128xf32>
    %1920 = vector.broadcast %1862 : f32 to vector<8x128xf32>
    %1921 = arith.mulf %1920, %1 : vector<8x128xf32>
    %1922 = arith.addf %1919, %1921 : vector<8x128xf32>
    %1923 = vector.broadcast %1865 : f32 to vector<8x128xf32>
    %1924 = arith.addf %1922, %1923 : vector<8x128xf32>
    %1925 = vector.broadcast %1868 : f32 to vector<8x128xf32>
    %1926 = arith.mulf %1925, %0 : vector<8x128xf32>
    %1927 = vector.broadcast %1871 : f32 to vector<8x128xf32>
    %1928 = arith.mulf %1927, %1 : vector<8x128xf32>
    %1929 = arith.addf %1926, %1928 : vector<8x128xf32>
    %1930 = vector.broadcast %1874 : f32 to vector<8x128xf32>
    %1931 = arith.addf %1929, %1930 : vector<8x128xf32>
    %1932 = vector.broadcast %1877 : f32 to vector<8x128xf32>
    %1933 = arith.mulf %1932, %0 : vector<8x128xf32>
    %1934 = vector.broadcast %1880 : f32 to vector<8x128xf32>
    %1935 = arith.mulf %1934, %1 : vector<8x128xf32>
    %1936 = arith.addf %1933, %1935 : vector<8x128xf32>
    %1937 = vector.broadcast %1883 : f32 to vector<8x128xf32>
    %1938 = arith.addf %1936, %1937 : vector<8x128xf32>
    %cst_721 = arith.constant 0.000000e+00 : f32
    %1939 = vector.broadcast %cst_721 : f32 to vector<8x128xf32>
    %1940 = arith.cmpf ogt, %1917, %1939 : vector<8x128xf32>
    %cst_722 = arith.constant 0.000000e+00 : f32
    %1941 = vector.broadcast %cst_722 : f32 to vector<8x128xf32>
    %1942 = arith.cmpf ogt, %1924, %1941 : vector<8x128xf32>
    %1943 = arith.andi %1940, %1942 : vector<8x128xi1>
    %cst_723 = arith.constant 0.000000e+00 : f32
    %1944 = vector.broadcast %cst_723 : f32 to vector<8x128xf32>
    %1945 = arith.cmpf ogt, %1931, %1944 : vector<8x128xf32>
    %1946 = arith.andi %1943, %1945 : vector<8x128xi1>
    %cst_724 = arith.constant 0.000000e+00 : f32
    %1947 = vector.broadcast %cst_724 : f32 to vector<8x128xf32>
    %1948 = arith.cmpf oge, %1938, %1947 : vector<8x128xf32>
    %1949 = arith.andi %1946, %1948 : vector<8x128xi1>
    %1950 = arith.cmpf olt, %1938, %1843 : vector<8x128xf32>
    %1951 = arith.andi %1949, %1950 : vector<8x128xi1>
    %1952 = vector.broadcast %1886 : f32 to vector<8x128xf32>
    %1953 = arith.mulf %1952, %0 : vector<8x128xf32>
    %1954 = vector.broadcast %1889 : f32 to vector<8x128xf32>
    %1955 = arith.mulf %1954, %1 : vector<8x128xf32>
    %1956 = arith.addf %1953, %1955 : vector<8x128xf32>
    %1957 = vector.broadcast %1892 : f32 to vector<8x128xf32>
    %1958 = arith.addf %1956, %1957 : vector<8x128xf32>
    %1959 = vector.broadcast %1895 : f32 to vector<8x128xf32>
    %1960 = arith.mulf %1959, %0 : vector<8x128xf32>
    %1961 = vector.broadcast %1898 : f32 to vector<8x128xf32>
    %1962 = arith.mulf %1961, %1 : vector<8x128xf32>
    %1963 = arith.addf %1960, %1962 : vector<8x128xf32>
    %1964 = vector.broadcast %1901 : f32 to vector<8x128xf32>
    %1965 = arith.addf %1963, %1964 : vector<8x128xf32>
    %1966 = vector.broadcast %1904 : f32 to vector<8x128xf32>
    %1967 = arith.mulf %1966, %0 : vector<8x128xf32>
    %1968 = vector.broadcast %1907 : f32 to vector<8x128xf32>
    %1969 = arith.mulf %1968, %1 : vector<8x128xf32>
    %1970 = arith.addf %1967, %1969 : vector<8x128xf32>
    %1971 = vector.broadcast %1910 : f32 to vector<8x128xf32>
    %1972 = arith.addf %1970, %1971 : vector<8x128xf32>
    %1973 = arith.select %1951, %1938, %1843 : vector<8x128xi1>, vector<8x128xf32>
    %1974 = arith.select %1951, %1958, %1844 : vector<8x128xi1>, vector<8x128xf32>
    %1975 = arith.select %1951, %1965, %1845 : vector<8x128xi1>, vector<8x128xf32>
    %1976 = arith.select %1951, %1972, %1846 : vector<8x128xi1>, vector<8x128xf32>
    %c7_i32_725 = arith.constant 7 : i32
    %c21_i32_726 = arith.constant 21 : i32
    %1977 = arith.muli %c21_i32_726, %c7_i32_725 : i32
    %c0_i32_727 = arith.constant 0 : i32
    %1978 = arith.addi %1977, %c0_i32_727 : i32
    %c1_728 = arith.constant 1 : index
    %1979 = arith.index_cast %1978 : i32 to index
    %1980 = memref.load %arg3[%c1_728, %1979] : memref<2x168xf32, #tpu.memory_space<smem>>
    %c1_i32_729 = arith.constant 1 : i32
    %1981 = arith.addi %1977, %c1_i32_729 : i32
    %c1_730 = arith.constant 1 : index
    %1982 = arith.index_cast %1981 : i32 to index
    %1983 = memref.load %arg3[%c1_730, %1982] : memref<2x168xf32, #tpu.memory_space<smem>>
    %c2_i32_731 = arith.constant 2 : i32
    %1984 = arith.addi %1977, %c2_i32_731 : i32
    %c1_732 = arith.constant 1 : index
    %1985 = arith.index_cast %1984 : i32 to index
    %1986 = memref.load %arg3[%c1_732, %1985] : memref<2x168xf32, #tpu.memory_space<smem>>
    %c3_i32_733 = arith.constant 3 : i32
    %1987 = arith.addi %1977, %c3_i32_733 : i32
    %c1_734 = arith.constant 1 : index
    %1988 = arith.index_cast %1987 : i32 to index
    %1989 = memref.load %arg3[%c1_734, %1988] : memref<2x168xf32, #tpu.memory_space<smem>>
    %c4_i32_735 = arith.constant 4 : i32
    %1990 = arith.addi %1977, %c4_i32_735 : i32
    %c1_736 = arith.constant 1 : index
    %1991 = arith.index_cast %1990 : i32 to index
    %1992 = memref.load %arg3[%c1_736, %1991] : memref<2x168xf32, #tpu.memory_space<smem>>
    %c5_i32_737 = arith.constant 5 : i32
    %1993 = arith.addi %1977, %c5_i32_737 : i32
    %c1_738 = arith.constant 1 : index
    %1994 = arith.index_cast %1993 : i32 to index
    %1995 = memref.load %arg3[%c1_738, %1994] : memref<2x168xf32, #tpu.memory_space<smem>>
    %c6_i32_739 = arith.constant 6 : i32
    %1996 = arith.addi %1977, %c6_i32_739 : i32
    %c1_740 = arith.constant 1 : index
    %1997 = arith.index_cast %1996 : i32 to index
    %1998 = memref.load %arg3[%c1_740, %1997] : memref<2x168xf32, #tpu.memory_space<smem>>
    %c7_i32_741 = arith.constant 7 : i32
    %1999 = arith.addi %1977, %c7_i32_741 : i32
    %c1_742 = arith.constant 1 : index
    %2000 = arith.index_cast %1999 : i32 to index
    %2001 = memref.load %arg3[%c1_742, %2000] : memref<2x168xf32, #tpu.memory_space<smem>>
    %c8_i32_743 = arith.constant 8 : i32
    %2002 = arith.addi %1977, %c8_i32_743 : i32
    %c1_744 = arith.constant 1 : index
    %2003 = arith.index_cast %2002 : i32 to index
    %2004 = memref.load %arg3[%c1_744, %2003] : memref<2x168xf32, #tpu.memory_space<smem>>
    %c9_i32_745 = arith.constant 9 : i32
    %2005 = arith.addi %1977, %c9_i32_745 : i32
    %c1_746 = arith.constant 1 : index
    %2006 = arith.index_cast %2005 : i32 to index
    %2007 = memref.load %arg3[%c1_746, %2006] : memref<2x168xf32, #tpu.memory_space<smem>>
    %c10_i32_747 = arith.constant 10 : i32
    %2008 = arith.addi %1977, %c10_i32_747 : i32
    %c1_748 = arith.constant 1 : index
    %2009 = arith.index_cast %2008 : i32 to index
    %2010 = memref.load %arg3[%c1_748, %2009] : memref<2x168xf32, #tpu.memory_space<smem>>
    %c11_i32_749 = arith.constant 11 : i32
    %2011 = arith.addi %1977, %c11_i32_749 : i32
    %c1_750 = arith.constant 1 : index
    %2012 = arith.index_cast %2011 : i32 to index
    %2013 = memref.load %arg3[%c1_750, %2012] : memref<2x168xf32, #tpu.memory_space<smem>>
    %c12_i32_751 = arith.constant 12 : i32
    %2014 = arith.addi %1977, %c12_i32_751 : i32
    %c1_752 = arith.constant 1 : index
    %2015 = arith.index_cast %2014 : i32 to index
    %2016 = memref.load %arg3[%c1_752, %2015] : memref<2x168xf32, #tpu.memory_space<smem>>
    %c13_i32_753 = arith.constant 13 : i32
    %2017 = arith.addi %1977, %c13_i32_753 : i32
    %c1_754 = arith.constant 1 : index
    %2018 = arith.index_cast %2017 : i32 to index
    %2019 = memref.load %arg3[%c1_754, %2018] : memref<2x168xf32, #tpu.memory_space<smem>>
    %c14_i32_755 = arith.constant 14 : i32
    %2020 = arith.addi %1977, %c14_i32_755 : i32
    %c1_756 = arith.constant 1 : index
    %2021 = arith.index_cast %2020 : i32 to index
    %2022 = memref.load %arg3[%c1_756, %2021] : memref<2x168xf32, #tpu.memory_space<smem>>
    %c15_i32_757 = arith.constant 15 : i32
    %2023 = arith.addi %1977, %c15_i32_757 : i32
    %c1_758 = arith.constant 1 : index
    %2024 = arith.index_cast %2023 : i32 to index
    %2025 = memref.load %arg3[%c1_758, %2024] : memref<2x168xf32, #tpu.memory_space<smem>>
    %c16_i32_759 = arith.constant 16 : i32
    %2026 = arith.addi %1977, %c16_i32_759 : i32
    %c1_760 = arith.constant 1 : index
    %2027 = arith.index_cast %2026 : i32 to index
    %2028 = memref.load %arg3[%c1_760, %2027] : memref<2x168xf32, #tpu.memory_space<smem>>
    %c17_i32_761 = arith.constant 17 : i32
    %2029 = arith.addi %1977, %c17_i32_761 : i32
    %c1_762 = arith.constant 1 : index
    %2030 = arith.index_cast %2029 : i32 to index
    %2031 = memref.load %arg3[%c1_762, %2030] : memref<2x168xf32, #tpu.memory_space<smem>>
    %c18_i32_763 = arith.constant 18 : i32
    %2032 = arith.addi %1977, %c18_i32_763 : i32
    %c1_764 = arith.constant 1 : index
    %2033 = arith.index_cast %2032 : i32 to index
    %2034 = memref.load %arg3[%c1_764, %2033] : memref<2x168xf32, #tpu.memory_space<smem>>
    %c19_i32_765 = arith.constant 19 : i32
    %2035 = arith.addi %1977, %c19_i32_765 : i32
    %c1_766 = arith.constant 1 : index
    %2036 = arith.index_cast %2035 : i32 to index
    %2037 = memref.load %arg3[%c1_766, %2036] : memref<2x168xf32, #tpu.memory_space<smem>>
    %c20_i32_767 = arith.constant 20 : i32
    %2038 = arith.addi %1977, %c20_i32_767 : i32
    %c1_768 = arith.constant 1 : index
    %2039 = arith.index_cast %2038 : i32 to index
    %2040 = memref.load %arg3[%c1_768, %2039] : memref<2x168xf32, #tpu.memory_space<smem>>
    %2041 = vector.broadcast %1980 : f32 to vector<8x128xf32>
    %2042 = arith.mulf %2041, %0 : vector<8x128xf32>
    %2043 = vector.broadcast %1983 : f32 to vector<8x128xf32>
    %2044 = arith.mulf %2043, %1 : vector<8x128xf32>
    %2045 = arith.addf %2042, %2044 : vector<8x128xf32>
    %2046 = vector.broadcast %1986 : f32 to vector<8x128xf32>
    %2047 = arith.addf %2045, %2046 : vector<8x128xf32>
    %2048 = vector.broadcast %1989 : f32 to vector<8x128xf32>
    %2049 = arith.mulf %2048, %0 : vector<8x128xf32>
    %2050 = vector.broadcast %1992 : f32 to vector<8x128xf32>
    %2051 = arith.mulf %2050, %1 : vector<8x128xf32>
    %2052 = arith.addf %2049, %2051 : vector<8x128xf32>
    %2053 = vector.broadcast %1995 : f32 to vector<8x128xf32>
    %2054 = arith.addf %2052, %2053 : vector<8x128xf32>
    %2055 = vector.broadcast %1998 : f32 to vector<8x128xf32>
    %2056 = arith.mulf %2055, %0 : vector<8x128xf32>
    %2057 = vector.broadcast %2001 : f32 to vector<8x128xf32>
    %2058 = arith.mulf %2057, %1 : vector<8x128xf32>
    %2059 = arith.addf %2056, %2058 : vector<8x128xf32>
    %2060 = vector.broadcast %2004 : f32 to vector<8x128xf32>
    %2061 = arith.addf %2059, %2060 : vector<8x128xf32>
    %2062 = vector.broadcast %2007 : f32 to vector<8x128xf32>
    %2063 = arith.mulf %2062, %0 : vector<8x128xf32>
    %2064 = vector.broadcast %2010 : f32 to vector<8x128xf32>
    %2065 = arith.mulf %2064, %1 : vector<8x128xf32>
    %2066 = arith.addf %2063, %2065 : vector<8x128xf32>
    %2067 = vector.broadcast %2013 : f32 to vector<8x128xf32>
    %2068 = arith.addf %2066, %2067 : vector<8x128xf32>
    %cst_769 = arith.constant 0.000000e+00 : f32
    %2069 = vector.broadcast %cst_769 : f32 to vector<8x128xf32>
    %2070 = arith.cmpf ogt, %2047, %2069 : vector<8x128xf32>
    %cst_770 = arith.constant 0.000000e+00 : f32
    %2071 = vector.broadcast %cst_770 : f32 to vector<8x128xf32>
    %2072 = arith.cmpf ogt, %2054, %2071 : vector<8x128xf32>
    %2073 = arith.andi %2070, %2072 : vector<8x128xi1>
    %cst_771 = arith.constant 0.000000e+00 : f32
    %2074 = vector.broadcast %cst_771 : f32 to vector<8x128xf32>
    %2075 = arith.cmpf ogt, %2061, %2074 : vector<8x128xf32>
    %2076 = arith.andi %2073, %2075 : vector<8x128xi1>
    %cst_772 = arith.constant 0.000000e+00 : f32
    %2077 = vector.broadcast %cst_772 : f32 to vector<8x128xf32>
    %2078 = arith.cmpf oge, %2068, %2077 : vector<8x128xf32>
    %2079 = arith.andi %2076, %2078 : vector<8x128xi1>
    %2080 = arith.cmpf olt, %2068, %1973 : vector<8x128xf32>
    %2081 = arith.andi %2079, %2080 : vector<8x128xi1>
    %2082 = vector.broadcast %2016 : f32 to vector<8x128xf32>
    %2083 = arith.mulf %2082, %0 : vector<8x128xf32>
    %2084 = vector.broadcast %2019 : f32 to vector<8x128xf32>
    %2085 = arith.mulf %2084, %1 : vector<8x128xf32>
    %2086 = arith.addf %2083, %2085 : vector<8x128xf32>
    %2087 = vector.broadcast %2022 : f32 to vector<8x128xf32>
    %2088 = arith.addf %2086, %2087 : vector<8x128xf32>
    %2089 = vector.broadcast %2025 : f32 to vector<8x128xf32>
    %2090 = arith.mulf %2089, %0 : vector<8x128xf32>
    %2091 = vector.broadcast %2028 : f32 to vector<8x128xf32>
    %2092 = arith.mulf %2091, %1 : vector<8x128xf32>
    %2093 = arith.addf %2090, %2092 : vector<8x128xf32>
    %2094 = vector.broadcast %2031 : f32 to vector<8x128xf32>
    %2095 = arith.addf %2093, %2094 : vector<8x128xf32>
    %2096 = vector.broadcast %2034 : f32 to vector<8x128xf32>
    %2097 = arith.mulf %2096, %0 : vector<8x128xf32>
    %2098 = vector.broadcast %2037 : f32 to vector<8x128xf32>
    %2099 = arith.mulf %2098, %1 : vector<8x128xf32>
    %2100 = arith.addf %2097, %2099 : vector<8x128xf32>
    %2101 = vector.broadcast %2040 : f32 to vector<8x128xf32>
    %2102 = arith.addf %2100, %2101 : vector<8x128xf32>
    %2103 = arith.select %2081, %2068, %1973 : vector<8x128xi1>, vector<8x128xf32>
    %2104 = arith.select %2081, %2088, %1974 : vector<8x128xi1>, vector<8x128xf32>
    %2105 = arith.select %2081, %2095, %1975 : vector<8x128xi1>, vector<8x128xf32>
    %2106 = arith.select %2081, %2102, %1976 : vector<8x128xi1>, vector<8x128xf32>
    %c8_i32_773 = arith.constant 8 : i32
    %cst_774 = arith.constant 1.000000e+30 : f32
    %2107 = vector.broadcast %cst_774 : f32 to vector<8x128xf32>
    %2108 = arith.cmpf olt, %2103, %2107 : vector<8x128xf32>
    %cst_775 = arith.constant 1.000000e+00 : f32
    %cst_776 = arith.constant 0.000000e+00 : f32
    %2109 = vector.broadcast %cst_775 : f32 to vector<8x128xf32>
    %2110 = vector.broadcast %cst_776 : f32 to vector<8x128xf32>
    %2111 = arith.select %2108, %2109, %2110 : vector<8x128xi1>, vector<8x128xf32>
    %c1_777 = arith.constant 1 : index
    %c0_778 = arith.constant 0 : index
    %c0_779 = arith.constant 0 : index
    %c0_780 = arith.constant 0 : index
    %2112 = vector.load %arg4[%c1_777, %c0_778, %c0_779, %c0_780] : memref<2x4x8x128xf32, #tpu.memory_space<vmem>>, vector<1x1x8x128xf32>
    %2113 = vector.shape_cast %2112 : vector<1x1x8x128xf32> to vector<8x128xf32>
    %2114 = vector.shape_cast %2104 : vector<8x128xf32> to vector<1x1x8x128xf32>
    tpu.vector_store %arg4[%c1_777, %c0_778, %c0_779, %c0_780], %2114 {strides = array<i32>} : memref<2x4x8x128xf32, #tpu.memory_space<vmem>>, vector<1x1x8x128xf32>,
    %c1_781 = arith.constant 1 : index
    %c1_782 = arith.constant 1 : index
    %c0_783 = arith.constant 0 : index
    %c0_784 = arith.constant 0 : index
    %2115 = vector.load %arg4[%c1_781, %c1_782, %c0_783, %c0_784] : memref<2x4x8x128xf32, #tpu.memory_space<vmem>>, vector<1x1x8x128xf32>
    %2116 = vector.shape_cast %2115 : vector<1x1x8x128xf32> to vector<8x128xf32>
    %2117 = vector.shape_cast %2105 : vector<8x128xf32> to vector<1x1x8x128xf32>
    tpu.vector_store %arg4[%c1_781, %c1_782, %c0_783, %c0_784], %2117 {strides = array<i32>} : memref<2x4x8x128xf32, #tpu.memory_space<vmem>>, vector<1x1x8x128xf32>,
    %c1_785 = arith.constant 1 : index
    %c2_786 = arith.constant 2 : index
    %c0_787 = arith.constant 0 : index
    %c0_788 = arith.constant 0 : index
    %2118 = vector.load %arg4[%c1_785, %c2_786, %c0_787, %c0_788] : memref<2x4x8x128xf32, #tpu.memory_space<vmem>>, vector<1x1x8x128xf32>
    %2119 = vector.shape_cast %2118 : vector<1x1x8x128xf32> to vector<8x128xf32>
    %2120 = vector.shape_cast %2106 : vector<8x128xf32> to vector<1x1x8x128xf32>
    tpu.vector_store %arg4[%c1_785, %c2_786, %c0_787, %c0_788], %2120 {strides = array<i32>} : memref<2x4x8x128xf32, #tpu.memory_space<vmem>>, vector<1x1x8x128xf32>,
    %c1_789 = arith.constant 1 : index
    %c3_790 = arith.constant 3 : index
    %c0_791 = arith.constant 0 : index
    %c0_792 = arith.constant 0 : index
    %2121 = vector.load %arg4[%c1_789, %c3_790, %c0_791, %c0_792] : memref<2x4x8x128xf32, #tpu.memory_space<vmem>>, vector<1x1x8x128xf32>
    %2122 = vector.shape_cast %2121 : vector<1x1x8x128xf32> to vector<8x128xf32>
    %2123 = vector.shape_cast %2111 : vector<8x128xf32> to vector<1x1x8x128xf32>
    tpu.vector_store %arg4[%c1_789, %c3_790, %c0_791, %c0_792], %2123 {strides = array<i32>} : memref<2x4x8x128xf32, #tpu.memory_space<vmem>>, vector<1x1x8x128xf32>,
    return
  }
  func.func @transform_0(%arg0: i32) -> (i32, i32) {
    %c0_i32 = arith.constant 0 : i32
    %c0_i32_0 = arith.constant 0 : i32
    %c0_i32_1 = arith.constant 0 : i32
    return %c0_i32, %c0_i32_0 : i32, i32
  }
  func.func @transform_1(%arg0: i32) -> (i32, i32) {
    %c0_i32 = arith.constant 0 : i32
    %c0_i32_0 = arith.constant 0 : i32
    %c0_i32_1 = arith.constant 0 : i32
    return %c0_i32, %c0_i32_0 : i32, i32
  }
  func.func @transform_2(%arg0: i32) -> (i32, i32) {
    %c0_i32 = arith.constant 0 : i32
    %c0_i32_0 = arith.constant 0 : i32
    return %arg0, %c0_i32 : i32, i32
  }
  func.func @transform_3(%arg0: i32) -> (i32, i32, i32, i32) {
    %c0_i32 = arith.constant 0 : i32
    %c0_i32_0 = arith.constant 0 : i32
    %c0_i32_1 = arith.constant 0 : i32
    %c0_i32_2 = arith.constant 0 : i32
    return %arg0, %c0_i32, %c0_i32_0, %c0_i32_1 : i32, i32, i32, i32
  }
}

</mosaic_0001>

<bundles_post_ra>
// kernel: tpu_custom_call.1
= control target key start
LH: loop header
LB: loop body
LE: loop exit
PB: predicated region body
PF: predicated region fallthrough
CT: control target
= control target key end

     0   :  { %8 = vsyncpa [#allocation3], 0  ;;  %s3620_s0 = inlined_call_operand.hbm [shape: f32[8,128], index: 0, kind: input, shape index: {}]   ;;  %s3621_s1 = inlined_call_operand.hbm [shape: f32[8,128], index: 1, kind: input, shape index: {}]   ;;  %s3622_s2 = inlined_call_operand.vmem [shape: f32[2,168], index: 2, kind: input, shape index: {}]   ;;  %s3623_s3 = inlined_call_operand.hbm [shape: f32[2,4,8,128], index: 3, kind: output, shape index: {}]  }
   0x1   :  { %9 = vsyncpa [#allocation7], 0 }
   0x2   :  { %10 = vsyncpa [#allocation5], 0 }
   0x3   :  { %11 = vsyncpa [#allocation4], 0  ;;  %s1852_s12 = smov [#allocation2]   ;;  %s1853_s14 = smov [#allocation6]  }
   0x4   :  { %s18_s13 = sshll.u32 %s1852_s12, 4  ;;  %s28_s15 = sshll.u32 %s1853_s14, 4  ;;  %s19_s13 = int_to_ptr.vmem [resolvable:$true] %s18_s13  ;;  %s29_s15 = int_to_ptr.vmem [resolvable:$true] %s28_s15 }
   0x5   :  { %s1766_s18 = scalar_lea.hbm %s3620_s0, 128 }
   0x6   :  { %p1767_p0 = scmp.ne.s32.totalorder %s3620_s0, %s1766_s18  ;;  %p1770_p1 = scmp.lt.u32.totalorder %s1766_s18, %s3620_s0 }
   0x8   :  { %p1772_p2 = pnand %p1770_p1, %p1767_p0 }
   0xa   :  { %1775 = shalt.err (!%p1772_p2)
}
   0xb   :  { %s1776_s23 = scalar_lea.vmem %s19_s13, 128  ;;  %p1781_p4 = scmp.lt.s32.totalorder %s19_s13, %s19_s13 }
   0xc   :  { %p1777_p3 = scmp.ne.s32.totalorder %s19_s13, %s1776_s23  ;;  %p1782_p5 = scmp.lt.s32.totalorder %s1776_s23, %s1776_s23 }
   0xe   :  { %p1783_p6 = por %p1782_p5, %p1781_p4 }
  0x10   :  { %p1784_p7 = pnand %p1783_p6, %p1777_p3 }
  0x12   :  { %1787 = shalt.err (!%p1784_p7)
}
  0x13   :  { %21 = dma.hbm_to_vmem [thread:$0]  %s3620_s0, 128, %s19_s13, [#allocation3]  }
  0x14   :  { %s1788_s28 = scalar_lea.hbm %s3621_s1, 128 }
  0x15   :  { %p1789_p8 = scmp.ne.s32.totalorder %s3621_s1, %s1788_s28  ;;  %p1792_p9 = scmp.lt.u32.totalorder %s1788_s28, %s3621_s1 }
  0x17   :  { %p1794_p10 = pnand %p1792_p9, %p1789_p8 }
  0x19   :  { %1797 = shalt.err (!%p1794_p10)
}
  0x1a   :  { %s1798_s6 = scalar_lea.vmem %s29_s15, 128  ;;  %p1803_p12 = scmp.lt.s32.totalorder %s29_s15, %s29_s15 }
  0x1b   :  { %p1799_p11 = scmp.ne.s32.totalorder %s29_s15, %s1798_s6  ;;  %p1804_p13 = scmp.lt.s32.totalorder %s1798_s6, %s1798_s6 }
  0x1d   :  { %p1805_p0 = por %p1804_p13, %p1803_p12 }
  0x1f   :  { %p1806_p1 = pnand %p1805_p0, %p1799_p11 }
  0x21   :  { %1809 = shalt.err (!%p1806_p1)
}
  0x22   :  { %31 = dma.hbm_to_vmem [thread:$0]  %s3621_s1, 128, %s29_s15, [#allocation7]  }
  0x23   :  { %s38_s10 = sshll.u32 %s3622_s2, 4  ;;  %s39_s10 = int_to_ptr.vmem [resolvable:$true] %s38_s10 }
  0x24   :  { %s1810_s11 = scalar_lea.vmem %s39_s10, 64  ;;  %p1815_p3 = scmp.lt.s32.totalorder %s39_s10, %s39_s10 }
  0x25   :  { %p1811_p2 = scmp.ne.s32.totalorder %s39_s10, %s1810_s11  ;;  %p1816_p4 = scmp.lt.s32.totalorder %s1810_s11, %s1810_s11 }
  0x27   :  { %p1817_p5 = por %p1816_p4, %p1815_p3 }
  0x29   :  { %p1818_p6 = pnand %p1817_p5, %p1811_p2 }
  0x2b   :  { %1821 = shalt.err (!%p1818_p6)
}
  0x2c   :  { %s1854_s12 = smov [#allocation8]  }
  0x2d   :  { %41 = dma.vmem_to_smem %s39_s10, 64, %s1854_s12, [#allocation5]  }
  0x2e   :  { %1844 = dma.done.wait [#allocation3], 128  }
  0x2f   :  { %1845 = vsyncadd [#allocation3], 4294967168 }
  0x30   :  { %1846 = dma.done.wait [#allocation7], 128  }
  0x31   :  { %1847 = vsyncadd [#allocation7], 4294967168 }
  0x32   :  { %1848 = dma.done.wait [#allocation5], 64  }
  0x33   :  { %1849 = vsyncadd [#allocation5], 4294967232 }
  0x34   :  { %51 = sfence }
  0x35   :  { %s54_s1 = sld [smem:[#allocation8]]  ;;  %s1420_s13 = sld [smem:[#allocation8 + $0x1]]  ;;  %v1910_v0 = vld [vmem:[#allocation2] sm:$0xff]  ;;  %v1912_v1 = vld [vmem:[#allocation6] sm:$0xff] }
  0x36   :  { %s1906_s2 = sld [smem:[#allocation8 + $0x2]]  ;;  %s1422_s14 = sld [smem:[#allocation8 + $0x3]] }
  0x37   :  { %s1423_s15 = sld [smem:[#allocation8 + $0x4]]  ;;  %s1908_s16 = sld [smem:[#allocation8 + $0x5]] }
  0x38   :  { %s1425_s17 = sld [smem:[#allocation8 + $0x6]]  ;;  %s1426_s18 = sld [smem:[#allocation8 + $0x7]] }
  0x39   :  { %s1914_s19 = sld [smem:[#allocation8 + $0x8]]  ;;  %s1916_s20 = sld [smem:[#allocation8 + $0x9]] }
  0x3a   :  { %s1918_s21 = sld [smem:[#allocation8 + $0xa]]  ;;  %s1920_s22 = sld [smem:[#allocation8 + $0xb]] }
  0x3b   :  { %s1922_s23 = sld [smem:[#allocation8 + $0xc]]  ;;  %s1924_s24 = sld [smem:[#allocation8 + $0xd]]  ;;  %v75_v2 = vstv %s54_s1  ;;  %v77_v3 = vstv %s1420_s13 }
  0x3c   :  { %s1926_s25 = sld [smem:[#allocation8 + $0xe]]  ;;  %s1928_s26 = sld [smem:[#allocation8 + $0xf]]  ;;  %v76_v4 = vmul.f32 %v75_v2, %v1910_v0  ;;  %v78_v5 = vmul.f32 %v77_v3, %v1912_v1  ;;  %v82_v6 = vstv %s1422_s14  ;;  %v80_v7 = vstv %s1906_s2 }
  0x3d   :  { %s1932_s27 = sld [smem:[#allocation8 + $0x10]]  ;;  %s1934_s28 = sld [smem:[#allocation8 + $0x11]]  ;;  %v83_v8 = vmul.f32 %v82_v6, %v1910_v0  ;;  %v84_v9 = vstv %s1423_s15  ;;  %v87_v10 = vstv %s1908_s16 }
  0x3e   :  { %s1939_s29 = sld [smem:[#allocation8 + $0x12]]  ;;  %s1941_s30 = sld [smem:[#allocation8 + $0x13]]  ;;  %v79_v11 = vadd.f32 %v78_v5, %v76_v4  ;;  %v85_v12 = vmul.f32 %v84_v9, %v1912_v1  ;;  %v89_v13 = vstv %s1425_s17  ;;  %v91_v14 = vstv %s1426_s18 }
  0x3f   :  { %s1944_s4 = sld [smem:[#allocation8 + $0x14]]  ;;  %v90_v15 = vmul.f32 %v89_v13, %v1910_v0  ;;  %v92_v16 = vmul.f32 %v91_v14, %v1912_v1  ;;  %v94_v17 = vstv %s1914_s19  ;;  %v96_v18 = vstv %s1916_s20  ;;  %s1952_s5 = sld [smem:[#allocation8 + $0x15]] }
  0x40   :  { %v81_v19 = vadd.f32 %v80_v7, %v79_v11  ;;  %v86_v20 = vadd.f32 %v85_v12, %v83_v8  ;;  %v97_v21 = vmul.f32 %v96_v18, %v1910_v0  ;;  %v98_v22 = vstv %s1918_s21  ;;  %s1954_s6 = sld [smem:[#allocation8 + $0x16]]  ;;  %s1959_s0 = sld [smem:[#allocation8 + $0x17]] }
  0x41   :  { %v93_v23 = vadd.f32 %v92_v16, %v90_v15  ;;  %v99_v24 = vmul.f32 %v98_v22, %v1912_v1  ;;  %v101_v25 = vstv %s1920_s22  ;;  %v112_v26 = vstv %s1922_s23  ;;  %s1961_s7 = sld [smem:[#allocation8 + $0x18]]  ;;  %s1967_s8 = sld [smem:[#allocation8 + $0x19]] }
  0x42   :  { %v88_v27 = vadd.f32 %v87_v10, %v86_v20  ;;  %vm103_vm0 = vcmp.gt.f32.partialorder %v81_v19, 0.0  ;;  %v113_v28 = vmul.f32 %v112_v26, %v1910_v0  ;;  %v114_v29 = vstv %s1924_s24  ;;  %s1969_s9 = sld [smem:[#allocation8 + $0x1a]]  ;;  %s1974_s10 = sld [smem:[#allocation8 + $0x1b]] }
  0x43   :  { %v95_v30 = vadd.f32 %v94_v17, %v93_v23  ;;  %v100_v31 = vadd.f32 %v99_v24, %v97_v21  ;;  %v115_v32 = vmul.f32 %v114_v29, %v1912_v1  ;;  %v117_v33 = vstv %s1926_s25  ;;  %s1978_s11 = sld [smem:[#allocation8 + $0x1c]]  ;;  %s1980_s12 = sld [smem:[#allocation8 + $0x1d]] }
  0x44   :  { %vm104_vm1 = vcmp.gt.f32.partialorder %v88_v27, 0.0  ;;  %v119_v34 = vstv %s1928_s26  ;;  %v121_v35 = vstv %s1932_s27  ;;  %v124_v36 = vstv %s1934_s28  ;;  %s1986_s1 = sld [smem:[#allocation8 + $0x1e]]  ;;  %s1988_s13 = sld [smem:[#allocation8 + $0x1f]] }
  0x45   :  { %v102_v37 = vadd.f32 %v101_v25, %v100_v31  ;;  %vm105_vm2 = vmand %vm103_vm0, %vm104_vm1  ;;  %vm106_vm3 = vcmp.gt.f32.partialorder %v95_v30, 0.0  ;;  %v116_v38 = vadd.f32 %v115_v32, %v113_v28  ;;  %v120_v39 = vmul.f32 %v119_v34, %v1910_v0  ;;  %s1993_s2 = sld [smem:[#allocation8 + $0x20]]  ;;  %s1996_s14 = sld [smem:[#allocation8 + $0x21]] }
  0x46   :  { %vm107_vm4 = vmand %vm105_vm2, %vm106_vm3  ;;  %v122_v40 = vmul.f32 %v121_v35, %v1912_v1  ;;  %v126_v41 = vstv %s1939_s29  ;;  %v128_v42 = vstv %s1941_s30  ;;  %v131_v43 = vstv %s1944_s4  ;;  %s1998_s15 = sld [smem:[#allocation8 + $0x22]]  ;;  %s2006_s16 = sld [smem:[#allocation8 + $0x23]] }
  0x47   :  { %vm108_vm5 = vcmp.ge.f32.partialorder %v102_v37, 0.0  ;;  %vm110_vm6 = vcmp.lt.f32.partialorder %v102_v37, 1e+30  ;;  %v1990_v44 = vadd.f32 %v117_v33, %v116_v38  ;;  %v127_v45 = vmul.f32 %v126_v41, %v1910_v0  ;;  %s2008_s17 = sld [smem:[#allocation8 + $0x24]]  ;;  %s2023_s18 = sld [smem:[#allocation8 + $0x25]] }
  0x48   :  { %vm109_vm7 = vmand %vm107_vm4, %vm108_vm5  ;;  %v123_v46 = vadd.f32 %v122_v40, %v120_v39  ;;  %v129_v47 = vmul.f32 %v128_v42, %v1912_v1  ;;  %v158_v48 = vstv %s1952_s5  ;;  %v160_v49 = vstv %s1954_s6  ;;  %s2025_s19 = sld [smem:[#allocation8 + $0x26]]  ;;  %s2027_s20 = sld [smem:[#allocation8 + $0x27]] }
  0x49   :  { %vm2002_vm8 = vmand %vm109_vm7, %vm110_vm6  ;;  %v159_v51 = vmul.f32 %v158_v48, %v1910_v0  ;;  %v161_v52 = vmul.f32 %v160_v49, %v1912_v1  ;;  %v163_v53 = vstv %s1959_s0  ;;  %v165_v54 = vstv %s1961_s7  ;;  %s2037_s21 = sld [smem:[#allocation8 + $0x28]]  ;;  %s2041_s22 = sld [smem:[#allocation8 + $0x29]] }
  0x4a   :  { %v2014_v55 = vadd.f32 %v124_v36, %v123_v46  ;;  %v130_v56 = vadd.f32 %v129_v47, %v127_v45  ;;  %v2018_v57 = vsel %vm2002_vm8, %v102_v37, 1e+30  ;;  %v134_v58 = vsel %vm2002_vm8, %v1990_v44, 1.0  ;;  %s2046_s23 = sld [smem:[#allocation8 + $0x2a]]  ;;  %s2056_s24 = sld [smem:[#allocation8 + $0x2b]] }
  0x4b   :  { %v162_v59 = vadd.f32 %v161_v52, %v159_v51  ;;  %v166_v60 = vmul.f32 %v165_v54, %v1910_v0  ;;  %v167_v61 = vstv %s1967_s8  ;;  %v170_v62 = vstv %s1969_s9  ;;  %s2058_s25 = sld [smem:[#allocation8 + $0x2c]]  ;;  %s2062_s26 = sld [smem:[#allocation8 + $0x2d]] }
  0x4c   :  { %v2032_v63 = vadd.f32 %v131_v43, %v130_v56  ;;  %v135_v2 = vsel %vm2002_vm8, %v2014_v55, 1.0  ;;  %v168_v3 = vmul.f32 %v167_v61, %v1912_v1  ;;  %v172_v4 = vstv %s1974_s10  ;;  %s2064_s27 = sld [smem:[#allocation8 + $0x2e]]  ;;  %s2071_s28 = sld [smem:[#allocation8 + $0x2f]] }
  0x4d   :  { %v164_v5 = vadd.f32 %v163_v53, %v162_v59  ;;  %v173_v6 = vmul.f32 %v172_v4, %v1910_v0  ;;  %v174_v7 = vstv %s1978_s11  ;;  %v177_v8 = vstv %s1980_s12  ;;  %s2073_s29 = sld [smem:[#allocation8 + $0x30]]  ;;  %s2080_s30 = sld [smem:[#allocation8 + $0x31]] }
  0x4e   :  { %v136_v9 = vsel %vm2002_vm8, %v2032_v63, 1.0  ;;  %v169_v10 = vadd.f32 %v168_v3, %v166_v60  ;;  %v175_v11 = vmul.f32 %v174_v7, %v1912_v1  ;;  %v179_v12 = vstv %s1986_s1  ;;  %s2082_s4 = sld [smem:[#allocation8 + $0x32]]  ;;  %s2085_s5 = sld [smem:[#allocation8 + $0x33]] }
  0x4f   :  { %v180_v13 = vmul.f32 %v179_v12, %v1910_v0  ;;  %v181_v14 = vstv %s1988_s13  ;;  %v184_v15 = vstv %s1993_s2  ;;  %vm186_vm9 = vcmp.gt.f32.partialorder %v164_v5, 0.0  ;;  %s2090_s6 = sld [smem:[#allocation8 + $0x34]]  ;;  %s2092_s0 = sld [smem:[#allocation8 + $0x35]] }
  0x50   :  { %v171_v16 = vadd.f32 %v170_v62, %v169_v10  ;;  %v176_v17 = vadd.f32 %v175_v11, %v173_v6  ;;  %v182_v18 = vmul.f32 %v181_v14, %v1912_v1  ;;  %v195_v19 = vstv %s1996_s14  ;;  %s2096_s7 = sld [smem:[#allocation8 + $0x36]]  ;;  %s2099_s8 = sld [smem:[#allocation8 + $0x37]] }
  0x51   :  { %v196_v20 = vmul.f32 %v195_v19, %v1910_v0  ;;  %v197_v21 = vstv %s1998_s15  ;;  %v200_v22 = vstv %s2006_s16  ;;  %v202_v23 = vstv %s2008_s17  ;;  %s2101_s9 = sld [smem:[#allocation8 + $0x38]]  ;;  %s2110_s10 = sld [smem:[#allocation8 + $0x39]] }
  0x52   :  { %v178_v24 = vadd.f32 %v177_v8, %v176_v17  ;;  %v183_v25 = vadd.f32 %v182_v18, %v180_v13  ;;  %vm187_vm10 = vcmp.gt.f32.partialorder %v171_v16, 0.0  ;;  %v198_v26 = vmul.f32 %v197_v21, %v1912_v1  ;;  %s2128_s11 = sld [smem:[#allocation8 + $0x3a]]  ;;  %s2130_s12 = sld [smem:[#allocation8 + $0x3b]] }
  0x53   :  { %vm188_vm11 = vmand %vm186_vm9, %vm187_vm10  ;;  %v203_v27 = vmul.f32 %v202_v23, %v1910_v0  ;;  %v204_v28 = vstv %s2023_s18  ;;  %v207_v29 = vstv %s2025_s19  ;;  %v209_v30 = vstv %s2027_s20  ;;  %s2141_s1 = sld [smem:[#allocation8 + $0x3c]]  ;;  %s2145_s13 = sld [smem:[#allocation8 + $0x3d]] }
  0x54   :  { %v185_v31 = vadd.f32 %v184_v15, %v183_v25  ;;  %vm189_vm12 = vcmp.gt.f32.partialorder %v178_v24, 0.0  ;;  %v199_v32 = vadd.f32 %v198_v26, %v196_v20  ;;  %v205_v33 = vmul.f32 %v204_v28, %v1912_v1  ;;  %s2147_s2 = sld [smem:[#allocation8 + $0x3e]]  ;;  %s2165_s14 = sld [smem:[#allocation8 + $0x3f]] }
  0x55   :  { %vm190_vm13 = vmand %vm188_vm11, %vm189_vm12  ;;  %v210_v34 = vmul.f32 %v209_v30, %v1910_v0  ;;  %v211_v35 = vstv %s2037_s21  ;;  %v214_v36 = vstv %s2041_s22  ;;  %v241_v37 = vstv %s2046_s23  ;;  %s2167_s15 = sld [smem:[#allocation8 + $0x40]]  ;;  %s2171_s16 = sld [smem:[#allocation8 + $0x41]] }
  0x56   :  { %vm191_vm14 = vcmp.ge.f32.partialorder %v185_v31, 0.0  ;;  %vm193_vm15 = vcmp.lt.f32.partialorder %v185_v31, %v2018_v57  ;;  %v201_v38 = vadd.f32 %v200_v22, %v199_v32  ;;  %v206_v39 = vadd.f32 %v205_v33, %v203_v27  ;;  %s2176_s17 = sld [smem:[#allocation8 + $0x42]]  ;;  %s2179_s18 = sld [smem:[#allocation8 + $0x43]] }
  0x57   :  { %vm192_vm0 = vmand %vm190_vm13, %vm191_vm14  ;;  %v212_v40 = vmul.f32 %v211_v35, %v1912_v1  ;;  %v242_v41 = vmul.f32 %v241_v37, %v1910_v0  ;;  %v243_v42 = vstv %s2056_s24  ;;  %v246_v43 = vstv %s2058_s25  ;;  %s2185_s19 = sld [smem:[#allocation8 + $0x44]]  ;;  %s2187_s20 = sld [smem:[#allocation8 + $0x45]] }
  0x58   :  { %vm2106_vm1 = vmand %vm192_vm0, %vm193_vm15  ;;  %v208_v46 = vadd.f32 %v207_v29, %v206_v39  ;;  %v244_v47 = vmul.f32 %v243_v42, %v1912_v1  ;;  %v248_v48 = vstv %s2062_s26  ;;  %v250_v49 = vstv %s2064_s27  ;;  %s2191_s21 = sld [smem:[#allocation8 + $0x46]]  ;;  %s2193_s22 = sld [smem:[#allocation8 + $0x47]] }
  0x59   :  { %v213_v51 = vadd.f32 %v212_v40, %v210_v34  ;;  %v2118_v52 = vsel %vm2106_vm1, %v185_v31, %v2018_v57  ;;  %v2126_v53 = vsel %vm2106_vm1, %v201_v38, %v134_v58  ;;  %v249_v54 = vmul.f32 %v248_v48, %v1910_v0  ;;  %s2198_s23 = sld [smem:[#allocation8 + $0x48]]  ;;  %s2202_s24 = sld [smem:[#allocation8 + $0x49]] }
  0x5a   :  { %v2139_v56 = vsel %vm2106_vm1, %v208_v46, %v135_v2  ;;  %v245_v44 = vadd.f32 %v244_v47, %v242_v41  ;;  %v251_v57 = vmul.f32 %v250_v49, %v1912_v1  ;;  %v253_v58 = vstv %s2071_s28  ;;  %s2204_s25 = sld [smem:[#allocation8 + $0x4a]]  ;;  %s2209_s26 = sld [smem:[#allocation8 + $0x4b]] }
  0x5b   :  { %v215_v59 = vadd.f32 %v214_v36, %v213_v51  ;;  %v255_v60 = vstv %s2073_s29  ;;  %v257_v55 = vstv %s2080_s30  ;;  %v260_v61 = vstv %s2082_s4  ;;  %s2211_s27 = sld [smem:[#allocation8 + $0x4c]]  ;;  %s2221_s28 = sld [smem:[#allocation8 + $0x4d]] }
  0x5c   :  { %v247_v62 = vadd.f32 %v246_v43, %v245_v44  ;;  %v252_v2 = vadd.f32 %v251_v57, %v249_v54  ;;  %v256_v3 = vmul.f32 %v255_v60, %v1910_v0  ;;  %v258_v4 = vmul.f32 %v257_v55, %v1912_v1  ;;  %s2223_s29 = sld [smem:[#allocation8 + $0x4e]]  ;;  %s2237_s30 = sld [smem:[#allocation8 + $0x4f]] }
  0x5d   :  { %v2160_v5 = vsel %vm2106_vm1, %v215_v59, %v136_v9  ;;  %v262_v6 = vstv %s2085_s5  ;;  %v264_v7 = vstv %s2090_s6  ;;  %v267_v8 = vstv %s2092_s0  ;;  %s2244_s4 = sld [smem:[#allocation8 + $0x50]]  ;;  %s2246_s5 = sld [smem:[#allocation8 + $0x51]] }
  0x5e   :  { %v254_v10 = vadd.f32 %v253_v58, %v252_v2  ;;  %v259_v11 = vadd.f32 %v258_v4, %v256_v3  ;;  %v263_v12 = vmul.f32 %v262_v6, %v1910_v0  ;;  %v265_v50 = vmul.f32 %v264_v7, %v1912_v1  ;;  %s2252_s6 = sld [smem:[#allocation8 + $0x52]]  ;;  %s2257_s0 = sld [smem:[#allocation8 + $0x53]] }
  0x5f   :  { %vm269_vm2 = vcmp.gt.f32.partialorder %v247_v62, 0.0  ;;  %v278_v63 = vstv %s2096_s7  ;;  %v280_v9 = vstv %s2099_s8  ;;  %v283_v13 = vstv %s2101_s9  ;;  %s2262_s7 = sld [smem:[#allocation8 + $0x54]]  ;;  %s2273_s8 = sld [smem:[#allocation8 + $0x55]] }
  0x60   :  { %v261_v14 = vadd.f32 %v260_v61, %v259_v11  ;;  %v266_v15 = vadd.f32 %v265_v50, %v263_v12  ;;  %vm270_vm3 = vcmp.gt.f32.partialorder %v254_v10, 0.0  ;;  %v279_v16 = vmul.f32 %v278_v63, %v1910_v0  ;;  %s2275_s9 = sld [smem:[#allocation8 + $0x56]] }
  0x61   :  { %vm271_vm4 = vmand %vm269_vm2, %vm270_vm3  ;;  %v281_v17 = vmul.f32 %v280_v9, %v1912_v1  ;;  %v285_v18 = vstv %s2110_s10  ;;  %v287_v19 = vstv %s2128_s11  ;;  %v290_v20 = vstv %s2130_s12  ;;  %s2279_s10 = sld [smem:[#allocation8 + $0x57]]  ;;  %s2281_s11 = sld [smem:[#allocation8 + $0x58]] }
  0x62   :  { %v268_v21 = vadd.f32 %v267_v8, %v266_v15  ;;  %vm272_vm5 = vcmp.gt.f32.partialorder %v261_v14, 0.0  ;;  %v286_v22 = vmul.f32 %v285_v18, %v1910_v0  ;;  %v288_v23 = vmul.f32 %v287_v19, %v1912_v1  ;;  %s2288_s12 = sld [smem:[#allocation8 + $0x59]] }
  0x63   :  { %vm273_vm6 = vmand %vm271_vm4, %vm272_vm5  ;;  %v282_v24 = vadd.f32 %v281_v17, %v279_v16  ;;  %v292_v25 = vstv %s2141_s1  ;;  %v294_v26 = vstv %s2145_s13  ;;  %v297_v27 = vstv %s2147_s2  ;;  %s2290_s1 = sld [smem:[#allocation8 + $0x5a]]  ;;  %s2297_s13 = sld [smem:[#allocation8 + $0x5b]] }
  0x64   :  { %vm274_vm7 = vcmp.ge.f32.partialorder %v268_v21, 0.0  ;;  %vm276_vm8 = vcmp.lt.f32.partialorder %v268_v21, %v2118_v52  ;;  %v289_v28 = vadd.f32 %v288_v23, %v286_v22  ;;  %v293_v29 = vmul.f32 %v292_v25, %v1910_v0  ;;  %s2299_s2 = sld [smem:[#allocation8 + $0x5c]] }
  0x65   :  { %vm275_vm9 = vmand %vm273_vm6, %vm274_vm7  ;;  %v2206_v30 = vadd.f32 %v283_v13, %v282_v24  ;;  %v295_v31 = vmul.f32 %v294_v26, %v1912_v1  ;;  %v324_v32 = vstv %s2165_s14  ;;  %v326_v33 = vstv %s2167_s15  ;;  %s2302_s14 = sld [smem:[#allocation8 + $0x5d]]  ;;  %s2307_s15 = sld [smem:[#allocation8 + $0x5e]] }
  0x66   :  { %vm2215_vm10 = vmand %vm275_vm9, %vm276_vm8  ;;  %v2219_v35 = vadd.f32 %v290_v20, %v289_v28  ;;  %v325_v36 = vmul.f32 %v324_v32, %v1910_v0  ;;  %v327_v37 = vmul.f32 %v326_v33, %v1912_v1  ;;  %v329_v38 = vstv %s2171_s16  ;;  %s2309_s16 = sld [smem:[#allocation8 + $0x5f]] }
  0x67   :  { %v296_v39 = vadd.f32 %v295_v31, %v293_v29  ;;  %v2231_v40 = vsel %vm2215_vm10, %v268_v21, %v2118_v52  ;;  %v300_v41 = vsel %vm2215_vm10, %v2206_v30, %v2126_v53  ;;  %v331_v42 = vstv %s2176_s17  ;;  %s2313_s17 = sld [smem:[#allocation8 + $0x60]] }
  0x68   :  { %v301_v43 = vsel %vm2215_vm10, %v2219_v35, %v2139_v56  ;;  %v328_v45 = vadd.f32 %v327_v37, %v325_v36  ;;  %v332_v46 = vmul.f32 %v331_v42, %v1910_v0  ;;  %v333_v47 = vstv %s2179_s18  ;;  %s2316_s18 = sld [smem:[#allocation8 + $0x61]] }
  0x69   :  { %v2250_v48 = vadd.f32 %v297_v27, %v296_v39  ;;  %v334_v49 = vmul.f32 %v333_v47, %v1912_v1  ;;  %v336_v51 = vstv %s2185_s19  ;;  %v338_v52 = vstv %s2187_s20  ;;  %s2318_s19 = sld [smem:[#allocation8 + $0x62]]  ;;  %s2327_s20 = sld [smem:[#allocation8 + $0x63]] }
  0x6a   :  { %v330_v54 = vadd.f32 %v329_v38, %v328_v45  ;;  %v339_v44 = vmul.f32 %v338_v52, %v1910_v0  ;;  %v340_v57 = vstv %s2191_s21  ;;  %v343_v58 = vstv %s2193_s22  ;;  %s2346_s21 = sld [smem:[#allocation8 + $0x64]]  ;;  %s2348_s22 = sld [smem:[#allocation8 + $0x65]] }
  0x6b   :  { %v302_v59 = vsel %vm2215_vm10, %v2250_v48, %v2160_v5  ;;  %v335_v60 = vadd.f32 %v334_v49, %v332_v46  ;;  %v341_v55 = vmul.f32 %v340_v57, %v1912_v1  ;;  %v345_v61 = vstv %s2198_s23  ;;  %s2360_s23 = sld [smem:[#allocation8 + $0x66]] }
  0x6c   :  { %v346_v62 = vmul.f32 %v345_v61, %v1910_v0  ;;  %v347_v2 = vstv %s2202_s24  ;;  %v350_v3 = vstv %s2204_s25  ;;  %vm352_vm11 = vcmp.gt.f32.partialorder %v330_v54, 0.0  ;;  %s2364_s24 = sld [smem:[#allocation8 + $0x67]]  ;;  %s2366_s25 = sld [smem:[#allocation8 + $0x68]] }
  0x6d   :  { %v337_v4 = vadd.f32 %v336_v51, %v335_v60  ;;  %v342_v6 = vadd.f32 %v341_v55, %v339_v44  ;;  %v348_v7 = vmul.f32 %v347_v2, %v1912_v1  ;;  %v361_v8 = vstv %s2209_s26  ;;  %s2385_s26 = sld [smem:[#allocation8 + $0x69]] }
  0x6e   :  { %v362_v10 = vmul.f32 %v361_v8, %v1910_v0  ;;  %v363_v11 = vstv %s2211_s27  ;;  %v366_v12 = vstv %s2221_s28  ;;  %v368_v50 = vstv %s2223_s29  ;;  %s2387_s27 = sld [smem:[#allocation8 + $0x6a]]  ;;  %s2391_s28 = sld [smem:[#allocation8 + $0x6b]] }
  0x6f   :  { %v344_v63 = vadd.f32 %v343_v58, %v342_v6  ;;  %v349_v9 = vadd.f32 %v348_v7, %v346_v62  ;;  %vm353_vm12 = vcmp.gt.f32.partialorder %v337_v4, 0.0  ;;  %v364_v13 = vmul.f32 %v363_v11, %v1912_v1  ;;  %s2396_s29 = sld [smem:[#allocation8 + $0x6c]] }
  0x70   :  { %vm354_vm13 = vmand %vm352_vm11, %vm353_vm12  ;;  %v369_v14 = vmul.f32 %v368_v50, %v1910_v0  ;;  %v370_v15 = vstv %s2237_s30  ;;  %v373_v16 = vstv %s2244_s4  ;;  %v375_v17 = vstv %s2246_s5  ;;  %s2399_s30 = sld [smem:[#allocation8 + $0x6d]]  ;;  %s2405_s4 = sld [smem:[#allocation8 + $0x6e]] }
  0x71   :  { %v351_v18 = vadd.f32 %v350_v3, %v349_v9  ;;  %vm355_vm14 = vcmp.gt.f32.partialorder %v344_v63, 0.0  ;;  %v365_v19 = vadd.f32 %v364_v13, %v362_v10  ;;  %v371_v20 = vmul.f32 %v370_v15, %v1912_v1  ;;  %s2407_s5 = sld [smem:[#allocation8 + $0x6f]] }
  0x72   :  { %vm356_vm15 = vmand %vm354_vm13, %vm355_vm14  ;;  %v376_v21 = vmul.f32 %v375_v17, %v1910_v0  ;;  %v377_v22 = vstv %s2252_s6  ;;  %v380_v23 = vstv %s2257_s0  ;;  %v407_v24 = vstv %s2262_s7  ;;  %s2411_s6 = sld [smem:[#allocation8 + $0x70]]  ;;  %s2413_s0 = sld [smem:[#allocation8 + $0x71]] }
  0x73   :  { %vm357_vm0 = vcmp.ge.f32.partialorder %v351_v18, 0.0  ;;  %vm359_vm1 = vcmp.lt.f32.partialorder %v351_v18, %v2231_v40  ;;  %v367_v25 = vadd.f32 %v366_v12, %v365_v19  ;;  %v372_v26 = vadd.f32 %v371_v20, %v369_v14  ;;  %s2418_s7 = sld [smem:[#allocation8 + $0x72]] }
  0x74   :  { %vm358_vm2 = vmand %vm356_vm15, %vm357_vm0  ;;  %v378_v27 = vmul.f32 %v377_v22, %v1912_v1  ;;  %v408_v28 = vmul.f32 %v407_v24, %v1910_v0  ;;  %v409_v29 = vstv %s2273_s8  ;;  %v412_v31 = vstv %s2275_s9  ;;  %s2422_s8 = sld [smem:[#allocation8 + $0x73]]  ;;  %s2424_s9 = sld [smem:[#allocation8 + $0x74]] }
  0x75   :  { %vm2323_vm3 = vmand %vm358_vm2, %vm359_vm1  ;;  %v374_v33 = vadd.f32 %v373_v16, %v372_v26  ;;  %v410_v36 = vmul.f32 %v409_v29, %v1912_v1  ;;  %v414_v37 = vstv %s2279_s10  ;;  %v416_v38 = vstv %s2281_s11  ;;  %s2429_s10 = sld [smem:[#allocation8 + $0x75]]  ;;  %s2431_s11 = sld [smem:[#allocation8 + $0x76]] }
  0x76   :  { %v379_v39 = vadd.f32 %v378_v27, %v376_v21  ;;  %v2335_v42 = vsel %vm2323_vm3, %v351_v18, %v2231_v40  ;;  %v2344_v45 = vsel %vm2323_vm3, %v367_v25, %v300_v41  ;;  %v415_v46 = vmul.f32 %v414_v37, %v1910_v0 }
  0x77   :  { %v2358_v40 = vsel %vm2323_vm3, %v374_v33, %v301_v43  ;;  %v411_v53 = vadd.f32 %v410_v36, %v408_v28  ;;  %v417_v30 = vmul.f32 %v416_v38, %v1912_v1  ;;  %v419_v41 = vstv %s2288_s12  ;;  %s2441_s12 = sld [smem:[#allocation8 + $0x77]] }
  0x78   :  { %v381_v47 = vadd.f32 %v380_v23, %v379_v39  ;;  %v421_v49 = vstv %s2290_s1  ;;  %v423_v56 = vstv %s2297_s13  ;;  %v426_v35 = vstv %s2299_s2  ;;  %s2443_s1 = sld [smem:[#allocation8 + $0x78]]  ;;  %s2457_s13 = sld [smem:[#allocation8 + $0x79]] }
  0x79   :  { %v413_v51 = vadd.f32 %v412_v31, %v411_v53  ;;  %v418_v43 = vadd.f32 %v417_v30, %v415_v46  ;;  %v422_v52 = vmul.f32 %v421_v49, %v1910_v0  ;;  %v424_v54 = vmul.f32 %v423_v56, %v1912_v1  ;;  %s2464_s2 = sld [smem:[#allocation8 + $0x7a]] }
  0x7a   :  { %v2380_v44 = vsel %vm2323_vm3, %v381_v47, %v302_v59  ;;  %v428_v57 = vstv %s2302_s14  ;;  %v430_v58 = vstv %s2307_s15  ;;  %v433_v60 = vstv %s2309_s16  ;;  %s2466_s14 = sld [smem:[#allocation8 + $0x7b]]  ;;  %s2472_s15 = sld [smem:[#allocation8 + $0x7c]] }
  0x7b   :  { %v420_v55 = vadd.f32 %v419_v41, %v418_v43  ;;  %v425_v61 = vadd.f32 %v424_v54, %v422_v52  ;;  %v429_v62 = vmul.f32 %v428_v57, %v1910_v0  ;;  %v431_v34 = vmul.f32 %v430_v58, %v1912_v1  ;;  %s2477_s16 = sld [smem:[#allocation8 + $0x7d]] }
  0x7c   :  { %vm435_vm4 = vcmp.gt.f32.partialorder %v413_v51, 0.0  ;;  %v444_v5 = vstv %s2313_s17  ;;  %v446_v48 = vstv %s2316_s18  ;;  %v449_v59 = vstv %s2318_s19  ;;  %s2482_s17 = sld [smem:[#allocation8 + $0x7e]]  ;;  %s2493_s18 = sld [smem:[#allocation8 + $0x7f]] }
  0x7d   :  { %v427_v2 = vadd.f32 %v426_v35, %v425_v61  ;;  %v432_v3 = vadd.f32 %v431_v34, %v429_v62  ;;  %vm436_vm5 = vcmp.gt.f32.partialorder %v420_v55, 0.0  ;;  %v445_v4 = vmul.f32 %v444_v5, %v1910_v0  ;;  %s2495_s19 = sld [smem:[#allocation8 + $0x100]] }
  0x7e   :  { %vm437_vm6 = vmand %vm435_vm4, %vm436_vm5  ;;  %v447_v6 = vmul.f32 %v446_v48, %v1912_v1  ;;  %v451_v7 = vstv %s2327_s20  ;;  %v453_v8 = vstv %s2346_s21  ;;  %v456_v10 = vstv %s2348_s22  ;;  %s2499_s20 = sld [smem:[#allocation8 + $0x101]]  ;;  %s2501_s21 = sld [smem:[#allocation8 + $0x102]] }
  0x7f   :  { %v434_v11 = vadd.f32 %v433_v60, %v432_v3  ;;  %vm438_vm7 = vcmp.gt.f32.partialorder %v427_v2, 0.0  ;;  %v452_v12 = vmul.f32 %v451_v7, %v1910_v0  ;;  %v454_v50 = vmul.f32 %v453_v8, %v1912_v1  ;;  %s2508_s22 = sld [smem:[#allocation8 + $0x103]] }
  0x80   :  { %vm439_vm8 = vmand %vm437_vm6, %vm438_vm7  ;;  %v448_v63 = vadd.f32 %v447_v6, %v445_v4  ;;  %v458_v9 = vstv %s2360_s23  ;;  %v460_v13 = vstv %s2364_s24  ;;  %v463_v14 = vstv %s2366_s25  ;;  %s2510_s23 = sld [smem:[#allocation8 + $0x104]]  ;;  %s2517_s24 = sld [smem:[#allocation8 + $0x105]] }
  0x81   :  { %vm440_vm9 = vcmp.ge.f32.partialorder %v434_v11, 0.0  ;;  %vm442_vm10 = vcmp.lt.f32.partialorder %v434_v11, %v2335_v42  ;;  %v455_v15 = vadd.f32 %v454_v50, %v452_v12  ;;  %v459_v16 = vmul.f32 %v458_v9, %v1910_v0  ;;  %s2519_s25 = sld [smem:[#allocation8 + $0x106]] }
  0x82   :  { %vm441_vm11 = vmand %vm439_vm8, %vm440_vm9  ;;  %v2426_v17 = vadd.f32 %v449_v59, %v448_v63  ;;  %v461_v18 = vmul.f32 %v460_v13, %v1912_v1  ;;  %v490_v19 = vstv %s2385_s26  ;;  %v492_v20 = vstv %s2387_s27  ;;  %s2522_s26 = sld [smem:[#allocation8 + $0x107]]  ;;  %s2527_s27 = sld [smem:[#allocation8 + $0x108]] }
  0x83   :  { %vm2435_vm12 = vmand %vm441_vm11, %vm442_vm10  ;;  %v2439_v22 = vadd.f32 %v456_v10, %v455_v15  ;;  %v491_v23 = vmul.f32 %v490_v19, %v1910_v0  ;;  %v493_v24 = vmul.f32 %v492_v20, %v1912_v1  ;;  %v495_v25 = vstv %s2391_s28  ;;  %s2529_s28 = sld [smem:[#allocation8 + $0x109]] }
  0x84   :  { %v462_v26 = vadd.f32 %v461_v18, %v459_v16  ;;  %v2451_v27 = vsel %vm2435_vm12, %v434_v11, %v2335_v42  ;;  %v466_v28 = vsel %vm2435_vm12, %v2426_v17, %v2344_v45  ;;  %v497_v29 = vstv %s2396_s29  ;;  %s2533_s29 = sld [smem:[#allocation8 + $0x10a]] }
  0x85   :  { %v467_v31 = vsel %vm2435_vm12, %v2439_v22, %v2358_v40  ;;  %v494_v32 = vadd.f32 %v493_v24, %v491_v23  ;;  %v498_v33 = vmul.f32 %v497_v29, %v1910_v0  ;;  %v499_v36 = vstv %s2399_s30  ;;  %s2536_s30 = sld [smem:[#allocation8 + $0x10b]] }
  0x86   :  { %v2470_v37 = vadd.f32 %v463_v14, %v462_v26  ;;  %v500_v38 = vmul.f32 %v499_v36, %v1912_v1  ;;  %v502_v39 = vstv %s2405_s4  ;;  %v504_v42 = vstv %s2407_s5  ;;  %s2538_s4 = sld [smem:[#allocation8 + $0x10c]]  ;;  %s2547_s5 = sld [smem:[#allocation8 + $0x10d]] }
  0x87   :  { %v496_v46 = vadd.f32 %v495_v25, %v494_v32  ;;  %v505_v53 = vmul.f32 %v504_v42, %v1910_v0  ;;  %v506_v30 = vstv %s2411_s6  ;;  %v509_v41 = vstv %s2413_s0  ;;  %s2566_s6 = sld [smem:[#allocation8 + $0x10e]]  ;;  %s2568_s0 = sld [smem:[#allocation8 + $0x10f]] }
  0x88   :  { %v468_v47 = vsel %vm2435_vm12, %v2470_v37, %v2380_v44  ;;  %v501_v49 = vadd.f32 %v500_v38, %v498_v33  ;;  %v507_v56 = vmul.f32 %v506_v30, %v1912_v1  ;;  %v511_v35 = vstv %s2418_s7  ;;  %s2582_s7 = sld [smem:[#allocation8 + $0x110]] }
  0x89   :  { %v512_v51 = vmul.f32 %v511_v35, %v1910_v0  ;;  %v513_v43 = vstv %s2422_s8  ;;  %v516_v52 = vstv %s2424_s9  ;;  %vm518_vm13 = vcmp.gt.f32.partialorder %v496_v46, 0.0  ;;  %s2588_s8 = sld [smem:[#allocation8 + $0x111]]  ;;  %s2590_s9 = sld [smem:[#allocation8 + $0x112]] }
  0x8a   :  { %v503_v54 = vadd.f32 %v502_v39, %v501_v49  ;;  %v508_v57 = vadd.f32 %v507_v56, %v505_v53  ;;  %v514_v58 = vmul.f32 %v513_v43, %v1912_v1  ;;  %v527_v60 = vstv %s2429_s10  ;;  %s2609_s10 = sld [smem:[#allocation8 + $0x113]] }
  0x8b   :  { %v528_v55 = vmul.f32 %v527_v60, %v1910_v0  ;;  %v529_v61 = vstv %s2431_s11  ;;  %v532_v62 = vstv %s2441_s12  ;;  %v534_v34 = vstv %s2443_s1  ;;  %s2611_s11 = sld [smem:[#allocation8 + $0x114]]  ;;  %s2615_s12 = sld [smem:[#allocation8 + $0x115]] }
  0x8c   :  { %v510_v5 = vadd.f32 %v509_v41, %v508_v57  ;;  %v515_v48 = vadd.f32 %v514_v58, %v512_v51  ;;  %vm519_vm14 = vcmp.gt.f32.partialorder %v503_v54, 0.0  ;;  %v530_v59 = vmul.f32 %v529_v61, %v1912_v1  ;;  %s2620_s1 = sld [smem:[#allocation8 + $0x116]] }
  0x8d   :  { %vm520_vm15 = vmand %vm518_vm13, %vm519_vm14  ;;  %v535_v2 = vmul.f32 %v534_v34, %v1910_v0  ;;  %v536_v3 = vstv %s2457_s13  ;;  %v539_v4 = vstv %s2464_s2  ;;  %v541_v6 = vstv %s2466_s14  ;;  %s2623_s13 = sld [smem:[#allocation8 + $0x117]]  ;;  %s2629_s2 = sld [smem:[#allocation8 + $0x118]] }
  0x8e   :  { %v517_v7 = vadd.f32 %v516_v52, %v515_v48  ;;  %vm521_vm0 = vcmp.gt.f32.partialorder %v510_v5, 0.0  ;;  %v531_v8 = vadd.f32 %v530_v59, %v528_v55  ;;  %v537_v10 = vmul.f32 %v536_v3, %v1912_v1  ;;  %s2631_s14 = sld [smem:[#allocation8 + $0x119]] }
  0x8f   :  { %vm522_vm1 = vmand %vm520_vm15, %vm521_vm0  ;;  %v542_v11 = vmul.f32 %v541_v6, %v1910_v0  ;;  %v543_v12 = vstv %s2472_s15  ;;  %v546_v50 = vstv %s2477_s16  ;;  %v573_v63 = vstv %s2482_s17  ;;  %s2635_s15 = sld [smem:[#allocation8 + $0x11a]]  ;;  %s2637_s16 = sld [smem:[#allocation8 + $0x11b]] }
  0x90   :  { %vm523_vm2 = vcmp.ge.f32.partialorder %v517_v7, 0.0  ;;  %vm525_vm3 = vcmp.lt.f32.partialorder %v517_v7, %v2451_v27  ;;  %v533_v9 = vadd.f32 %v532_v62, %v531_v8  ;;  %v538_v13 = vadd.f32 %v537_v10, %v535_v2  ;;  %s2642_s17 = sld [smem:[#allocation8 + $0x11c]] }
  0x91   :  { %vm524_vm4 = vmand %vm522_vm1, %vm523_vm2  ;;  %v544_v14 = vmul.f32 %v543_v12, %v1912_v1  ;;  %v574_v15 = vmul.f32 %v573_v63, %v1910_v0  ;;  %v575_v16 = vstv %s2493_s18  ;;  %v578_v18 = vstv %s2495_s19  ;;  %s2646_s18 = sld [smem:[#allocation8 + $0x11d]]  ;;  %s2648_s19 = sld [smem:[#allocation8 + $0x11e]] }
  0x92   :  { %vm2543_vm5 = vmand %vm524_vm4, %vm525_vm3  ;;  %v540_v20 = vadd.f32 %v539_v4, %v538_v13  ;;  %v576_v23 = vmul.f32 %v575_v16, %v1912_v1  ;;  %v580_v24 = vstv %s2499_s20  ;;  %v582_v25 = vstv %s2501_s21  ;;  %v2570_v1 = vld [vmem:[#allocation2] sm:$0xff]  ;;  %s2653_s20 = sld [smem:[#allocation8 + $0x11f]]  ;;  %s2655_s21 = sld [smem:[#allocation8 + $0x120]] }
  0x93   :  { %v545_v26 = vadd.f32 %v544_v14, %v542_v11  ;;  %v2555_v0 = vsel %vm2543_vm5, %v517_v7, %v2451_v27  ;;  %v2564_v29 = vsel %vm2543_vm5, %v533_v9, %v466_v28  ;;  %v581_v27 = vmul.f32 %v2570_v1, %v580_v24  ;;  %v2584_v28 = vld [vmem:[#allocation6] sm:$0xff] }
  0x94   :  { %v2580_v45 = vsel %vm2543_vm5, %v540_v20, %v467_v31  ;;  %v577_v17 = vadd.f32 %v576_v23, %v574_v15  ;;  %v583_v32 = vmul.f32 %v2584_v28, %v582_v25  ;;  %v585_v33 = vstv %s2508_s22  ;;  %s2665_s22 = sld [smem:[#allocation8 + $0x121]] }
  0x95   :  { %v547_v36 = vadd.f32 %v546_v50, %v545_v26  ;;  %v587_v40 = vstv %s2510_s23  ;;  %v589_v22 = vstv %s2517_s24  ;;  %v592_v31 = vstv %s2519_s25  ;;  %s2667_s23 = sld [smem:[#allocation8 + $0x122]]  ;;  %s2681_s24 = sld [smem:[#allocation8 + $0x123]] }
  0x96   :  { %v579_v38 = vadd.f32 %v578_v18, %v577_v17  ;;  %v584_v39 = vadd.f32 %v583_v32, %v581_v27  ;;  %v588_v42 = vmul.f32 %v2570_v1, %v587_v40  ;;  %v590_v46 = vmul.f32 %v2584_v28, %v589_v22  ;;  %s2688_s25 = sld [smem:[#allocation8 + $0x124]] }
  0x97   :  { %v2604_v53 = vsel %vm2543_vm5, %v547_v36, %v468_v47  ;;  %v594_v30 = vstv %s2522_s26  ;;  %v596_v41 = vstv %s2527_s27  ;;  %v599_v49 = vstv %s2529_s28  ;;  %s2690_s26 = sld [smem:[#allocation8 + $0x125]]  ;;  %s2696_s27 = sld [smem:[#allocation8 + $0x126]] }
  0x98   :  { %v586_v56 = vadd.f32 %v585_v33, %v584_v39  ;;  %v591_v35 = vadd.f32 %v590_v46, %v588_v42  ;;  %v595_v51 = vmul.f32 %v2570_v1, %v594_v30  ;;  %v597_v21 = vmul.f32 %v2584_v28, %v596_v41  ;;  %s2701_s28 = sld [smem:[#allocation8 + $0x127]] }
  0x99   :  { %vm601_vm6 = vcmp.gt.f32.partialorder %v579_v38, 0.0  ;;  %v610_v44 = vstv %s2533_s29  ;;  %v612_v37 = vstv %s2536_s30  ;;  %v615_v47 = vstv %s2538_s4  ;;  %s2706_s29 = sld [smem:[#allocation8 + $0x80]]  ;;  %s2717_s30 = sld [smem:[#allocation8 + $0x81]] }
  0x9a   :  { %v593_v43 = vadd.f32 %v592_v31, %v591_v35  ;;  %v598_v52 = vadd.f32 %v597_v21, %v595_v51  ;;  %vm602_vm7 = vcmp.gt.f32.partialorder %v586_v56, 0.0  ;;  %v611_v54 = vmul.f32 %v2570_v1, %v610_v44  ;;  %s2719_s4 = sld [smem:[#allocation8 + $0x82]] }
  0x9b   :  { %vm603_vm8 = vmand %vm601_vm6, %vm602_vm7  ;;  %v613_v57 = vmul.f32 %v2584_v28, %v612_v37  ;;  %v617_v58 = vstv %s2547_s5  ;;  %v619_v60 = vstv %s2566_s6  ;;  %v622_v55 = vstv %s2568_s0  ;;  %s2723_s5 = sld [smem:[#allocation8 + $0x83]]  ;;  %s2725_s6 = sld [smem:[#allocation8 + $0x84]] }
  0x9c   :  { %v600_v61 = vadd.f32 %v599_v49, %v598_v52  ;;  %vm604_vm9 = vcmp.gt.f32.partialorder %v593_v43, 0.0  ;;  %v618_v62 = vmul.f32 %v2570_v1, %v617_v58  ;;  %v620_v34 = vmul.f32 %v2584_v28, %v619_v60  ;;  %s2737_s0 = sld [smem:[#allocation8 + $0x85]] }
  0x9d   :  { %vm605_vm10 = vmand %vm603_vm8, %vm604_vm9  ;;  %v614_v5 = vadd.f32 %v613_v57, %v611_v54  ;;  %v624_v48 = vstv %s2582_s7  ;;  %v626_v59 = vstv %s2588_s8  ;;  %v629_v2 = vstv %s2590_s9  ;;  %s2739_s7 = sld [smem:[#allocation8 + $0x86]]  ;;  %s2742_s8 = sld [smem:[#allocation8 + $0x87]] }
  0x9e   :  { %vm606_vm11 = vcmp.ge.f32.partialorder %v600_v61, 0.0  ;;  %vm608_vm12 = vcmp.lt.f32.partialorder %v600_v61, %v2555_v0  ;;  %v621_v3 = vadd.f32 %v620_v34, %v618_v62  ;;  %v625_v4 = vmul.f32 %v2570_v1, %v624_v48  ;;  %s2747_s9 = sld [smem:[#allocation8 + $0x89]] }
  0x9f   :  { %vm607_vm13 = vmand %vm605_vm10, %vm606_vm11  ;;  %v2650_v6 = vadd.f32 %v615_v47, %v614_v5  ;;  %v627_v7 = vmul.f32 %v2584_v28, %v626_v59  ;;  %v656_v8 = vstv %s2609_s10  ;;  %v658_v10 = vstv %s2611_s11  ;;  %s2751_s10 = sld [smem:[#allocation8 + $0x88]]  ;;  %s2753_s11 = sld [smem:[#allocation8 + $0x8a]] }
  0xa0   :  { %vm2659_vm14 = vmand %vm607_vm13, %vm608_vm12  ;;  %v2663_v12 = vadd.f32 %v622_v55, %v621_v3  ;;  %v657_v50 = vmul.f32 %v2570_v1, %v656_v8  ;;  %v659_v63 = vmul.f32 %v2584_v28, %v658_v10  ;;  %v661_v9 = vstv %s2615_s12  ;;  %s2756_s12 = sld [smem:[#allocation8 + $0x8c]] }
  0xa1   :  { %v628_v13 = vadd.f32 %v627_v7, %v625_v4  ;;  %v2675_v14 = vsel %vm2659_vm14, %v600_v61, %v2555_v0  ;;  %v632_v15 = vsel %vm2659_vm14, %v2650_v6, %v2564_v29  ;;  %v663_v16 = vstv %s2620_s1  ;;  %s2765_s1 = sld [smem:[#allocation8 + $0x8b]] }
  0xa2   :  { %v633_v18 = vsel %vm2659_vm14, %v2663_v12, %v2580_v45  ;;  %v660_v19 = vadd.f32 %v659_v63, %v657_v50  ;;  %v664_v20 = vmul.f32 %v2570_v1, %v663_v16  ;;  %v665_v23 = vstv %s2623_s13  ;;  %s2767_s13 = sld [smem:[#allocation8 + $0x8d]] }
  0xa3   :  { %v2694_v24 = vadd.f32 %v629_v2, %v628_v13  ;;  %v666_v25 = vmul.f32 %v2584_v28, %v665_v23  ;;  %v668_v26 = vstv %s2629_s2  ;;  %v670_v0 = vstv %s2631_s14  ;;  %s2782_s2 = sld [smem:[#allocation8 + $0x8f]]  ;;  %s2792_s14 = sld [smem:[#allocation8 + $0x90]] }
  0xa4   :  { %v662_v27 = vadd.f32 %v661_v9, %v660_v19  ;;  %v671_v17 = vmul.f32 %v2570_v1, %v670_v0  ;;  %v672_v32 = vstv %s2635_s15  ;;  %v675_v33 = vstv %s2637_s16  ;;  %s2794_s15 = sld [smem:[#allocation8 + $0x92]]  ;;  %s2798_s16 = sld [smem:[#allocation8 + $0x8e]] }
  0xa5   :  { %v634_v36 = vsel %vm2659_vm14, %v2694_v24, %v2604_v53  ;;  %v667_v40 = vadd.f32 %v666_v25, %v664_v20  ;;  %v673_v22 = vmul.f32 %v2584_v28, %v672_v32  ;;  %v677_v31 = vstv %s2642_s17  ;;  %s2802_s17 = sld [smem:[#allocation8 + $0x93]] }
  0xa6   :  { %v678_v38 = vmul.f32 %v2570_v1, %v677_v31  ;;  %v679_v39 = vstv %s2646_s18  ;;  %v682_v42 = vstv %s2648_s19  ;;  %vm684_vm15 = vcmp.gt.f32.partialorder %v662_v27, 0.0  ;;  %s2806_s18 = sld [smem:[#allocation8 + $0x95]]  ;;  %s2817_s19 = sld [smem:[#allocation8 + $0x91]] }
  0xa7   :  { %v669_v46 = vadd.f32 %v668_v26, %v667_v40  ;;  %v674_v30 = vadd.f32 %v673_v22, %v671_v17  ;;  %v680_v41 = vmul.f32 %v2584_v28, %v679_v39  ;;  %v693_v49 = vstv %s2653_s20  ;;  %s2822_s20 = sld [smem:[#allocation8 + $0x96]] }
  0xa8   :  { %v694_v56 = vmul.f32 %v2570_v1, %v693_v49  ;;  %v695_v35 = vstv %s2655_s21  ;;  %v698_v51 = vstv %s2665_s22  ;;  %v700_v21 = vstv %s2667_s23  ;;  %s2826_s21 = sld [smem:[#allocation8 + $0x98]]  ;;  %s2828_s22 = sld [smem:[#allocation8 + $0x99]] }
  0xa9   :  { %v676_v44 = vadd.f32 %v675_v33, %v674_v30  ;;  %v681_v37 = vadd.f32 %v680_v41, %v678_v38  ;;  %vm685_vm0 = vcmp.gt.f32.partialorder %v669_v46, 0.0  ;;  %v696_v47 = vmul.f32 %v2584_v28, %v695_v35  ;;  %s2830_s23 = sld [smem:[#allocation8 + $0x94]] }
  0xaa   :  { %vm686_vm1 = vmand %vm684_vm15, %vm685_vm0  ;;  %v701_v43 = vmul.f32 %v2570_v1, %v700_v21  ;;  %v702_v52 = vstv %s2681_s24  ;;  %v705_v54 = vstv %s2688_s25  ;;  %v707_v57 = vstv %s2690_s26  ;;  %s2835_s24 = sld [smem:[#allocation8 + $0x97]]  ;;  %s2839_s25 = sld [smem:[#allocation8 + $0x9a]] }
  0xab   :  { %v683_v58 = vadd.f32 %v682_v42, %v681_v37  ;;  %vm687_vm2 = vcmp.gt.f32.partialorder %v676_v44, 0.0  ;;  %v697_v60 = vadd.f32 %v696_v47, %v694_v56  ;;  %v703_v55 = vmul.f32 %v2584_v28, %v702_v52  ;;  %s2844_s26 = sld [smem:[#allocation8 + $0x9b]] }
  0xac   :  { %vm688_vm3 = vmand %vm686_vm1, %vm687_vm2  ;;  %v708_v61 = vmul.f32 %v2570_v1, %v707_v57  ;;  %v709_v62 = vstv %s2696_s27  ;;  %v712_v34 = vstv %s2701_s28  ;;  %v748_v5 = vstv %s2706_s29  ;;  %s2846_s27 = sld [smem:[#allocation8 + $0x9c]]  ;;  %s2849_s28 = sld [smem:[#allocation8 + $0x9d]] }
  0xad   :  { %vm689_vm4 = vcmp.ge.f32.partialorder %v683_v58, 0.0  ;;  %vm691_vm5 = vcmp.lt.f32.partialorder %v683_v58, %v2675_v14  ;;  %v699_v48 = vadd.f32 %v698_v51, %v697_v60  ;;  %v704_v59 = vadd.f32 %v703_v55, %v701_v43  ;;  %s2853_s29 = sld [smem:[#allocation8 + $0x9e]] }
  0xae   :  { %vm690_vm6 = vmand %vm688_vm3, %vm689_vm4  ;;  %v710_v2 = vmul.f32 %v2584_v28, %v709_v62  ;;  %v749_v3 = vmul.f32 %v2570_v1, %v748_v5  ;;  %v750_v4 = vstv %s2717_s30  ;;  %v753_v7 = vstv %s2719_s4  ;;  %s2855_s30 = sld [smem:[#allocation8 + $0x9f]]  ;;  %s2859_s4 = sld [smem:[#allocation8 + $0xa0]] }
  0xaf   :  { %vm2761_vm7 = vmand %vm690_vm6, %vm691_vm5  ;;  %v706_v10 = vadd.f32 %v705_v54, %v704_v59  ;;  %v751_v50 = vmul.f32 %v2584_v28, %v750_v4  ;;  %v755_v63 = vstv %s2723_s5  ;;  %v757_v9 = vstv %s2725_s6  ;;  %s2863_s5 = sld [smem:[#allocation8 + $0xa1]]  ;;  %s2865_s6 = sld [smem:[#allocation8 + $0xa2]] }
  0xb0   :  { %v711_v13 = vadd.f32 %v710_v2, %v708_v61  ;;  %v714_v16 = vsel %vm2761_vm7, %v683_v58, %v2675_v14  ;;  %v715_v19 = vsel %vm2761_vm7, %v699_v48, %v632_v15  ;;  %v756_v20 = vmul.f32 %v2570_v1, %v755_v63 }
  0xb1   :  { %v716_v14 = vsel %vm2761_vm7, %v706_v10, %v633_v18  ;;  %vm718_vm8 = vcmp.lt.f32.partialorder %v714_v16, 1e+30  ;;  %720 = vst [vmem:[#allocation9] sm:$0xff] %v715_v19  ;;  %v752_v29 = vadd.f32 %v751_v50, %v749_v3  ;;  %v758_v6 = vmul.f32 %v2584_v28, %v757_v9 }
  0xb2   :  { %v713_v15 = vadd.f32 %v712_v34, %v711_v13  ;;  %v1855_v23 = vmov 0.0   ;;  %722 = vst [vmem:[#allocation9 + $0x8] sm:$0xff] %v716_v14  ;;  %v760_v45 = vstv %s2737_s0  ;;  %v762_v12 = vstv %s2739_s7  ;;  %s2879_s0 = sld [smem:[#allocation8 + $0xa4]]  ;;  %s2881_s7 = sld [smem:[#allocation8 + $0xa5]] }
  0xb3   :  { %v719_v25 = vsel %vm718_vm8, 1.0, %v1855_v23  ;;  %v754_v18 = vadd.f32 %v753_v7, %v752_v29  ;;  %v759_v26 = vadd.f32 %v758_v6, %v756_v20  ;;  %v763_v0 = vmul.f32 %v2570_v1, %v762_v12 }
  0xb4   :  { %726 = vst [vmem:[#allocation9 + $0x18] sm:$0xff] %v719_v25  ;;  %v764_v27 = vstv %s2742_s8  ;;  %v717_v17 = vsel %vm2761_vm7, %v713_v15, %v634_v36  ;;  %v769_v33 = vstv %s2747_s9  ;;  %v767_v22 = vstv %s2751_s10  ;;  %s2887_s8 = sld [smem:[#allocation8 + $0xa3]]  ;;  %s2894_s9 = sld [smem:[#allocation8 + $0xa7]] }
  0xb5   :  { %v765_v32 = vmul.f32 %v2584_v28, %v764_v27  ;;  %724 = vst [vmem:[#allocation9 + $0x10] sm:$0xff] %v717_v17  ;;  %v761_v40 = vadd.f32 %v760_v45, %v759_v26  ;;  %v770_v31 = vmul.f32 %v2570_v1, %v769_v33  ;;  %v771_v38 = vstv %s2753_s11  ;;  %s2896_s10 = sld [smem:[#allocation8 + $0xa8]]  ;;  %s2901_s11 = sld [smem:[#allocation8 + $0xa6]] }
  0xb6   :  { %v772_v53 = vmul.f32 %v2584_v28, %v771_v38  ;;  %vm776_vm9 = vcmp.gt.f32.partialorder %v754_v18, 0.0  ;;  %v785_v24 = vstv %s2756_s12  ;;  %v774_v36 = vstv %s2765_s1  ;;  %s2911_s12 = sld [smem:[#allocation8 + $0xaa]]  ;;  %s2913_s1 = sld [smem:[#allocation8 + $0xab]] }
  0xb7   :  { %v766_v11 = vadd.f32 %v765_v32, %v763_v0  ;;  %vm777_vm10 = vcmp.gt.f32.partialorder %v761_v40, 0.0  ;;  %v786_v39 = vmul.f32 %v2570_v1, %v785_v24  ;;  %v787_v42 = vstv %s2767_s13  ;;  %s2915_s13 = sld [smem:[#allocation8 + $0xa9]] }
  0xb8   :  { %v773_v30 = vadd.f32 %v772_v53, %v770_v31  ;;  %vm778_vm11 = vmand %vm776_vm9, %vm777_vm10  ;;  %v788_v41 = vmul.f32 %v2584_v28, %v787_v42  ;;  %v792_v49 = vstv %s2782_s2  ;;  %v794_v35 = vstv %s2792_s14  ;;  %s2922_s2 = sld [smem:[#allocation8 + $0xac]]  ;;  %s2924_s14 = sld [smem:[#allocation8 + $0xad]] }
  0xb9   :  { %v768_v46 = vadd.f32 %v767_v22, %v766_v11  ;;  %v793_v56 = vmul.f32 %v2570_v1, %v792_v49  ;;  %v799_v51 = vstv %s2794_s15  ;;  %v795_v44 = vmul.f32 %v2584_v28, %v794_v35  ;;  %s2927_s15 = sld [smem:[#allocation8 + $0xae]] }
  0xba   :  { %v775_v21 = vadd.f32 %v774_v36, %v773_v30  ;;  %v789_v37 = vadd.f32 %v788_v41, %v786_v39  ;;  %v790_v47 = vstv %s2798_s16  ;;  %v801_v43 = vstv %s2802_s17  ;;  %s2934_s16 = sld [smem:[#allocation8 + $0xb0]]  ;;  %s2938_s17 = sld [smem:[#allocation8 + $0xaf]] }
  0xbb   :  { %vm779_vm12 = vcmp.gt.f32.partialorder %v768_v46, 0.0  ;;  %v831_v52 = vstv %s2806_s18  ;;  %v796_v54 = vadd.f32 %v795_v44, %v793_v56  ;;  %v800_v57 = vmul.f32 %v2570_v1, %v799_v51  ;;  %s2940_s18 = sld [smem:[#allocation8 + $0xb1]] }
  0xbc   :  { %vm780_vm13 = vmand %vm778_vm11, %vm779_vm12  ;;  %vm781_vm14 = vcmp.ge.f32.partialorder %v775_v21, 0.0  ;;  %vm783_vm15 = vcmp.lt.f32.partialorder %v775_v21, 1e+30  ;;  %v797_v58 = vstv %s2817_s19  ;;  %v802_v60 = vmul.f32 %v2584_v28, %v801_v43  ;;  %s2945_s19 = sld [smem:[#allocation8 + $0xb3]] }
  0xbd   :  { %vm782_vm0 = vmand %vm780_vm13, %vm781_vm14  ;;  %v832_v55 = vmul.f32 %v2570_v1, %v831_v52  ;;  %v833_v61 = vstv %s2822_s20  ;;  %v838_v5 = vstv %s2826_s21  ;;  %v840_v48 = vstv %s2828_s22  ;;  %s2949_s20 = sld [smem:[#allocation8 + $0xb2]]  ;;  %s2951_s21 = sld [smem:[#allocation8 + $0xb4]] }
  0xbe   :  { %vm2869_vm1 = vmand %vm782_vm0, %vm783_vm15  ;;  %v834_v34 = vmul.f32 %v2584_v28, %v833_v61  ;;  %v2876_v59 = vadd.f32 %v790_v47, %v789_v37  ;;  %v804_v2 = vstv %s2830_s23  ;;  %v836_v3 = vstv %s2835_s24  ;;  %s2955_s22 = sld [smem:[#allocation8 + $0xb5]]  ;;  %s2957_s23 = sld [smem:[#allocation8 + $0xb6]] }
  0xbf   :  { %v839_v4 = vmul.f32 %v2570_v1, %v838_v5  ;;  %v2885_v7 = vadd.f32 %v797_v58, %v796_v54  ;;  %v803_v8 = vadd.f32 %v802_v60, %v800_v57  ;;  %v841_v50 = vmul.f32 %v2584_v28, %v840_v48  ;;  %s2971_s24 = sld [smem:[#allocation8 + $0xb7]] }
  0xc0   :  { %v835_v10 = vadd.f32 %v834_v34, %v832_v55  ;;  %v2892_v63 = vsel %vm2869_vm1, %v775_v21, 1e+30  ;;  %v843_v9 = vstv %s2839_s25  ;;  %v845_v13 = vstv %s2844_s26  ;;  %s2973_s25 = sld [smem:[#allocation8 + $0xb9]]  ;;  %s2980_s26 = sld [smem:[#allocation8 + $0xba]] }
  0xc1   :  { %v847_v16 = vstv %s2846_s27  ;;  %v842_v20 = vadd.f32 %v841_v50, %v839_v4  ;;  %v846_v14 = vmul.f32 %v2570_v1, %v845_v13  ;;  %v807_v6 = vsel %vm2869_vm1, %v2876_v59, 1.0  ;;  %s2982_s27 = sld [smem:[#allocation8 + $0xbc]] }
  0xc2   :  { %v837_v19 = vadd.f32 %v836_v3, %v835_v10  ;;  %v848_v29 = vmul.f32 %v2584_v28, %v847_v16  ;;  %v850_v15 = vstv %s2849_s28  ;;  %v852_v25 = vstv %s2853_s29  ;;  %s2991_s28 = sld [smem:[#allocation8 + $0xb8]]  ;;  %s2995_s29 = sld [smem:[#allocation8 + $0xbd]] }
  0xc3   :  { %v854_v45 = vstv %s2855_s30  ;;  %v844_v12 = vadd.f32 %v843_v9, %v842_v20  ;;  %v853_v26 = vmul.f32 %v2570_v1, %v852_v25  ;;  %v857_v27 = vstv %s2859_s4  ;;  %s3000_s30 = sld [smem:[#allocation8 + $0xbf]]  ;;  %s3012_s4 = sld [smem:[#allocation8 + $0xbb]] }
  0xc4   :  { %v849_v18 = vadd.f32 %v848_v29, %v846_v14  ;;  %v855_v0 = vmul.f32 %v2584_v28, %v854_v45  ;;  %vm859_vm2 = vcmp.gt.f32.partialorder %v837_v19, 0.0  ;;  %v868_v17 = vstv %s2863_s5  ;;  %s3017_s5 = sld [smem:[#allocation8 + $0xc0]] }
  0xc5   :  { %v870_v32 = vstv %s2865_s6  ;;  %vm860_vm3 = vcmp.gt.f32.partialorder %v844_v12, 0.0  ;;  %v869_v22 = vmul.f32 %v2570_v1, %v868_v17  ;;  %v2929_v31 = vadd.f32 %v804_v2, %v803_v8  ;;  %s3021_s6 = sld [smem:[#allocation8 + $0xc2]] }
  0xc6   :  { %v851_v33 = vadd.f32 %v850_v15, %v849_v18  ;;  %v856_v40 = vadd.f32 %v855_v0, %v853_v26  ;;  %vm861_vm4 = vmand %vm859_vm2, %vm860_vm3  ;;  %v871_v38 = vmul.f32 %v2584_v28, %v870_v32  ;;  %v875_v11 = vstv %s2879_s0  ;;  %s3023_s0 = sld [smem:[#allocation8 + $0xc3]] }
  0xc7   :  { %v877_v53 = vstv %s2881_s7  ;;  %v876_v36 = vmul.f32 %v2570_v1, %v875_v11  ;;  %v873_v46 = vstv %s2887_s8  ;;  %v882_v30 = vstv %s2894_s9  ;;  %s3025_s7 = sld [smem:[#allocation8 + $0xbe]]  ;;  %s3031_s8 = sld [smem:[#allocation8 + $0xc1]] }
  0xc8   :  { %v858_v24 = vadd.f32 %v857_v27, %v856_v40  ;;  %vm862_vm5 = vcmp.gt.f32.partialorder %v851_v33, 0.0  ;;  %v878_v39 = vmul.f32 %v2584_v28, %v877_v53  ;;  %v872_v42 = vadd.f32 %v871_v38, %v869_v22  ;;  %s3034_s9 = sld [smem:[#allocation8 + $0xc4]] }
  0xc9   :  { %vm863_vm6 = vmand %vm861_vm4, %vm862_vm5  ;;  %v884_v41 = vstv %s2896_s10  ;;  %v880_v56 = vstv %s2901_s11  ;;  %v883_v35 = vmul.f32 %v2570_v1, %v882_v30  ;;  %v914_v21 = vstv %s2911_s12  ;;  %s3044_s10 = sld [smem:[#allocation8 + $0xc5]]  ;;  %s3046_s11 = sld [smem:[#allocation8 + $0xc6]] }
  0xca   :  { %vm864_vm7 = vcmp.ge.f32.partialorder %v858_v24, 0.0  ;;  %vm866_vm8 = vcmp.lt.f32.partialorder %v858_v24, %v2892_v63  ;;  %v879_v49 = vadd.f32 %v878_v39, %v876_v36  ;;  %v885_v51 = vmul.f32 %v2584_v28, %v884_v41  ;;  %s3049_s12 = sld [smem:[#allocation8 + $0xc7]] }
  0xcb   :  { %vm865_vm9 = vmand %vm863_vm6, %vm864_vm7  ;;  %v916_v44 = vstv %s2913_s1  ;;  %v808_v37 = vsel %vm2869_vm1, %v2885_v7, 1.0  ;;  %v809_v47 = vsel %vm2869_vm1, %v2929_v31, 1.0  ;;  %v915_v52 = vmul.f32 %v2570_v1, %v914_v21  ;;  %s3053_s1 = sld [smem:[#allocation8 + $0xc8]] }
  0xcc   :  { %vm2967_vm10 = vmand %vm865_vm9, %vm866_vm8  ;;  %v917_v54 = vmul.f32 %v2584_v28, %v916_v44  ;;  %v874_v57 = vadd.f32 %v873_v46, %v872_v42  ;;  %v887_v58 = vstv %s2915_s13  ;;  %v919_v60 = vstv %s2922_s2  ;;  %s3055_s13 = sld [smem:[#allocation8 + $0xc9]]  ;;  %s3060_s2 = sld [smem:[#allocation8 + $0xca]] }
  0xcd   :  { %v921_v55 = vstv %s2924_s14  ;;  %v881_v61 = vadd.f32 %v880_v56, %v879_v49  ;;  %v923_v48 = vstv %s2927_s15  ;;  %v886_v2 = vadd.f32 %v885_v51, %v883_v35  ;;  %s3064_s14 = sld [smem:[#allocation8 + $0xcb]]  ;;  %s3066_s15 = sld [smem:[#allocation8 + $0xcc]] }
  0xce   :  { %v918_v34 = vadd.f32 %v917_v54, %v915_v52  ;;  %v922_v5 = vmul.f32 %v2570_v1, %v921_v55  ;;  %v2989_v3 = vsel %vm2967_vm10, %v858_v24, %v2892_v63  ;;  %v924_v4 = vmul.f32 %v2584_v28, %v923_v48 }
  0xcf   :  { %v928_v7 = vstv %s2934_s16  ;;  %v926_v10 = vstv %s2938_s17  ;;  %v930_v9 = vstv %s2940_s18  ;;  %v3008_v63 = vsel %vm2967_vm10, %v874_v57, %v807_v6  ;;  %s3088_s16 = sld [smem:[#allocation8 + $0xce]]  ;;  %s3090_s17 = sld [smem:[#allocation8 + $0xcf]] }
  0xd0   :  { %v920_v8 = vadd.f32 %v919_v60, %v918_v34  ;;  %v929_v50 = vmul.f32 %v2570_v1, %v928_v7  ;;  %v925_v13 = vadd.f32 %v924_v4, %v922_v5  ;;  %v931_v16 = vmul.f32 %v2584_v28, %v930_v9  ;;  %s3096_s18 = sld [smem:[#allocation8 + $0xcd]] }
  0xd1   :  { %v935_v19 = vstv %s2945_s19  ;;  %v933_v20 = vstv %s2949_s20  ;;  %v937_v29 = vstv %s2951_s21  ;;  %v951_v25 = vstv %s2957_s23  ;;  %s3104_s19 = sld [smem:[#allocation8 + $0xd1]]  ;;  %s3106_s20 = sld [smem:[#allocation8 + $0xd2]] }
  0xd2   :  { %v936_v14 = vmul.f32 %v2570_v1, %v935_v19  ;;  %vm942_vm11 = vcmp.gt.f32.partialorder %v920_v8, 0.0  ;;  %v927_v59 = vadd.f32 %v926_v10, %v925_v13  ;;  %v932_v15 = vadd.f32 %v931_v16, %v929_v50  ;;  %s3111_s21 = sld [smem:[#allocation8 + $0xd0]]  ;;  %s3124_s23 = sld [smem:[#allocation8 + $0xd5]] }
  0xd3   :  { %v938_v6 = vmul.f32 %v2584_v28, %v937_v29  ;;  %v940_v45 = vstv %s2955_s22  ;;  %v952_v12 = vmul.f32 %v2570_v1, %v951_v25  ;;  %v953_v18 = vstv %s2971_s24  ;;  %s3122_s22 = sld [smem:[#allocation8 + $0xd4]]  ;;  %s3126_s24 = sld [smem:[#allocation8 + $0xd3]] }
  0xd4   :  { %v958_v26 = vstv %s2973_s25  ;;  %v934_v0 = vadd.f32 %v933_v20, %v932_v15  ;;  %vm943_vm12 = vcmp.gt.f32.partialorder %v927_v59, 0.0  ;;  %v954_v17 = vmul.f32 %v2584_v28, %v953_v18  ;;  %s3133_s25 = sld [smem:[#allocation8 + $0xd6]] }
  0xd5   :  { %v939_v27 = vadd.f32 %v938_v6, %v936_v14  ;;  %v3038_v32 = vsel %vm2967_vm10, %v881_v61, %v808_v37  ;;  %vm944_vm13 = vmand %vm942_vm11, %vm943_vm12  ;;  %v959_v33 = vmul.f32 %v2570_v1, %v958_v26  ;;  %v960_v40 = vstv %s2980_s26  ;;  %s3135_s26 = sld [smem:[#allocation8 + $0xd7]] }
  0xd6   :  { %v965_v22 = vstv %s2982_s27  ;;  %v888_v38 = vadd.f32 %v887_v58, %v886_v2  ;;  %vm945_vm14 = vcmp.gt.f32.partialorder %v934_v0, 0.0  ;;  %v961_v53 = vmul.f32 %v2584_v28, %v960_v40  ;;  %s3138_s27 = sld [smem:[#allocation8 + $0xd8]] }
  0xd7   :  { %v941_v11 = vadd.f32 %v940_v45, %v939_v27  ;;  %vm946_vm15 = vmand %vm944_vm13, %vm945_vm14  ;;  %v955_v24 = vadd.f32 %v954_v17, %v952_v12  ;;  %v956_v36 = vstv %s2991_s28  ;;  %v967_v39 = vstv %s2995_s29  ;;  %s3145_s28 = sld [smem:[#allocation8 + $0xda]]  ;;  %s3149_s29 = sld [smem:[#allocation8 + $0xd9]] }
  0xd8   :  { %v997_v42 = vstv %s3000_s30  ;;  %v962_v46 = vadd.f32 %v961_v53, %v959_v33  ;;  %v966_v30 = vmul.f32 %v2570_v1, %v965_v22  ;;  %v963_v41 = vstv %s3012_s4  ;;  %s3151_s30 = sld [smem:[#allocation8 + $0xdb]]  ;;  %s3156_s4 = sld [smem:[#allocation8 + $0xdd]] }
  0xd9   :  { %vm947_vm0 = vcmp.ge.f32.partialorder %v941_v11, 0.0  ;;  %vm949_vm2 = vcmp.lt.f32.partialorder %v941_v11, %v2989_v3  ;;  %v968_v49 = vmul.f32 %v2584_v28, %v967_v39  ;;  %v998_v56 = vmul.f32 %v2570_v1, %v997_v42 }
  0xda   :  { %vm948_vm3 = vmand %vm946_vm15, %vm947_vm0  ;;  %v999_v35 = vstv %s3017_s5  ;;  %v3076_v51 = vsel %vm2967_vm10, %v888_v38, %v809_v47  ;;  %v1004_v37 = vstv %s3021_s6  ;;  %v1006_v52 = vstv %s3023_s0  ;;  %s3160_s5 = sld [smem:[#allocation8 + $0xdc]]  ;;  %s3162_s6 = sld [smem:[#allocation8 + $0xde]] }
  0xdb   :  { %vm3078_vm4 = vmand %vm948_vm3, %vm949_vm2  ;;  %v1000_v44 = vmul.f32 %v2584_v28, %v999_v35  ;;  %v3085_v54 = vadd.f32 %v956_v36, %v955_v24  ;;  %v970_v62 = vstv %s3025_s7  ;;  %v1002_v31 = vstv %s3031_s8  ;;  %s3166_s0 = sld [smem:[#allocation8 + $0xdf]]  ;;  %s3168_s7 = sld [smem:[#allocation8 + $0xe0]] }
  0xdc   :  { %v1005_v47 = vmul.f32 %v2570_v1, %v1004_v37  ;;  %v3094_v43 = vadd.f32 %v963_v41, %v962_v46  ;;  %v969_v57 = vadd.f32 %v968_v49, %v966_v30  ;;  %v1007_v60 = vmul.f32 %v2584_v28, %v1006_v52  ;;  %s3184_s8 = sld [smem:[#allocation8 + $0xe1]] }
  0xdd   :  { %v1001_v58 = vadd.f32 %v1000_v44, %v998_v56  ;;  %v3102_v55 = vsel %vm3078_vm4, %v941_v11, %v2989_v3  ;;  %v1009_v61 = vstv %s3034_s9  ;;  %v1011_v34 = vstv %s3044_s10  ;;  %s3186_s9 = sld [smem:[#allocation8 + $0xe3]]  ;;  %s3193_s10 = sld [smem:[#allocation8 + $0xe4]] }
  0xde   :  { %v1013_v5 = vstv %s3046_s11  ;;  %v1008_v2 = vadd.f32 %v1007_v60, %v1005_v47  ;;  %v1012_v4 = vmul.f32 %v2570_v1, %v1011_v34  ;;  %v973_v3 = vsel %vm3078_vm4, %v3085_v54, %v3008_v63  ;;  %s3195_s11 = sld [smem:[#allocation8 + $0xe6]] }
  0xdf   :  { %v1003_v48 = vadd.f32 %v1002_v31, %v1001_v58  ;;  %v1014_v7 = vmul.f32 %v2584_v28, %v1013_v5  ;;  %v1016_v8 = vstv %s3049_s12  ;;  %v1018_v10 = vstv %s3053_s1  ;;  %s3204_s12 = sld [smem:[#allocation8 + $0xe2]]  ;;  %s3208_s1 = sld [smem:[#allocation8 + $0xe7]] }
  0xe0   :  { %v1020_v50 = vstv %s3055_s13  ;;  %v1010_v9 = vadd.f32 %v1009_v61, %v1008_v2  ;;  %v1019_v16 = vmul.f32 %v2570_v1, %v1018_v10  ;;  %v1023_v20 = vstv %s3060_s2  ;;  %s3213_s13 = sld [smem:[#allocation8 + $0xe9]]  ;;  %s3226_s2 = sld [smem:[#allocation8 + $0xe5]]  ;;  %v3235_v10 = vld [vmem:[#allocation6] sm:$0xff] }
  0xe1   :  { %v1015_v13 = vadd.f32 %v1014_v7, %v1012_v4  ;;  %v1021_v19 = vmul.f32 %v2584_v28, %v1020_v50  ;;  %vm1025_vm1 = vcmp.gt.f32.partialorder %v1003_v48, 0.0  ;;  %v1034_v14 = vstv %s3064_s14  ;;  %v3229_v7 = vld [vmem:[#allocation2] sm:$0xff]  ;;  %s3233_s14 = sld [smem:[#allocation8 + $0xea]] }
  0xe2   :  { %v1036_v29 = vstv %s3066_s15  ;;  %vm1026_vm5 = vcmp.gt.f32.partialorder %v1010_v9, 0.0  ;;  %v1035_v6 = vmul.f32 %v2570_v1, %v1034_v14  ;;  %v3140_v25 = vadd.f32 %v970_v62, %v969_v57  ;;  %s3239_s15 = sld [smem:[#allocation8 + $0xec]] }
  0xe3   :  { %v1017_v59 = vadd.f32 %v1016_v8, %v1015_v13  ;;  %v1022_v15 = vadd.f32 %v1021_v19, %v1019_v16  ;;  %vm1027_vm6 = vmand %vm1025_vm1, %vm1026_vm5  ;;  %v1037_v45 = vmul.f32 %v2584_v28, %v1036_v29  ;;  %v1041_v12 = vstv %s3088_s16  ;;  %s3241_s16 = sld [smem:[#allocation8 + $0xed]] }
  0xe4   :  { %v1043_v18 = vstv %s3090_s17  ;;  %v1042_v0 = vmul.f32 %v2570_v1, %v1041_v12  ;;  %v1039_v33 = vstv %s3096_s18  ;;  %v1048_v40 = vstv %s3104_s19  ;;  %s3243_s17 = sld [smem:[#allocation8 + $0xe8]]  ;;  %s3249_s18 = sld [smem:[#allocation8 + $0xeb]] }
  0xe5   :  { %v1024_v26 = vadd.f32 %v1023_v20, %v1022_v15  ;;  %vm1028_vm7 = vcmp.gt.f32.partialorder %v1017_v59, 0.0  ;;  %v1044_v27 = vmul.f32 %v2584_v28, %v1043_v18  ;;  %v1038_v17 = vadd.f32 %v1037_v45, %v1035_v6  ;;  %s3252_s19 = sld [smem:[#allocation8 + $0xee]] }
  0xe6   :  { %vm1029_vm8 = vmand %vm1027_vm6, %vm1028_vm7  ;;  %v1050_v22 = vstv %s3106_s20  ;;  %v1046_v11 = vstv %s3111_s21  ;;  %v1049_v53 = vmul.f32 %v2570_v1, %v1048_v40  ;;  %v1080_v36 = vstv %s3122_s22  ;;  %s3262_s20 = sld [smem:[#allocation8 + $0xef]]  ;;  %s3264_s21 = sld [smem:[#allocation8 + $0xf0]] }
  0xe7   :  { %vm1030_vm9 = vcmp.ge.f32.partialorder %v1024_v26, 0.0  ;;  %vm1032_vm10 = vcmp.lt.f32.partialorder %v1024_v26, %v3102_v55  ;;  %v1045_v38 = vadd.f32 %v1044_v27, %v1042_v0  ;;  %v1051_v24 = vmul.f32 %v2584_v28, %v1050_v22  ;;  %s3267_s22 = sld [smem:[#allocation8 + $0xf1]] }
  0xe8   :  { %vm1031_vm11 = vmand %vm1029_vm8, %vm1030_vm9  ;;  %v1082_v39 = vstv %s3124_s23  ;;  %v974_v42 = vsel %vm3078_vm4, %v3094_v43, %v3038_v32  ;;  %v975_v46 = vsel %vm3078_vm4, %v3140_v25, %v3076_v51  ;;  %v1081_v41 = vmul.f32 %v2570_v1, %v1080_v36  ;;  %s3271_s23 = sld [smem:[#allocation8 + $0xf2]] }
  0xe9   :  { %vm3180_vm12 = vmand %vm1031_vm11, %vm1032_vm10  ;;  %v1083_v49 = vmul.f32 %v2584_v28, %v1082_v39  ;;  %v1040_v32 = vadd.f32 %v1039_v33, %v1038_v17  ;;  %v1053_v56 = vstv %s3126_s24  ;;  %v1085_v35 = vstv %s3133_s25  ;;  %s3273_s24 = sld [smem:[#allocation8 + $0xf3]]  ;;  %s3278_s25 = sld [smem:[#allocation8 + $0xf4]] }
  0xea   :  { %v1087_v44 = vstv %s3135_s26  ;;  %v1047_v37 = vadd.f32 %v1046_v11, %v1045_v38  ;;  %v1089_v31 = vstv %s3138_s27  ;;  %v1052_v47 = vadd.f32 %v1051_v24, %v1049_v53  ;;  %s3282_s26 = sld [smem:[#allocation8 + $0xf5]]  ;;  %s3284_s27 = sld [smem:[#allocation8 + $0xf6]] }
  0xeb   :  { %v1084_v52 = vadd.f32 %v1083_v49, %v1081_v41  ;;  %v1088_v62 = vmul.f32 %v2570_v1, %v1087_v44  ;;  %v3202_v43 = vsel %vm3180_vm12, %v1024_v26, %v3102_v55  ;;  %v1090_v57 = vmul.f32 %v2584_v28, %v1089_v31 }
  0xec   :  { %v1094_v58 = vstv %s3145_s28  ;;  %v1092_v61 = vstv %s3149_s29  ;;  %v1096_v5 = vstv %s3151_s30  ;;  %v3222_v55 = vsel %vm3180_vm12, %v1040_v32, %v973_v3  ;;  %s3307_s28 = sld [smem:[#allocation8 + $0xf8]]  ;;  %s3309_s29 = sld [smem:[#allocation8 + $0xf9]] }
  0xed   :  { %v1086_v60 = vadd.f32 %v1085_v35, %v1084_v52  ;;  %v1095_v34 = vmul.f32 %v2570_v1, %v1094_v58  ;;  %v1091_v48 = vadd.f32 %v1090_v57, %v1088_v62  ;;  %v1097_v2 = vmul.f32 %v2584_v28, %v1096_v5  ;;  %s3315_s30 = sld [smem:[#allocation8 + $0xf7]] }
  0xee   :  { %v1101_v4 = vstv %s3156_s4  ;;  %v1099_v1 = vstv %s3160_s5  ;;  %v1103_v63 = vstv %s3162_s6  ;;  %v1117_v50 = vstv %s3168_s7  ;;  %s3323_s4 = sld [smem:[#allocation8 + $0xfb]]  ;;  %s3325_s5 = sld [smem:[#allocation8 + $0xfc]] }
  0xef   :  { %v1102_v8 = vmul.f32 %v3229_v7, %v1101_v4  ;;  %vm1108_vm13 = vcmp.gt.f32.partialorder %v1086_v60, 0.0  ;;  %v1093_v54 = vadd.f32 %v1092_v61, %v1091_v48  ;;  %v1098_v3 = vadd.f32 %v1097_v2, %v1095_v34  ;;  %s3330_s6 = sld [smem:[#allocation8 + $0xfa]]  ;;  %s3343_s7 = sld [smem:[#allocation8 + $0xff]] }
  0xf0   :  { %v1104_v28 = vmul.f32 %v3235_v10, %v1103_v63  ;;  %v1106_v9 = vstv %s3166_s0  ;;  %v1118_v13 = vmul.f32 %v3229_v7, %v1117_v50  ;;  %v1119_v16 = vstv %s3184_s8  ;;  %s3341_s0 = sld [smem:[#allocation8 + $0xfe]]  ;;  %s3345_s8 = sld [smem:[#allocation8 + $0xfd]] }
  0xf1   :  { %v1124_v19 = vstv %s3186_s9  ;;  %v1100_v20 = vadd.f32 %v1099_v1, %v1098_v3  ;;  %vm1109_vm14 = vcmp.gt.f32.partialorder %v1093_v54, 0.0  ;;  %v1120_v29 = vmul.f32 %v3235_v10, %v1119_v16  ;;  %s3352_s9 = sld [smem:[#allocation8 + $0x180]] }
  0xf2   :  { %v1105_v14 = vadd.f32 %v1104_v28, %v1102_v8  ;;  %v3256_v59 = vsel %vm3180_vm12, %v1047_v37, %v974_v42  ;;  %vm1110_vm15 = vmand %vm1108_vm13, %vm1109_vm14  ;;  %v1125_v15 = vmul.f32 %v3229_v7, %v1124_v19  ;;  %v1126_v6 = vstv %s3193_s10  ;;  %s3354_s10 = sld [smem:[#allocation8 + $0x181]] }
  0xf3   :  { %v1131_v45 = vstv %s3195_s11  ;;  %v1054_v12 = vadd.f32 %v1053_v56, %v1052_v47  ;;  %vm1111_vm0 = vcmp.gt.f32.partialorder %v1100_v20, 0.0  ;;  %v1127_v26 = vmul.f32 %v3235_v10, %v1126_v6  ;;  %s3357_s11 = sld [smem:[#allocation8 + $0x182]] }
  0xf4   :  { %v1107_v18 = vadd.f32 %v1106_v9, %v1105_v14  ;;  %vm1112_vm2 = vmand %vm1110_vm15, %vm1111_vm0  ;;  %v1121_v0 = vadd.f32 %v1120_v29, %v1118_v13  ;;  %v1122_v27 = vstv %s3204_s12  ;;  %v1133_v17 = vstv %s3208_s1  ;;  %s3364_s12 = sld [smem:[#allocation8 + $0x184]]  ;;  %s3368_s1 = sld [smem:[#allocation8 + $0x183]] }
  0xf5   :  { %v1163_v33 = vstv %s3213_s13  ;;  %v1128_v40 = vadd.f32 %v1127_v26, %v1125_v15  ;;  %v1132_v22 = vmul.f32 %v3229_v7, %v1131_v45  ;;  %v1129_v38 = vstv %s3226_s2  ;;  %s3370_s13 = sld [smem:[#allocation8 + $0x185]]  ;;  %s3375_s2 = sld [smem:[#allocation8 + $0x187]] }
  0xf6   :  { %vm1113_vm3 = vcmp.ge.f32.partialorder %v1107_v18, 0.0  ;;  %vm1115_vm1 = vcmp.lt.f32.partialorder %v1107_v18, %v3202_v43  ;;  %v1134_v11 = vmul.f32 %v3235_v10, %v1133_v17  ;;  %v1164_v53 = vmul.f32 %v3229_v7, %v1163_v33 }
  0xf7   :  { %vm1114_vm5 = vmand %vm1112_vm2, %vm1113_vm3  ;;  %v1165_v24 = vstv %s3233_s14  ;;  %v3295_v36 = vsel %vm3180_vm12, %v1054_v12, %v975_v46  ;;  %v1170_v41 = vstv %s3239_s15  ;;  %v1172_v49 = vstv %s3241_s16  ;;  %s3379_s14 = sld [smem:[#allocation8 + $0x186]]  ;;  %s3381_s15 = sld [smem:[#allocation8 + $0x188]] }
  0xf8   :  { %vm3297_vm6 = vmand %vm1114_vm5, %vm1115_vm1  ;;  %v1166_v42 = vmul.f32 %v3235_v10, %v1165_v24  ;;  %v3304_v32 = vadd.f32 %v1122_v27, %v1121_v0  ;;  %v1136_v21 = vstv %s3243_s17  ;;  %v1168_v51 = vstv %s3249_s18  ;;  %s3385_s16 = sld [smem:[#allocation8 + $0x189]]  ;;  %s3387_s17 = sld [smem:[#allocation8 + $0x18a]] }
  0xf9   :  { %v1171_v25 = vmul.f32 %v3229_v7, %v1170_v41  ;;  %v3313_v46 = vadd.f32 %v1129_v38, %v1128_v40  ;;  %v1135_v30 = vadd.f32 %v1134_v11, %v1132_v22  ;;  %v1173_v35 = vmul.f32 %v3235_v10, %v1172_v49  ;;  %s3403_s18 = sld [smem:[#allocation8 + $0x18b]] }
  0xfa   :  { %v1167_v56 = vadd.f32 %v1166_v42, %v1164_v53  ;;  %v3321_v44 = vsel %vm3297_vm6, %v1107_v18, %v3202_v43  ;;  %v1175_v37 = vstv %s3252_s19  ;;  %v1177_v52 = vstv %s3262_s20  ;;  %s3405_s19 = sld [smem:[#allocation8 + $0x18d]]  ;;  %s3410_s20 = sld [smem:[#allocation8 + $0x18c]] }
  0xfb   :  { %v1179_v62 = vstv %s3264_s21  ;;  %v1174_v47 = vadd.f32 %v1173_v35, %v1171_v25  ;;  %v1178_v57 = vmul.f32 %v3229_v7, %v1177_v52  ;;  %v1139_v43 = vsel %vm3297_vm6, %v3304_v32, %v3222_v55  ;;  %s3414_s21 = sld [smem:[#allocation8 + $0x18e]] }
  0xfc   :  { %v1169_v31 = vadd.f32 %v1168_v51, %v1167_v56  ;;  %v1180_v58 = vmul.f32 %v3235_v10, %v1179_v62  ;;  %v1182_v60 = vstv %s3267_s22  ;;  %v1184_v61 = vstv %s3271_s23  ;;  %s3416_s22 = sld [smem:[#allocation8 + $0x190]]  ;;  %s3429_s23 = sld [smem:[#allocation8 + $0x191]] }
  0xfd   :  { %v1186_v34 = vstv %s3273_s24  ;;  %v1176_v5 = vadd.f32 %v1175_v37, %v1174_v47  ;;  %v1185_v2 = vmul.f32 %v3229_v7, %v1184_v61  ;;  %v1189_v1 = vstv %s3278_s25  ;;  %s3434_s24 = sld [smem:[#allocation8 + $0x193]]  ;;  %s3445_s25 = sld [smem:[#allocation8 + $0x18f]] }
  0xfe   :  { %v1181_v48 = vadd.f32 %v1180_v58, %v1178_v57  ;;  %v1187_v4 = vmul.f32 %v3235_v10, %v1186_v34  ;;  %vm1191_vm4 = vcmp.gt.f32.partialorder %v1169_v31, 0.0  ;;  %v1200_v8 = vstv %s3282_s26  ;;  %s3452_s26 = sld [smem:[#allocation8 + $0x194]] }
  0xff   :  { %v1202_v63 = vstv %s3284_s27  ;;  %vm1192_vm7 = vcmp.gt.f32.partialorder %v1176_v5, 0.0  ;;  %v1201_v28 = vmul.f32 %v3229_v7, %v1200_v8  ;;  %v3359_v50 = vadd.f32 %v1136_v21, %v1135_v30  ;;  %s3456_s27 = sld [smem:[#allocation8 + $0x196]] }
 0x100   :  { %v1183_v54 = vadd.f32 %v1182_v60, %v1181_v48  ;;  %v1188_v3 = vadd.f32 %v1187_v4, %v1185_v2  ;;  %vm1193_vm8 = vmand %vm1191_vm4, %vm1192_vm7  ;;  %v1203_v9 = vmul.f32 %v3235_v10, %v1202_v63  ;;  %v1207_v13 = vstv %s3307_s28  ;;  %s3458_s28 = sld [smem:[#allocation8 + $0x197]] }
 0x101   :  { %v1209_v16 = vstv %s3309_s29  ;;  %v1208_v20 = vmul.f32 %v3229_v7, %v1207_v13  ;;  %v1205_v15 = vstv %s3315_s30  ;;  %v1214_v6 = vstv %s3323_s4  ;;  %s3460_s29 = sld [smem:[#allocation8 + $0x192]]  ;;  %s3466_s30 = sld [smem:[#allocation8 + $0x195]] }
 0x102   :  { %v1190_v19 = vadd.f32 %v1189_v1, %v1188_v3  ;;  %vm1194_vm9 = vcmp.gt.f32.partialorder %v1183_v54, 0.0  ;;  %v1210_v14 = vmul.f32 %v3235_v10, %v1209_v16  ;;  %v1204_v29 = vadd.f32 %v1203_v9, %v1201_v28  ;;  %s3469_s4 = sld [smem:[#allocation8 + $0x198]] }
 0x103   :  { %vm1195_vm10 = vmand %vm1193_vm8, %vm1194_vm9  ;;  %v1216_v45 = vstv %s3325_s5  ;;  %v1212_v18 = vstv %s3330_s6  ;;  %v1215_v26 = vmul.f32 %v3229_v7, %v1214_v6  ;;  %v1246_v27 = vstv %s3341_s0  ;;  %s3476_s5 = sld [smem:[#allocation8 + $0x199]]  ;;  %s3478_s6 = sld [smem:[#allocation8 + $0x19a]] }
 0x104   :  { %vm1196_vm11 = vcmp.ge.f32.partialorder %v1190_v19, 0.0  ;;  %vm1198_vm12 = vcmp.lt.f32.partialorder %v1190_v19, %v3321_v44  ;;  %v1211_v12 = vadd.f32 %v1210_v14, %v1208_v20  ;;  %v1217_v0 = vmul.f32 %v3235_v10, %v1216_v45  ;;  %s3481_s0 = sld [smem:[#allocation8 + $0x19b]] }
 0x105   :  { %vm1197_vm13 = vmand %vm1195_vm10, %vm1196_vm11  ;;  %v1248_v17 = vstv %s3343_s7  ;;  %v1140_v33 = vsel %vm3297_vm6, %v3313_v46, %v3256_v59  ;;  %v1141_v40 = vsel %vm3297_vm6, %v3359_v50, %v3295_v36  ;;  %v1247_v38 = vmul.f32 %v3229_v7, %v1246_v27  ;;  %s3494_s7 = sld [smem:[#allocation8 + $0x19c]] }
 0x106   :  { %vm3399_vm14 = vmand %vm1197_vm13, %vm1198_vm12  ;;  %v1249_v11 = vmul.f32 %v3235_v10, %v1248_v17  ;;  %v1206_v53 = vadd.f32 %v1205_v15, %v1204_v29  ;;  %v1219_v24 = vstv %s3345_s8  ;;  %v1251_v42 = vstv %s3352_s9  ;;  %s3496_s9 = sld [smem:[#allocation8 + $0x19d]]  ;;  %s3529_s8 = sld [smem:[#allocation8 + $0x1a3]] }
 0x107   :  { %v1253_v41 = vstv %s3354_s10  ;;  %v1213_v49 = vadd.f32 %v1212_v18, %v1211_v12  ;;  %v1255_v25 = vstv %s3357_s11  ;;  %v3420_v30 = vadd.f32 %v1217_v0, %v1215_v26  ;;  %s3501_s10 = sld [smem:[#allocation8 + $0x19e]]  ;;  %s3506_s11 = sld [smem:[#allocation8 + $0x19f]] }
 0x108   :  { %v1250_v21 = vadd.f32 %v1249_v11, %v1247_v38  ;;  %v1254_v51 = vmul.f32 %v3229_v7, %v1253_v41  ;;  %v3425_v56 = vsel %vm3399_vm14, %v1190_v19, %v3321_v44  ;;  %v1256_v35 = vmul.f32 %v3235_v10, %v1255_v25 }
 0x109   :  { %v1260_v37 = vstv %s3364_s12  ;;  %v1258_v62 = vstv %s3368_s1  ;;  %v1262_v47 = vstv %s3370_s13  ;;  %v3443_v44 = vsel %vm3399_vm14, %v1206_v53, %v1139_v43  ;;  %s3508_s12 = sld [smem:[#allocation8 + $0x1a0]]  ;;  %s3521_s1 = sld [smem:[#allocation8 + $0x1a1]] }
 0x10a   :  { %v1252_v52 = vadd.f32 %v1251_v42, %v1250_v21  ;;  %v1261_v31 = vmul.f32 %v3229_v7, %v1260_v37  ;;  %v1257_v57 = vadd.f32 %v1256_v35, %v1254_v51  ;;  %v1263_v58 = vmul.f32 %v3235_v10, %v1262_v47  ;;  %s3527_s13 = sld [smem:[#allocation8 + $0x1a2]] }
 0x10b   :  { %v1267_v60 = vstv %s3375_s2  ;;  %v1265_v61 = vstv %s3379_s14  ;;  %v1269_v5 = vstv %s3381_s15  ;;  %v1283_v48 = vstv %s3387_s17  ;;  %s3540_s2 = sld [smem:[#allocation8 + $0x1a4]]  ;;  %s3547_s14 = sld [smem:[#allocation8 + $0x1a5]] }
 0x10c   :  { %v1268_v34 = vmul.f32 %v3229_v7, %v1267_v60  ;;  %vm1274_vm15 = vcmp.gt.f32.partialorder %v1252_v52, 0.0  ;;  %v1259_v55 = vadd.f32 %v1258_v62, %v1257_v57  ;;  %v1264_v32 = vadd.f32 %v1263_v58, %v1261_v31  ;;  %s3549_s15 = sld [smem:[#allocation8 + $0x1a6]]  ;;  %s1856_s17 = smov [#allocation9]  }
 0x10d   :  { %v1270_v43 = vmul.f32 %v3235_v10, %v1269_v5  ;;  %v1272_v2 = vstv %s3385_s16  ;;  %v1284_v4 = vmul.f32 %v3229_v7, %v1283_v48  ;;  %v1285_v1 = vstv %s3403_s18  ;;  %s3559_s16 = sld [smem:[#allocation8 + $0x1a7]]  ;;  %s1406_s18 = sshll.u32 %s1856_s17, 4  ;;  %s1407_s18 = int_to_ptr.vmem [resolvable:$true] %s1406_s18 }
 0x10e   :  { %v1290_v8 = vstv %s3405_s19  ;;  %v1266_v63 = vadd.f32 %v1265_v61, %v1264_v32  ;;  %vm1275_vm0 = vcmp.gt.f32.partialorder %v1259_v55, 0.0  ;;  %v1286_v3 = vmul.f32 %v3235_v10, %v1285_v1  ;;  %s1822_s19 = scalar_lea.vmem %s1407_s18, 1024  ;;  %p1827_p8 = scmp.lt.s32.totalorder %s1407_s18, %s1407_s18 }
 0x10f   :  { %v1271_v54 = vadd.f32 %v1270_v43, %v1268_v34  ;;  %vm1276_vm2 = vmand %vm1274_vm15, %vm1275_vm0  ;;  %v1288_v28 = vstv %s3410_s20  ;;  %v1291_v9 = vmul.f32 %v3229_v7, %v1290_v8  ;;  %v1292_v13 = vstv %s3414_s21  ;;  %p1823_p7 = scmp.ne.s32.totalorder %s1407_s18, %s1822_s19  ;;  %p1828_p9 = scmp.lt.s32.totalorder %s1822_s19, %s1822_s19 }
 0x110   :  { %v1297_v16 = vstv %s3416_s22  ;;  %vm1277_vm3 = vcmp.gt.f32.partialorder %v1266_v63, 0.0  ;;  %v1287_v20 = vadd.f32 %v1286_v3, %v1284_v4  ;;  %v1293_v14 = vmul.f32 %v3235_v10, %v1292_v13 }
 0x111   :  { %v1273_v19 = vadd.f32 %v1272_v2, %v1271_v54  ;;  %v3490_v29 = vsel %vm3399_vm14, %v1213_v49, %v1140_v33  ;;  %vm1278_vm1 = vmand %vm1276_vm2, %vm1277_vm3  ;;  %v1298_v15 = vmul.f32 %v3229_v7, %v1297_v16  ;;  %v1299_v6 = vstv %s3429_s23  ;;  %p1829_p10 = por %p1828_p9, %p1827_p8 }
 0x112   :  { %v1329_v45 = vstv %s3434_s24  ;;  %v1294_v59 = vadd.f32 %v1293_v14, %v1291_v9  ;;  %v1295_v46 = vstv %s3445_s25  ;;  %v3503_v12 = vadd.f32 %v1288_v28, %v1287_v20 }
 0x113   :  { %vm1279_vm5 = vcmp.ge.f32.partialorder %v1273_v19, 0.0  ;;  %vm1281_vm4 = vcmp.lt.f32.partialorder %v1273_v19, %v3425_v56  ;;  %v1300_v18 = vmul.f32 %v3235_v10, %v1299_v6  ;;  %v1330_v26 = vmul.f32 %v3229_v7, %v1329_v45  ;;  %p1830_p11 = pnand %p1829_p10, %p1823_p7 }
 0x114   :  { %vm1280_vm7 = vmand %vm1278_vm1, %vm1279_vm5  ;;  %v1331_v0 = vstv %s3452_s26  ;;  %v3515_v27 = vadd.f32 %v1219_v24, %v3420_v30  ;;  %v1336_v38 = vstv %s3456_s27  ;;  %v1338_v11 = vstv %s3458_s28 }
 0x115   :  { %vm3517_vm8 = vmand %vm1280_vm7, %vm1281_vm4  ;;  %v1332_v33 = vmul.f32 %v3235_v10, %v1331_v0  ;;  %v1301_v53 = vadd.f32 %v1300_v18, %v1298_v15  ;;  %v1302_v42 = vstv %s3460_s29  ;;  %v1334_v24 = vstv %s3466_s30 }
 0x116   :  { %v1337_v41 = vmul.f32 %v3229_v7, %v1336_v38  ;;  %v3533_v49 = vadd.f32 %v1295_v46, %v1294_v59  ;;  %v3538_v21 = vsel %vm3517_vm8, %v1273_v19, %v3425_v56  ;;  %v1339_v25 = vmul.f32 %v3235_v10, %v1338_v11 }
 0x117   :  { %v1333_v51 = vadd.f32 %v1332_v33, %v1330_v26  ;;  %v1305_v30 = vsel %vm3517_vm8, %v3503_v12, %v3443_v44  ;;  %v1341_v35 = vstv %s3469_s4  ;;  %v1343_v56 = vstv %s3476_s5 }
 0x118   :  { %v1345_v37 = vstv %s3478_s6  ;;  %v1340_v62 = vadd.f32 %v1339_v25, %v1337_v41  ;;  %v1344_v31 = vmul.f32 %v3229_v7, %v1343_v56  ;;  %v1303_v57 = vadd.f32 %v1302_v42, %v1301_v53 }
 0x119   :  { %v1335_v52 = vadd.f32 %v1334_v24, %v1333_v51  ;;  %v1346_v47 = vmul.f32 %v3235_v10, %v1345_v37  ;;  %v1348_v58 = vstv %s3481_s0  ;;  %v1350_v60 = vstv %s3494_s7 }
 0x11a   :  { %v1352_v44 = vstv %s3496_s9  ;;  %v1342_v61 = vadd.f32 %v1341_v35, %v1340_v62  ;;  %v1351_v5 = vmul.f32 %v3229_v7, %v1350_v60  ;;  %v1355_v32 = vstv %s3501_s10 }
 0x11b   :  { %v1347_v34 = vadd.f32 %v1346_v47, %v1344_v31  ;;  %v1353_v55 = vmul.f32 %v3235_v10, %v1352_v44  ;;  %vm1357_vm9 = vcmp.gt.f32.partialorder %v1335_v52, 0.0  ;;  %v1366_v43 = vstv %s3506_s11 }
 0x11c   :  { %v1368_v48 = vstv %s3508_s12  ;;  %vm1358_vm10 = vcmp.gt.f32.partialorder %v1342_v61, 0.0  ;;  %v1367_v1 = vmul.f32 %v3229_v7, %v1366_v43  ;;  %v1371_v63 = vstv %s3521_s1 }
 0x11d   :  { %v1349_v2 = vadd.f32 %v1348_v58, %v1347_v34  ;;  %v1354_v4 = vadd.f32 %v1353_v55, %v1351_v5  ;;  %vm1359_vm11 = vmand %vm1357_vm9, %vm1358_vm10  ;;  %v1369_v8 = vmul.f32 %v3235_v10, %v1368_v48  ;;  %v1373_v54 = vstv %s3527_s13 }
 0x11e   :  { %v1375_v3 = vstv %s3529_s8  ;;  %v1374_v9 = vmul.f32 %v3229_v7, %v1373_v54  ;;  %v1378_v19 = vstv %s3540_s2  ;;  %v1380_v20 = vstv %s3547_s14 }
 0x11f   :  { %v1356_v28 = vadd.f32 %v1355_v32, %v1354_v4  ;;  %vm1360_vm12 = vcmp.gt.f32.partialorder %v1349_v2, 0.0  ;;  %v1376_v13 = vmul.f32 %v3235_v10, %v1375_v3  ;;  %v1370_v16 = vadd.f32 %v1369_v8, %v1367_v1 }
 0x120   :  { %vm1361_vm13 = vmand %vm1359_vm11, %vm1360_vm12  ;;  %v1382_v14 = vstv %s3549_s15  ;;  %v1381_v6 = vmul.f32 %v3229_v7, %v1380_v20  ;;  %v1224_v45 = vsel %vm3399_vm14, %v3515_v27, %v1141_v40  ;;  %v1306_v59 = vsel %vm3517_vm8, %v3533_v49, %v3490_v29 }
 0x121   :  { %vm1362_vm15 = vcmp.ge.f32.partialorder %v1356_v28, 0.0  ;;  %vm1364_vm0 = vcmp.lt.f32.partialorder %v1356_v28, %v3538_v21  ;;  %v1377_v15 = vadd.f32 %v1376_v13, %v1374_v9  ;;  %v1372_v46 = vadd.f32 %v1371_v63, %v1370_v16 }
 0x122   :  { %vm1363_vm2 = vmand %vm1361_vm13, %vm1362_vm15  ;;  %v1383_v12 = vmul.f32 %v3235_v10, %v1382_v14  ;;  %v1385_v18 = vstv %s3559_s16  ;;  %v1307_v22 = vsel %vm3517_vm8, %v1303_v57, %v1224_v45 }
 0x123   :  { %vm3591_vm3 = vmand %vm1363_vm2, %vm1364_vm0  ;;  %v1379_v39 = vadd.f32 %v1378_v19, %v1377_v15 }
 0x124   :  { %v1384_v36 = vadd.f32 %v1383_v12, %v1381_v6  ;;  %v1387_v50 = vsel %vm3591_vm3, %v1356_v28, %v3538_v21  ;;  %v1388_v40 = vsel %vm3591_vm3, %v1372_v46, %v1305_v30 }
 0x125   :  { %v1389_v10 = vsel %vm3591_vm3, %v1379_v39, %v1306_v59  ;;  %vm1391_vm6 = vcmp.lt.f32.partialorder %v1387_v50, 1e+30  ;;  %1394 = vst [vmem:[#allocation9 + $0x20] sm:$0xff] %v1388_v40 }
 0x126   :  { %v1386_v29 = vadd.f32 %v1385_v18, %v1384_v36  ;;  %v1392_v26 = vsel %vm1391_vm6, 1.0, %v1855_v23  ;;  %1396 = vst [vmem:[#allocation9 + $0x28] sm:$0xff] %v1389_v10 }
 0x127   :  { %1400 = vst [vmem:[#allocation9 + $0x38] sm:$0xff] %v1392_v26 }
 0x128   :  { %v1390_v0 = vsel %vm3591_vm3, %v1386_v29, %v1307_v22 }
 0x129   :  { %1398 = vst [vmem:[#allocation9 + $0x30] sm:$0xff] %v1390_v0 }
 0x12a   :  { %1833 = shalt.err (!%p1830_p11)
}
 0x12b   :  { %s1834_s22 = scalar_lea.hbm %s3623_s3, 1024 }
 0x12c   :  { %p1835_p12 = scmp.ne.s32.totalorder %s3623_s3, %s1834_s22  ;;  %p1838_p13 = scmp.lt.u32.totalorder %s1834_s22, %s3623_s3 }
 0x12e   :  { %p1840_p0 = pnand %p1838_p13, %p1835_p12 }
 0x130   :  { %1843 = shalt.err (!%p1840_p0)
}
 0x131   :  { %s1857_s27 = smov 128   ;;  %s1858_s28 = smov 8  }
 0x132   :  { %1412 = dma.vmem_to_hbm [thread:$0]  %s1407_s18, 1024, %s3623_s3, [#allocation4], %s1857_s27, %s1857_s27, %s1858_s28  }
 0x133   :  { %1850 = dma.done.wait [#allocation4], 1024  }
 0x134   :  { %1851 = vsyncadd [#allocation4], 4294966272 }
 0x135   :  { %1416 = vsyncpa [#allocation3], 1 }
 0x136   :  { %1417 = vsyncpa [#allocation7], 1 }
 0x137   :  { %1418 = vsyncpa [#allocation4], 1 }
 0x138   :  { %1419 = vsyncpa [#allocation5], 1 }

</bundles_post_ra>
